<compile_context>
chip_gen: v6e
topology: v6e:2x2x1
jax: 0.10.0
libtpu: 0.0.40
codegen_flags: <defaults>
</compile_context>

<pallas_src>
import functools
import math

import jax
import jax.numpy as jnp
from jax import lax
from jax.experimental import pallas as pl
from jax.experimental.pallas import tpu as pltpu


# ----------------------------------------------------------------------------
# In-kernel helpers
# ----------------------------------------------------------------------------
def _mm(x, w):
    """bf16 MXU matmul with f32 accumulation: x @ w (2-D operands)."""
    return lax.dot_general(
        x.astype(jnp.bfloat16), w.astype(jnp.bfloat16),
        (((x.ndim - 1,), (0,)), ((), ())),
        preferred_element_type=jnp.float32)


def _bqk(q, k):
    """Batched (over dim 0) q @ k^T contracting the last dims: (b,n,d),(b,m,d)->(b,n,m)."""
    return lax.dot_general(
        q.astype(jnp.bfloat16), k.astype(jnp.bfloat16),
        (((2,), (2,)), ((0,), (0,))),
        preferred_element_type=jnp.float32)


def _bpv(p, v):
    """Batched (over dim 0) p @ v: (b,n,m),(b,m,d)->(b,n,d)."""
    return lax.dot_general(
        p.astype(jnp.bfloat16), v.astype(jnp.bfloat16),
        (((2,), (1,)), ((0,), (0,))),
        preferred_element_type=jnp.float32)


def _layernorm(x, g, b, eps=1e-5):
    x = x.astype(jnp.float32)
    mu = jnp.mean(x, axis=-1, keepdims=True)
    xc = x - mu
    var = jnp.mean(xc * xc, axis=-1, keepdims=True)
    return xc * lax.rsqrt(var + eps) * g + b


def _gelu_tanh(x):
    # tanh-approximate GELU (transcendental lands on the EUP slot).
    c = math.sqrt(2.0 / math.pi)
    return 0.5 * x * (1.0 + jnp.tanh(c * (x + 0.044715 * x * x * x)))


# ----------------------------------------------------------------------------
# Fused YOGO kernel: ViT (per grid step: bt batch elements) + grasp MLP (step 0)
# ----------------------------------------------------------------------------
def _yogo_kernel(
    patches_ref, cls_mask_ref, pos_ref,
    p_ln1_g_ref, p_ln1_b_ref, patch_w_ref, patch_b_ref, p_ln2_g_ref, p_ln2_b_ref,
    cls_ref,
    attn_ln_g_ref, attn_ln_b_ref, w_qkv_ref, w_out_ref, b_out_ref,
    ff_ln_g_ref, ff_ln_b_ref, ff_w1_ref, ff_b1_ref, ff_w2_ref, ff_b2_ref,
    head_ln_g_ref, head_ln_b_ref, head_w_ref, head_b_ref,
    gfeat_ref, gw1_ref, gb1_ref, gw2_ref, gb2_ref, gw3_ref, gb3_ref, gw4_ref, gb4_ref,
    scene_o_ref, grasp_o_ref,
    *, depth, heads, dim_head, bt, n_pad, n_tok):
    inner = heads * dim_head
    scale = dim_head ** -0.5
    rows = bt * n_pad

    # --- patch embedding: LN -> Linear -> LN on all bt*n_pad flattened rows.
    #     cls-placeholder / pad rows carry junk-but-finite values; pad keys are
    #     masked in attention and cls rows are overwritten with the cls token.
    p = patches_ref[...]                                                  # (rows, patch_dim)
    p = _layernorm(p, p_ln1_g_ref[...], p_ln1_b_ref[...])
    p = _mm(p, patch_w_ref[...]) + patch_b_ref[...]
    p = _layernorm(p, p_ln2_g_ref[...], p_ln2_b_ref[...])                 # (rows, dim)

    x = jnp.where(cls_mask_ref[...] > 0.5, cls_ref[...], p) + pos_ref[...]

    # key-padding mask: token index within each element < n_tok (real tokens)
    kcol = lax.broadcasted_iota(jnp.int32, (bt, n_pad, n_pad), 2)
    kmask = kcol < n_tok

    # --- transformer blocks (static unroll over small depth / heads)
    for l in range(depth):
        # pre-norm multi-head attention; one wide QKV matmul for all rows
        y = _layernorm(x, attn_ln_g_ref[pl.ds(l, 1), :], attn_ln_b_ref[pl.ds(l, 1), :])
        qkv = _mm(y, w_qkv_ref[l])                                        # (rows, 3*inner)
        q = (qkv[:, :inner] * scale).reshape(bt, n_pad, inner)            # scale folded into q
        k = qkv[:, inner:2 * inner].reshape(bt, n_pad, inner)
        v = qkv[:, 2 * inner:3 * inner].reshape(bt, n_pad, inner)

        o_heads = []
        for h in range(heads):
            # NOTE: odd-h slices start at a 64-lane offset (one XLU lane rotate
            # each) -- unavoidable when dim_head=64 < 128 lanes.
            sl = slice(h * dim_head, (h + 1) * dim_head)
            s = _bqk(q[..., sl], k[..., sl])                               # (bt, np, np) f32
            s = jnp.where(kmask, s, -1e30)
            s = s - jnp.max(s, axis=-1, keepdims=True)
            e = jnp.exp(s)
            prob = e * pl.reciprocal(jnp.sum(e, axis=-1, keepdims=True), approx=True)
            o_heads.append(_bpv(prob, v[..., sl]))                         # (bt, np, dh)
        # heads concatenated along lanes (heads*dh = 128) -> ONE out-proj matmul
        o = o_heads[0] if heads == 1 else jnp.concatenate(o_heads, axis=-1)
        o = o.reshape(rows, inner)
        x = x + _mm(o, w_out_ref[l]) + b_out_ref[pl.ds(l, 1), :]           # residual

        # pre-norm feed-forward with tanh-approx GELU
        y = _layernorm(x, ff_ln_g_ref[pl.ds(l, 1), :], ff_ln_b_ref[pl.ds(l, 1), :])
        y = _mm(y, ff_w1_ref[l]) + ff_b1_ref[pl.ds(l, 1), :]
        y = _gelu_tanh(y)
        y = _mm(y, ff_w2_ref[l]) + ff_b2_ref[pl.ds(l, 1), :]
        x = x + y                                                          # residual

    # --- cls pooling (rows b*n_pad are 8-aligned single-row slices) + LN + head
    cls_rows = [x[b * n_pad:b * n_pad + 1, :] for b in range(bt)]
    c = cls_rows[0] if bt == 1 else jnp.concatenate(cls_rows, axis=0)      # (bt, dim)
    c = _layernorm(c, head_ln_g_ref[...], head_ln_b_ref[...])
    scene_o_ref[...] = (_mm(c, head_w_ref[...]) + head_b_ref[...]).astype(scene_o_ref.dtype)

    # --- grasp-encoder MLP fused into the same call (no 2nd kernel launch).
    #     Computed once on grid step 0; its resident output block persists.
    @pl.when(pl.program_id(0) == 0)
    def _():
        g = gfeat_ref[...]
        h1 = jnp.maximum(_mm(g, gw1_ref[...]) + gb1_ref[...], 0.0)
        h2 = jnp.maximum(_mm(h1, gw2_ref[...]) + gb2_ref[...], 0.0)
        h3 = jnp.maximum(_mm(h2, gw3_ref[...]) + gb3_ref[...], 0.0)
        grasp_o_ref[...] = (_mm(h3, gw4_ref[...]) + gb4_ref[...]).astype(grasp_o_ref.dtype)


# ----------------------------------------------------------------------------
# Top-level forward (single fused pallas_call)
# ----------------------------------------------------------------------------
def yogo_forward(params, cfg, scene_image, success_grasp, failure_grasp):
    vp, gp = params["vit"], params["grasp"]
    B, C, H, W = scene_image.shape
    ps = cfg["patch_size"]
    gh, gw = H // ps, W // ps
    n = gh * gw
    n_tok = n + 1
    n_pad = ((n_tok + 7) // 8) * 8           # pad tokens to a sublane multiple
    dim = cfg["dim"]
    patch_dim = ps * ps * C
    depth, heads, dh = cfg["depth"], cfg["heads"], cfg["dim_head"]
    inner = heads * dh
    mlp = cfg["mlp_dim"]
    E = cfg["scene_embed_dim"]
    gE = cfg["grasp_embed_dim"]
    gd = cfg["grasp_dim"]

    # batch elements per grid step (whole batch at toy size -> single grid step)
    bt = B if B <= 8 else next(d for d in (8, 4, 2, 1) if B % d == 0)
    assert B % bt == 0
    steps = B // bt
    rows = bt * n_pad

    # ---- XLA-side layout glue (tiny, one-time) ------------------------------
    # 'b c (h p1) (w p2) -> b (h w) (p1 p2 c)'
    x = scene_image.reshape(B, C, gh, ps, gw, ps)
    x = jnp.transpose(x, (0, 2, 4, 3, 5, 1)).reshape(B, n, patch_dim).astype(jnp.float32)
    # per element: row 0 = cls placeholder, rows 1..n = patches, rest = zero padding
    patches = jnp.zeros((B, n_pad, patch_dim), jnp.float32).at[:, 1:n_tok, :].set(x)
    patches = patches.reshape(B * n_pad, patch_dim)

    pos = jnp.zeros((n_pad, dim), jnp.float32).at[:n_tok, :].set(
        vp["pos_embedding"].reshape(n_tok, dim))
    pos_tiled = jnp.tile(pos, (bt, 1))                                      # (rows, dim)
    cls_mask = (jnp.arange(rows) % n_pad == 0).astype(jnp.float32)[:, None]  # (rows, 1)

    assert success_grasp.shape[0] == failure_grasp.shape[0]
    Bg = success_grasp.shape[0]
    g = jnp.concatenate([success_grasp, failure_grasp], axis=0)             # (2Bg, gd)
    gfeat = jnp.concatenate([g, jnp.sin(g), jnp.cos(g)], axis=1).astype(jnp.float32)
    n_grasp = gfeat.shape[0]

    bf16 = lambda a: a.astype(jnp.bfloat16)
    args = (
        patches, cls_mask, pos_tiled,
        vp["patch_ln1_g"].reshape(1, patch_dim), vp["patch_ln1_b"].reshape(1, patch_dim),
        bf16(vp["patch_w"]), vp["patch_b"].reshape(1, dim),
        vp["patch_ln2_g"].reshape(1, dim), vp["patch_ln2_b"].reshape(1, dim),
        vp["cls_token"].reshape(1, dim),
        vp["attn_ln_g"], vp["attn_ln_b"],
        bf16(vp["w_qkv"]), bf16(vp["w_out"]), vp["b_out"],
        vp["ff_ln_g"], vp["ff_ln_b"],
        bf16(vp["ff_w1"]), vp["ff_b1"], bf16(vp["ff_w2"]), vp["ff_b2"],
        vp["head_ln_g"].reshape(1, dim), vp["head_ln_b"].reshape(1, dim),
        bf16(vp["head_w"]), vp["head_b"].reshape(1, E),
        gfeat,
        bf16(gp["w1"]), gp["b1"].reshape(1, -1),
        bf16(gp["w2"]), gp["b2"].reshape(1, -1),
        bf16(gp["w3"]), gp["b3"].reshape(1, -1),
        bf16(gp["w4"]), gp["b4"].reshape(1, -1),
    )

    def _resident(a):
        # whole array in VMEM, same block every grid step -> fetched once
        nd = a.ndim
        return pl.BlockSpec(a.shape, lambda i: (0,) * nd)

    in_specs = [pl.BlockSpec((rows, patch_dim), lambda i: (i, 0))]
    in_specs += [_resident(a) for a in args[1:]]

    out_shape = (jax.ShapeDtypeStruct((B, E), jnp.float32),
                 jax.ShapeDtypeStruct((n_grasp, gE), jnp.float32))
    out_specs = (pl.BlockSpec((bt, E), lambda i: (i, 0)),
                 pl.BlockSpec((n_grasp, gE), lambda i: (0, 0)))

    flops = 2 * B * n_pad * (patch_dim * dim
                             + depth * (dim * 3 * inner + inner * dim + 2 * dim * mlp))
    flops += 2 * B * depth * heads * 2 * n_pad * n_pad * dh
    flops += 2 * B * dim * E
    flops += 2 * n_grasp * (3 * gd * 256 + 2 * 256 * 256 + 256 * gE)
    transcendentals = B * depth * (heads * n_pad * n_pad + n_pad * mlp)
    bytes_accessed = (sum(int(a.size) * a.dtype.itemsize for a in args)
                      + B * E * 4 + n_grasp * gE * 4)

    scene_out, grasp_out = pl.pallas_call(
        functools.partial(_yogo_kernel, depth=depth, heads=heads, dim_head=dh,
                          bt=bt, n_pad=n_pad, n_tok=n_tok),
        grid=(steps,),
        in_specs=in_specs,
        out_specs=out_specs,
        out_shape=out_shape,
        compiler_params=pltpu.CompilerParams(
            # "arbitrary": grid is a single step at toy size, and the fused grasp
            # output block is written once (step 0) and kept resident.
            dimension_semantics=("arbitrary",),
            # raise v5e's 16 MiB scoped-VMEM default; equals the v6e/v7x default.
            vmem_limit_bytes=32 * 1024 * 1024),
        cost_estimate=pl.CostEstimate(flops=int(flops),
                                      transcendentals=int(transcendentals),
                                      bytes_accessed=int(bytes_accessed)),
    )(*args)

    return scene_out, grasp_out[:Bg], grasp_out[Bg:]


# ----------------------------------------------------------------------------
# Deterministic parameter init (synthetic weights; per-layer params stacked on depth)
# ----------------------------------------------------------------------------
def init_params(key, cfg):
    def nrm(k, shape, scale=0.02):
        return scale * jax.random.normal(k, shape, dtype=jnp.float32)

    keys = iter(jax.random.split(key, 64))
    ps, C, dim = cfg["patch_size"], cfg["channels"], cfg["dim"]
    patch_dim = ps * ps * C
    n = (cfg["image_size"] // ps) ** 2
    inner = cfg["heads"] * cfg["dim_head"]
    depth, mlp = cfg["depth"], cfg["mlp_dim"]

    vit = {
        "patch_ln1_g": jnp.ones((patch_dim,), jnp.float32),
        "patch_ln1_b": jnp.zeros((patch_dim,), jnp.float32),
        "patch_w": nrm(next(keys), (patch_dim, dim)),
        "patch_b": jnp.zeros((dim,), jnp.float32),
        "patch_ln2_g": jnp.ones((dim,), jnp.float32),
        "patch_ln2_b": jnp.zeros((dim,), jnp.float32),
        "cls_token": nrm(next(keys), (1, 1, dim), 1.0),
        "pos_embedding": nrm(next(keys), (1, n + 1, dim), 1.0),
        "head_ln_g": jnp.ones((dim,), jnp.float32),
        "head_ln_b": jnp.zeros((dim,), jnp.float32),
        "head_w": nrm(next(keys), (dim, cfg["scene_embed_dim"])),
        "head_b": jnp.zeros((cfg["scene_embed_dim"],), jnp.float32),
        # per-layer params stacked along a leading depth axis
        "attn_ln_g": jnp.ones((depth, dim), jnp.float32),
        "attn_ln_b": jnp.zeros((depth, dim), jnp.float32),
        "w_qkv": nrm(next(keys), (depth, dim, 3 * inner)),
        "w_out": nrm(next(keys), (depth, inner, dim)),
        "b_out": jnp.zeros((depth, dim), jnp.float32),
        "ff_ln_g": jnp.ones((depth, dim), jnp.float32),
        "ff_ln_b": jnp.zeros((depth, dim), jnp.float32),
        "ff_w1": nrm(next(keys), (depth, dim, mlp)),
        "ff_b1": jnp.zeros((depth, mlp), jnp.float32),
        "ff_w2": nrm(next(keys), (depth, mlp, dim)),
        "ff_b2": jnp.zeros((depth, dim), jnp.float32),
    }

    gd = cfg["grasp_dim"]
    grasp = {
        "w1": nrm(next(keys), (3 * gd, 256)), "b1": jnp.zeros((256,), jnp.float32),
        "w2": nrm(next(keys), (256, 256)),    "b2": jnp.zeros((256,), jnp.float32),
        "w3": nrm(next(keys), (256, 256)),    "b3": jnp.zeros((256,), jnp.float32),
        "w4": nrm(next(keys), (256, cfg["grasp_embed_dim"])),
        "b4": jnp.zeros((cfg["grasp_embed_dim"],), jnp.float32),
    }
    return {"vit": vit, "grasp": grasp}


# ----------------------------------------------------------------------------
if __name__ == "__main__":
    # Small config consistent with the module (scaled-down ViT hyperparams).
    cfg = dict(
        image_size=16, patch_size=8, channels=3,
        dim=32, depth=2, heads=2, dim_head=64, mlp_dim=64,
        scene_embed_dim=16, grasp_dim=7, grasp_embed_dim=16,
    )

    root = jax.random.PRNGKey(0)
    k_param, k_img, k_sg, k_fg = jax.random.split(root, 4)

    params = init_params(k_param, cfg)

    B = 2
    scene_image = jax.random.normal(
        k_img, (B, cfg["channels"], cfg["image_size"], cfg["image_size"]), dtype=jnp.float32)
    success_grasp = jax.random.normal(k_sg, (B, cfg["grasp_dim"]), dtype=jnp.float32)
    failure_grasp = jax.random.normal(k_fg, (B, cfg["grasp_dim"]), dtype=jnp.float32)

    fwd = jax.jit(lambda si, sg, fg: yogo_forward(params, cfg, si, sg, fg))
    scene_f, succ_f, fail_f = fwd(scene_image, success_grasp, failure_grasp)
    jax.block_until_ready((scene_f, succ_f, fail_f))

    assert scene_f.shape == (B, cfg["scene_embed_dim"])
    assert succ_f.shape == (B, cfg["grasp_embed_dim"])
    assert fail_f.shape == (B, cfg["grasp_embed_dim"])
    assert bool(jnp.isfinite(scene_f).all()
                & jnp.isfinite(succ_f).all()
                & jnp.isfinite(fail_f).all())
    print("KERNEL_OK")
</pallas_src>

<mosaic_0001>
module attributes {stable_mosaic.version = 11 : i64} {
  func.func @_yogo_kernel(%arg0: i32, %arg1: memref<16x192xf32, #tpu.memory_space<vmem>>, %arg2: memref<16x1xf32, #tpu.memory_space<vmem>>, %arg3: memref<16x32xf32, #tpu.memory_space<vmem>>, %arg4: memref<1x192xf32, #tpu.memory_space<vmem>>, %arg5: memref<1x192xf32, #tpu.memory_space<vmem>>, %arg6: memref<192x32xbf16, #tpu.memory_space<vmem>>, %arg7: memref<1x32xf32, #tpu.memory_space<vmem>>, %arg8: memref<1x32xf32, #tpu.memory_space<vmem>>, %arg9: memref<1x32xf32, #tpu.memory_space<vmem>>, %arg10: memref<1x32xf32, #tpu.memory_space<vmem>>, %arg11: memref<2x32xf32, #tpu.memory_space<vmem>>, %arg12: memref<2x32xf32, #tpu.memory_space<vmem>>, %arg13: memref<2x32x384xbf16, #tpu.memory_space<vmem>>, %arg14: memref<2x128x32xbf16, #tpu.memory_space<vmem>>, %arg15: memref<2x32xf32, #tpu.memory_space<vmem>>, %arg16: memref<2x32xf32, #tpu.memory_space<vmem>>, %arg17: memref<2x32xf32, #tpu.memory_space<vmem>>, %arg18: memref<2x32x64xbf16, #tpu.memory_space<vmem>>, %arg19: memref<2x64xf32, #tpu.memory_space<vmem>>, %arg20: memref<2x64x32xbf16, #tpu.memory_space<vmem>>, %arg21: memref<2x32xf32, #tpu.memory_space<vmem>>, %arg22: memref<1x32xf32, #tpu.memory_space<vmem>>, %arg23: memref<1x32xf32, #tpu.memory_space<vmem>>, %arg24: memref<32x16xbf16, #tpu.memory_space<vmem>>, %arg25: memref<1x16xf32, #tpu.memory_space<vmem>>, %arg26: memref<4x21xf32, #tpu.memory_space<vmem>>, %arg27: memref<21x256xbf16, #tpu.memory_space<vmem>>, %arg28: memref<1x256xf32, #tpu.memory_space<vmem>>, %arg29: memref<256x256xbf16, #tpu.memory_space<vmem>>, %arg30: memref<1x256xf32, #tpu.memory_space<vmem>>, %arg31: memref<256x256xbf16, #tpu.memory_space<vmem>>, %arg32: memref<1x256xf32, #tpu.memory_space<vmem>>, %arg33: memref<256x16xbf16, #tpu.memory_space<vmem>>, %arg34: memref<1x16xf32, #tpu.memory_space<vmem>>, %arg35: memref<2x16xf32, #tpu.memory_space<vmem>>, %arg36: memref<4x16xf32, #tpu.memory_space<vmem>>) attributes {dimension_semantics = [#tpu.dimension_semantics<arbitrary>], iteration_bounds = array<i64: 1>, scalar_prefetch = 0 : i64, scratch_operands = 0 : i64, tpu.core_type = #tpu.core_type<tc>, window_params = [{transform_indices = @transform_0, window_bounds = array<i64: 16, 192>}, {pipeline_mode = #tpu.pipeline_mode<synchronous>, transform_indices = @transform_1, window_bounds = array<i64: 16, 1>}, {pipeline_mode = #tpu.pipeline_mode<synchronous>, transform_indices = @transform_2, window_bounds = array<i64: 16, 32>}, {pipeline_mode = #tpu.pipeline_mode<synchronous>, transform_indices = @transform_3, window_bounds = array<i64: 1, 192>}, {pipeline_mode = #tpu.pipeline_mode<synchronous>, transform_indices = @transform_4, window_bounds = array<i64: 1, 192>}, {pipeline_mode = #tpu.pipeline_mode<synchronous>, transform_indices = @transform_5, window_bounds = array<i64: 192, 32>}, {pipeline_mode = #tpu.pipeline_mode<synchronous>, transform_indices = @transform_6, window_bounds = array<i64: 1, 32>}, {pipeline_mode = #tpu.pipeline_mode<synchronous>, transform_indices = @transform_7, window_bounds = array<i64: 1, 32>}, {pipeline_mode = #tpu.pipeline_mode<synchronous>, transform_indices = @transform_8, window_bounds = array<i64: 1, 32>}, {pipeline_mode = #tpu.pipeline_mode<synchronous>, transform_indices = @transform_9, window_bounds = array<i64: 1, 32>}, {pipeline_mode = #tpu.pipeline_mode<synchronous>, transform_indices = @transform_10, window_bounds = array<i64: 2, 32>}, {pipeline_mode = #tpu.pipeline_mode<synchronous>, transform_indices = @transform_11, window_bounds = array<i64: 2, 32>}, {pipeline_mode = #tpu.pipeline_mode<synchronous>, transform_indices = @transform_12, window_bounds = array<i64: 2, 32, 384>}, {pipeline_mode = #tpu.pipeline_mode<synchronous>, transform_indices = @transform_13, window_bounds = array<i64: 2, 128, 32>}, {pipeline_mode = #tpu.pipeline_mode<synchronous>, transform_indices = @transform_14, window_bounds = array<i64: 2, 32>}, {pipeline_mode = #tpu.pipeline_mode<synchronous>, transform_indices = @transform_15, window_bounds = array<i64: 2, 32>}, {pipeline_mode = #tpu.pipeline_mode<synchronous>, transform_indices = @transform_16, window_bounds = array<i64: 2, 32>}, {pipeline_mode = #tpu.pipeline_mode<synchronous>, transform_indices = @transform_17, window_bounds = array<i64: 2, 32, 64>}, {pipeline_mode = #tpu.pipeline_mode<synchronous>, transform_indices = @transform_18, window_bounds = array<i64: 2, 64>}, {pipeline_mode = #tpu.pipeline_mode<synchronous>, transform_indices = @transform_19, window_bounds = array<i64: 2, 64, 32>}, {pipeline_mode = #tpu.pipeline_mode<synchronous>, transform_indices = @transform_20, window_bounds = array<i64: 2, 32>}, {pipeline_mode = #tpu.pipeline_mode<synchronous>, transform_indices = @transform_21, window_bounds = array<i64: 1, 32>}, {pipeline_mode = #tpu.pipeline_mode<synchronous>, transform_indices = @transform_22, window_bounds = array<i64: 1, 32>}, {pipeline_mode = #tpu.pipeline_mode<synchronous>, transform_indices = @transform_23, window_bounds = array<i64: 32, 16>}, {pipeline_mode = #tpu.pipeline_mode<synchronous>, transform_indices = @transform_24, window_bounds = array<i64: 1, 16>}, {pipeline_mode = #tpu.pipeline_mode<synchronous>, transform_indices = @transform_25, window_bounds = array<i64: 4, 21>}, {pipeline_mode = #tpu.pipeline_mode<synchronous>, transform_indices = @transform_26, window_bounds = array<i64: 21, 256>}, {pipeline_mode = #tpu.pipeline_mode<synchronous>, transform_indices = @transform_27, window_bounds = array<i64: 1, 256>}, {pipeline_mode = #tpu.pipeline_mode<synchronous>, transform_indices = @transform_28, window_bounds = array<i64: 256, 256>}, {pipeline_mode = #tpu.pipeline_mode<synchronous>, transform_indices = @transform_29, window_bounds = array<i64: 1, 256>}, {pipeline_mode = #tpu.pipeline_mode<synchronous>, transform_indices = @transform_30, window_bounds = array<i64: 256, 256>}, {pipeline_mode = #tpu.pipeline_mode<synchronous>, transform_indices = @transform_31, window_bounds = array<i64: 1, 256>}, {pipeline_mode = #tpu.pipeline_mode<synchronous>, transform_indices = @transform_32, window_bounds = array<i64: 256, 16>}, {pipeline_mode = #tpu.pipeline_mode<synchronous>, transform_indices = @transform_33, window_bounds = array<i64: 1, 16>}, {transform_indices = @transform_34, window_bounds = array<i64: 2, 16>}, {pipeline_mode = #tpu.pipeline_mode<synchronous>, transform_indices = @transform_35, window_bounds = array<i64: 4, 16>}]} {
    %c0 = arith.constant 0 : index
    %c0_0 = arith.constant 0 : index
    %0 = vector.load %arg1[%c0, %c0_0] : memref<16x192xf32, #tpu.memory_space<vmem>>, vector<16x192xf32>
    %c0_1 = arith.constant 0 : index
    %c0_2 = arith.constant 0 : index
    %1 = vector.load %arg4[%c0_1, %c0_2] : memref<1x192xf32, #tpu.memory_space<vmem>>, vector<1x192xf32>
    %c0_3 = arith.constant 0 : index
    %c0_4 = arith.constant 0 : index
    %2 = vector.load %arg5[%c0_3, %c0_4] : memref<1x192xf32, #tpu.memory_space<vmem>>, vector<1x192xf32>
    %cst = arith.constant dense<0.000000e+00> : vector<16xf32>
    %3 = vector.multi_reduction <add>, %0, %cst [1] : vector<16x192xf32> to vector<16xf32>
    %4 = vector.shape_cast %3 : vector<16xf32> to vector<16x1xf32>
    %cst_5 = arith.constant 1.920000e+02 : f32
    %5 = vector.broadcast %cst_5 : f32 to vector<16x1xf32>
    %6 = arith.divf %4, %5 : vector<16x1xf32>
    %7 = vector.broadcast %6 : vector<16x1xf32> to vector<16x192xf32>
    %8 = arith.subf %0, %7 : vector<16x192xf32>
    %9 = arith.mulf %8, %8 : vector<16x192xf32>
    %cst_6 = arith.constant dense<0.000000e+00> : vector<16xf32>
    %10 = vector.multi_reduction <add>, %9, %cst_6 [1] : vector<16x192xf32> to vector<16xf32>
    %11 = vector.shape_cast %10 : vector<16xf32> to vector<16x1xf32>
    %cst_7 = arith.constant 1.920000e+02 : f32
    %12 = vector.broadcast %cst_7 : f32 to vector<16x1xf32>
    %13 = arith.divf %11, %12 : vector<16x1xf32>
    %cst_8 = arith.constant 9.99999974E-6 : f32
    %14 = vector.broadcast %cst_8 : f32 to vector<16x1xf32>
    %15 = arith.addf %13, %14 : vector<16x1xf32>
    %16 = math.rsqrt %15 : vector<16x1xf32>
    %17 = vector.broadcast %16 : vector<16x1xf32> to vector<16x192xf32>
    %18 = arith.mulf %8, %17 : vector<16x192xf32>
    %19 = vector.broadcast %1 : vector<1x192xf32> to vector<16x192xf32>
    %20 = arith.mulf %18, %19 : vector<16x192xf32>
    %21 = vector.broadcast %2 : vector<1x192xf32> to vector<16x192xf32>
    %22 = arith.addf %20, %21 : vector<16x192xf32>
    %c0_9 = arith.constant 0 : index
    %c0_10 = arith.constant 0 : index
    %23 = vector.load %arg6[%c0_9, %c0_10] : memref<192x32xbf16, #tpu.memory_space<vmem>>, vector<192x32xbf16>
    %24 = arith.truncf %22 : vector<16x192xf32> to vector<16x192xbf16>
    %cst_11 = arith.constant dense<0.000000e+00> : vector<16x32xf32>
    %25 = tpu.matmul %24, %23, %cst_11 {dimension_numbers = #tpu.dot_dimension_numbers<[1], [0], [0], [1], [0, 0, 1, 1], [], []>} : vector<16x192xbf16>, vector<192x32xbf16>, vector<16x32xf32> -> vector<16x32xf32>
    %c0_12 = arith.constant 0 : index
    %c0_13 = arith.constant 0 : index
    %26 = vector.load %arg7[%c0_12, %c0_13] : memref<1x32xf32, #tpu.memory_space<vmem>>, vector<1x32xf32>
    %27 = vector.broadcast %26 : vector<1x32xf32> to vector<16x32xf32>
    %28 = arith.addf %25, %27 : vector<16x32xf32>
    %c0_14 = arith.constant 0 : index
    %c0_15 = arith.constant 0 : index
    %29 = vector.load %arg8[%c0_14, %c0_15] : memref<1x32xf32, #tpu.memory_space<vmem>>, vector<1x32xf32>
    %c0_16 = arith.constant 0 : index
    %c0_17 = arith.constant 0 : index
    %30 = vector.load %arg9[%c0_16, %c0_17] : memref<1x32xf32, #tpu.memory_space<vmem>>, vector<1x32xf32>
    %cst_18 = arith.constant dense<0.000000e+00> : vector<16xf32>
    %31 = vector.multi_reduction <add>, %28, %cst_18 [1] : vector<16x32xf32> to vector<16xf32>
    %32 = vector.shape_cast %31 : vector<16xf32> to vector<16x1xf32>
    %cst_19 = arith.constant 3.200000e+01 : f32
    %33 = vector.broadcast %cst_19 : f32 to vector<16x1xf32>
    %34 = arith.divf %32, %33 : vector<16x1xf32>
    %35 = vector.broadcast %34 : vector<16x1xf32> to vector<16x32xf32>
    %36 = arith.subf %28, %35 : vector<16x32xf32>
    %37 = arith.mulf %36, %36 : vector<16x32xf32>
    %cst_20 = arith.constant dense<0.000000e+00> : vector<16xf32>
    %38 = vector.multi_reduction <add>, %37, %cst_20 [1] : vector<16x32xf32> to vector<16xf32>
    %39 = vector.shape_cast %38 : vector<16xf32> to vector<16x1xf32>
    %cst_21 = arith.constant 3.200000e+01 : f32
    %40 = vector.broadcast %cst_21 : f32 to vector<16x1xf32>
    %41 = arith.divf %39, %40 : vector<16x1xf32>
    %cst_22 = arith.constant 9.99999974E-6 : f32
    %42 = vector.broadcast %cst_22 : f32 to vector<16x1xf32>
    %43 = arith.addf %41, %42 : vector<16x1xf32>
    %44 = math.rsqrt %43 : vector<16x1xf32>
    %45 = vector.broadcast %44 : vector<16x1xf32> to vector<16x32xf32>
    %46 = arith.mulf %36, %45 : vector<16x32xf32>
    %47 = vector.broadcast %29 : vector<1x32xf32> to vector<16x32xf32>
    %48 = arith.mulf %46, %47 : vector<16x32xf32>
    %49 = vector.broadcast %30 : vector<1x32xf32> to vector<16x32xf32>
    %50 = arith.addf %48, %49 : vector<16x32xf32>
    %c0_23 = arith.constant 0 : index
    %c0_24 = arith.constant 0 : index
    %51 = vector.load %arg2[%c0_23, %c0_24] : memref<16x1xf32, #tpu.memory_space<vmem>>, vector<16x1xf32>
    %cst_25 = arith.constant 5.000000e-01 : f32
    %52 = vector.broadcast %cst_25 : f32 to vector<16x1xf32>
    %53 = arith.cmpf ogt, %51, %52 : vector<16x1xf32>
    %c0_26 = arith.constant 0 : index
    %c0_27 = arith.constant 0 : index
    %54 = vector.load %arg10[%c0_26, %c0_27] : memref<1x32xf32, #tpu.memory_space<vmem>>, vector<1x32xf32>
    %55 = vector.shape_cast %53 : vector<16x1xi1> to vector<16x1xi1>
    %56 = vector.broadcast %55 : vector<16x1xi1> to vector<16x32xi1>
    %57 = vector.shape_cast %54 : vector<1x32xf32> to vector<1x32xf32>
    %58 = vector.broadcast %57 : vector<1x32xf32> to vector<16x32xf32>
    %59 = arith.select %56, %58, %50 : vector<16x32xi1>, vector<16x32xf32>
    %c0_28 = arith.constant 0 : index
    %c0_29 = arith.constant 0 : index
    %60 = vector.load %arg3[%c0_28, %c0_29] : memref<16x32xf32, #tpu.memory_space<vmem>>, vector<16x32xf32>
    %61 = arith.addf %59, %60 : vector<16x32xf32>
    %62 = tpu.iota {dimensions = array<i32: 2>} : vector<2x8x8xi32>
    %c5_i32 = arith.constant 5 : i32
    %63 = vector.broadcast %c5_i32 : i32 to vector<2x8x8xi32>
    %64 = arith.cmpi slt, %62, %63 : vector<2x8x8xi32>
    %c0_30 = arith.constant 0 : index
    %c0_31 = arith.constant 0 : index
    %65 = vector.load %arg11[%c0_30, %c0_31] : memref<2x32xf32, #tpu.memory_space<vmem>>, vector<1x32xf32>
    %c0_32 = arith.constant 0 : index
    %c0_33 = arith.constant 0 : index
    %66 = vector.load %arg12[%c0_32, %c0_33] : memref<2x32xf32, #tpu.memory_space<vmem>>, vector<1x32xf32>
    %cst_34 = arith.constant dense<0.000000e+00> : vector<16xf32>
    %67 = vector.multi_reduction <add>, %61, %cst_34 [1] : vector<16x32xf32> to vector<16xf32>
    %68 = vector.shape_cast %67 : vector<16xf32> to vector<16x1xf32>
    %cst_35 = arith.constant 3.200000e+01 : f32
    %69 = vector.broadcast %cst_35 : f32 to vector<16x1xf32>
    %70 = arith.divf %68, %69 : vector<16x1xf32>
    %71 = vector.broadcast %70 : vector<16x1xf32> to vector<16x32xf32>
    %72 = arith.subf %61, %71 : vector<16x32xf32>
    %73 = arith.mulf %72, %72 : vector<16x32xf32>
    %cst_36 = arith.constant dense<0.000000e+00> : vector<16xf32>
    %74 = vector.multi_reduction <add>, %73, %cst_36 [1] : vector<16x32xf32> to vector<16xf32>
    %75 = vector.shape_cast %74 : vector<16xf32> to vector<16x1xf32>
    %cst_37 = arith.constant 3.200000e+01 : f32
    %76 = vector.broadcast %cst_37 : f32 to vector<16x1xf32>
    %77 = arith.divf %75, %76 : vector<16x1xf32>
    %cst_38 = arith.constant 9.99999974E-6 : f32
    %78 = vector.broadcast %cst_38 : f32 to vector<16x1xf32>
    %79 = arith.addf %77, %78 : vector<16x1xf32>
    %80 = math.rsqrt %79 : vector<16x1xf32>
    %81 = vector.broadcast %80 : vector<16x1xf32> to vector<16x32xf32>
    %82 = arith.mulf %72, %81 : vector<16x32xf32>
    %83 = vector.broadcast %65 : vector<1x32xf32> to vector<16x32xf32>
    %84 = arith.mulf %82, %83 : vector<16x32xf32>
    %85 = vector.broadcast %66 : vector<1x32xf32> to vector<16x32xf32>
    %86 = arith.addf %84, %85 : vector<16x32xf32>
    %c0_39 = arith.constant 0 : index
    %c0_40 = arith.constant 0 : index
    %c0_41 = arith.constant 0 : index
    %87 = vector.load %arg13[%c0_39, %c0_40, %c0_41] : memref<2x32x384xbf16, #tpu.memory_space<vmem>>, vector<1x32x384xbf16>
    %88 = vector.shape_cast %87 : vector<1x32x384xbf16> to vector<32x384xbf16>
    %89 = arith.truncf %86 : vector<16x32xf32> to vector<16x32xbf16>
    %cst_42 = arith.constant dense<0.000000e+00> : vector<16x384xf32>
    %90 = tpu.matmul %89, %88, %cst_42 {dimension_numbers = #tpu.dot_dimension_numbers<[1], [0], [0], [1], [0, 0, 1, 1], [], []>} : vector<16x32xbf16>, vector<32x384xbf16>, vector<16x384xf32> -> vector<16x384xf32>
    %91 = vector.extract_strided_slice %90 {offsets = [0, 0], sizes = [16, 128], strides = [1, 1]} : vector<16x384xf32> to vector<16x128xf32>
    %cst_43 = arith.constant 1.250000e-01 : f32
    %92 = vector.broadcast %cst_43 : f32 to vector<16x128xf32>
    %93 = arith.mulf %91, %92 : vector<16x128xf32>
    %94 = vector.shape_cast %93 : vector<16x128xf32> to vector<2x8x128xf32>
    %95 = vector.extract_strided_slice %90 {offsets = [0, 128], sizes = [16, 128], strides = [1, 1]} : vector<16x384xf32> to vector<16x128xf32>
    %96 = vector.shape_cast %95 : vector<16x128xf32> to vector<2x8x128xf32>
    %97 = vector.extract_strided_slice %90 {offsets = [0, 256], sizes = [16, 128], strides = [1, 1]} : vector<16x384xf32> to vector<16x128xf32>
    %98 = vector.shape_cast %97 : vector<16x128xf32> to vector<2x8x128xf32>
    %99 = vector.extract_strided_slice %94 {offsets = [0, 0, 0], sizes = [2, 8, 64], strides = [1, 1, 1]} : vector<2x8x128xf32> to vector<2x8x64xf32>
    %100 = vector.extract_strided_slice %96 {offsets = [0, 0, 0], sizes = [2, 8, 64], strides = [1, 1, 1]} : vector<2x8x128xf32> to vector<2x8x64xf32>
    %101 = arith.truncf %99 : vector<2x8x64xf32> to vector<2x8x64xbf16>
    %102 = arith.truncf %100 : vector<2x8x64xf32> to vector<2x8x64xbf16>
    %cst_44 = arith.constant dense<0.000000e+00> : vector<2x8x8xf32>
    %103 = tpu.matmul %101, %102, %cst_44 {dimension_numbers = #tpu.dot_dimension_numbers<[2], [2], [1], [1], [0, 0, 0, 1, 1, 1], [0], [0]>} : vector<2x8x64xbf16>, vector<2x8x64xbf16>, vector<2x8x8xf32> -> vector<2x8x8xf32>
    %cst_45 = arith.constant -1.000000e+30 : f32
    %104 = vector.broadcast %cst_45 : f32 to vector<2x8x8xf32>
    %105 = arith.select %64, %103, %104 : vector<2x8x8xi1>, vector<2x8x8xf32>
    %cst_46 = arith.constant dense<0xFF800000> : vector<2x8xf32>
    %106 = vector.multi_reduction <maximumf>, %105, %cst_46 [2] : vector<2x8x8xf32> to vector<2x8xf32>
    %107 = vector.shape_cast %106 : vector<2x8xf32> to vector<2x8x1xf32>
    %108 = vector.broadcast %107 : vector<2x8x1xf32> to vector<2x8x8xf32>
    %109 = arith.subf %105, %108 : vector<2x8x8xf32>
    %110 = math.exp %109 : vector<2x8x8xf32>
    %cst_47 = arith.constant dense<0.000000e+00> : vector<2x8xf32>
    %111 = vector.multi_reduction <add>, %110, %cst_47 [2] : vector<2x8x8xf32> to vector<2x8xf32>
    %112 = vector.shape_cast %111 : vector<2x8xf32> to vector<2x8x1xf32>
    %113 = tpu.reciprocal %112 {approx = true} : vector<2x8x1xf32> -> vector<2x8x1xf32>
    %114 = vector.broadcast %113 : vector<2x8x1xf32> to vector<2x8x8xf32>
    %115 = arith.mulf %110, %114 : vector<2x8x8xf32>
    %116 = vector.extract_strided_slice %98 {offsets = [0, 0, 0], sizes = [2, 8, 64], strides = [1, 1, 1]} : vector<2x8x128xf32> to vector<2x8x64xf32>
    %117 = arith.truncf %115 : vector<2x8x8xf32> to vector<2x8x8xbf16>
    %118 = arith.truncf %116 : vector<2x8x64xf32> to vector<2x8x64xbf16>
    %cst_48 = arith.constant dense<0.000000e+00> : vector<2x8x64xf32>
    %119 = tpu.matmul %117, %118, %cst_48 {dimension_numbers = #tpu.dot_dimension_numbers<[2], [1], [1], [2], [0, 0, 0, 1, 1, 2], [0], [0]>} : vector<2x8x8xbf16>, vector<2x8x64xbf16>, vector<2x8x64xf32> -> vector<2x8x64xf32>
    %120 = vector.extract_strided_slice %94 {offsets = [0, 0, 64], sizes = [2, 8, 64], strides = [1, 1, 1]} : vector<2x8x128xf32> to vector<2x8x64xf32>
    %121 = vector.extract_strided_slice %96 {offsets = [0, 0, 64], sizes = [2, 8, 64], strides = [1, 1, 1]} : vector<2x8x128xf32> to vector<2x8x64xf32>
    %122 = arith.truncf %120 : vector<2x8x64xf32> to vector<2x8x64xbf16>
    %123 = arith.truncf %121 : vector<2x8x64xf32> to vector<2x8x64xbf16>
    %cst_49 = arith.constant dense<0.000000e+00> : vector<2x8x8xf32>
    %124 = tpu.matmul %122, %123, %cst_49 {dimension_numbers = #tpu.dot_dimension_numbers<[2], [2], [1], [1], [0, 0, 0, 1, 1, 1], [0], [0]>} : vector<2x8x64xbf16>, vector<2x8x64xbf16>, vector<2x8x8xf32> -> vector<2x8x8xf32>
    %cst_50 = arith.constant -1.000000e+30 : f32
    %125 = vector.broadcast %cst_50 : f32 to vector<2x8x8xf32>
    %126 = arith.select %64, %124, %125 : vector<2x8x8xi1>, vector<2x8x8xf32>
    %cst_51 = arith.constant dense<0xFF800000> : vector<2x8xf32>
    %127 = vector.multi_reduction <maximumf>, %126, %cst_51 [2] : vector<2x8x8xf32> to vector<2x8xf32>
    %128 = vector.shape_cast %127 : vector<2x8xf32> to vector<2x8x1xf32>
    %129 = vector.broadcast %128 : vector<2x8x1xf32> to vector<2x8x8xf32>
    %130 = arith.subf %126, %129 : vector<2x8x8xf32>
    %131 = math.exp %130 : vector<2x8x8xf32>
    %cst_52 = arith.constant dense<0.000000e+00> : vector<2x8xf32>
    %132 = vector.multi_reduction <add>, %131, %cst_52 [2] : vector<2x8x8xf32> to vector<2x8xf32>
    %133 = vector.shape_cast %132 : vector<2x8xf32> to vector<2x8x1xf32>
    %134 = tpu.reciprocal %133 {approx = true} : vector<2x8x1xf32> -> vector<2x8x1xf32>
    %135 = vector.broadcast %134 : vector<2x8x1xf32> to vector<2x8x8xf32>
    %136 = arith.mulf %131, %135 : vector<2x8x8xf32>
    %137 = vector.extract_strided_slice %98 {offsets = [0, 0, 64], sizes = [2, 8, 64], strides = [1, 1, 1]} : vector<2x8x128xf32> to vector<2x8x64xf32>
    %138 = arith.truncf %136 : vector<2x8x8xf32> to vector<2x8x8xbf16>
    %139 = arith.truncf %137 : vector<2x8x64xf32> to vector<2x8x64xbf16>
    %cst_53 = arith.constant dense<0.000000e+00> : vector<2x8x64xf32>
    %140 = tpu.matmul %138, %139, %cst_53 {dimension_numbers = #tpu.dot_dimension_numbers<[2], [1], [1], [2], [0, 0, 0, 1, 1, 2], [0], [0]>} : vector<2x8x8xbf16>, vector<2x8x64xbf16>, vector<2x8x64xf32> -> vector<2x8x64xf32>
    %141 = tpu.concatenate %119, %140 in 2 : vector<2x8x64xf32>, vector<2x8x64xf32> -> vector<2x8x128xf32>
    %142 = vector.shape_cast %141 : vector<2x8x128xf32> to vector<16x128xf32>
    %c0_54 = arith.constant 0 : index
    %c0_55 = arith.constant 0 : index
    %c0_56 = arith.constant 0 : index
    %143 = vector.load %arg14[%c0_54, %c0_55, %c0_56] : memref<2x128x32xbf16, #tpu.memory_space<vmem>>, vector<1x128x32xbf16>
    %144 = vector.shape_cast %143 : vector<1x128x32xbf16> to vector<128x32xbf16>
    %145 = arith.truncf %142 : vector<16x128xf32> to vector<16x128xbf16>
    %cst_57 = arith.constant dense<0.000000e+00> : vector<16x32xf32>
    %146 = tpu.matmul %145, %144, %cst_57 {dimension_numbers = #tpu.dot_dimension_numbers<[1], [0], [0], [1], [0, 0, 1, 1], [], []>} : vector<16x128xbf16>, vector<128x32xbf16>, vector<16x32xf32> -> vector<16x32xf32>
    %147 = arith.addf %61, %146 : vector<16x32xf32>
    %c0_58 = arith.constant 0 : index
    %c0_59 = arith.constant 0 : index
    %148 = vector.load %arg15[%c0_58, %c0_59] : memref<2x32xf32, #tpu.memory_space<vmem>>, vector<1x32xf32>
    %149 = vector.broadcast %148 : vector<1x32xf32> to vector<16x32xf32>
    %150 = arith.addf %147, %149 : vector<16x32xf32>
    %c0_60 = arith.constant 0 : index
    %c0_61 = arith.constant 0 : index
    %151 = vector.load %arg16[%c0_60, %c0_61] : memref<2x32xf32, #tpu.memory_space<vmem>>, vector<1x32xf32>
    %c0_62 = arith.constant 0 : index
    %c0_63 = arith.constant 0 : index
    %152 = vector.load %arg17[%c0_62, %c0_63] : memref<2x32xf32, #tpu.memory_space<vmem>>, vector<1x32xf32>
    %cst_64 = arith.constant dense<0.000000e+00> : vector<16xf32>
    %153 = vector.multi_reduction <add>, %150, %cst_64 [1] : vector<16x32xf32> to vector<16xf32>
    %154 = vector.shape_cast %153 : vector<16xf32> to vector<16x1xf32>
    %cst_65 = arith.constant 3.200000e+01 : f32
    %155 = vector.broadcast %cst_65 : f32 to vector<16x1xf32>
    %156 = arith.divf %154, %155 : vector<16x1xf32>
    %157 = vector.broadcast %156 : vector<16x1xf32> to vector<16x32xf32>
    %158 = arith.subf %150, %157 : vector<16x32xf32>
    %159 = arith.mulf %158, %158 : vector<16x32xf32>
    %cst_66 = arith.constant dense<0.000000e+00> : vector<16xf32>
    %160 = vector.multi_reduction <add>, %159, %cst_66 [1] : vector<16x32xf32> to vector<16xf32>
    %161 = vector.shape_cast %160 : vector<16xf32> to vector<16x1xf32>
    %cst_67 = arith.constant 3.200000e+01 : f32
    %162 = vector.broadcast %cst_67 : f32 to vector<16x1xf32>
    %163 = arith.divf %161, %162 : vector<16x1xf32>
    %cst_68 = arith.constant 9.99999974E-6 : f32
    %164 = vector.broadcast %cst_68 : f32 to vector<16x1xf32>
    %165 = arith.addf %163, %164 : vector<16x1xf32>
    %166 = math.rsqrt %165 : vector<16x1xf32>
    %167 = vector.broadcast %166 : vector<16x1xf32> to vector<16x32xf32>
    %168 = arith.mulf %158, %167 : vector<16x32xf32>
    %169 = vector.broadcast %151 : vector<1x32xf32> to vector<16x32xf32>
    %170 = arith.mulf %168, %169 : vector<16x32xf32>
    %171 = vector.broadcast %152 : vector<1x32xf32> to vector<16x32xf32>
    %172 = arith.addf %170, %171 : vector<16x32xf32>
    %c0_69 = arith.constant 0 : index
    %c0_70 = arith.constant 0 : index
    %c0_71 = arith.constant 0 : index
    %173 = vector.load %arg18[%c0_69, %c0_70, %c0_71] : memref<2x32x64xbf16, #tpu.memory_space<vmem>>, vector<1x32x64xbf16>
    %174 = vector.shape_cast %173 : vector<1x32x64xbf16> to vector<32x64xbf16>
    %175 = arith.truncf %172 : vector<16x32xf32> to vector<16x32xbf16>
    %cst_72 = arith.constant dense<0.000000e+00> : vector<16x64xf32>
    %176 = tpu.matmul %175, %174, %cst_72 {dimension_numbers = #tpu.dot_dimension_numbers<[1], [0], [0], [1], [0, 0, 1, 1], [], []>} : vector<16x32xbf16>, vector<32x64xbf16>, vector<16x64xf32> -> vector<16x64xf32>
    %c0_73 = arith.constant 0 : index
    %c0_74 = arith.constant 0 : index
    %177 = vector.load %arg19[%c0_73, %c0_74] : memref<2x64xf32, #tpu.memory_space<vmem>>, vector<1x64xf32>
    %178 = vector.broadcast %177 : vector<1x64xf32> to vector<16x64xf32>
    %179 = arith.addf %176, %178 : vector<16x64xf32>
    %cst_75 = arith.constant 5.000000e-01 : f32
    %180 = vector.broadcast %cst_75 : f32 to vector<16x64xf32>
    %181 = arith.mulf %180, %179 : vector<16x64xf32>
    %cst_76 = arith.constant 4.471500e-02 : f32
    %182 = vector.broadcast %cst_76 : f32 to vector<16x64xf32>
    %183 = arith.mulf %182, %179 : vector<16x64xf32>
    %184 = arith.mulf %183, %179 : vector<16x64xf32>
    %185 = arith.mulf %184, %179 : vector<16x64xf32>
    %186 = arith.addf %179, %185 : vector<16x64xf32>
    %cst_77 = arith.constant 0.797884583 : f32
    %187 = vector.broadcast %cst_77 : f32 to vector<16x64xf32>
    %188 = arith.mulf %187, %186 : vector<16x64xf32>
    %189 = math.tanh %188 : vector<16x64xf32>
    %cst_78 = arith.constant 1.000000e+00 : f32
    %190 = vector.broadcast %cst_78 : f32 to vector<16x64xf32>
    %191 = arith.addf %190, %189 : vector<16x64xf32>
    %192 = arith.mulf %181, %191 : vector<16x64xf32>
    %c0_79 = arith.constant 0 : index
    %c0_80 = arith.constant 0 : index
    %c0_81 = arith.constant 0 : index
    %193 = vector.load %arg20[%c0_79, %c0_80, %c0_81] : memref<2x64x32xbf16, #tpu.memory_space<vmem>>, vector<1x64x32xbf16>
    %194 = vector.shape_cast %193 : vector<1x64x32xbf16> to vector<64x32xbf16>
    %195 = arith.truncf %192 : vector<16x64xf32> to vector<16x64xbf16>
    %cst_82 = arith.constant dense<0.000000e+00> : vector<16x32xf32>
    %196 = tpu.matmul %195, %194, %cst_82 {dimension_numbers = #tpu.dot_dimension_numbers<[1], [0], [0], [1], [0, 0, 1, 1], [], []>} : vector<16x64xbf16>, vector<64x32xbf16>, vector<16x32xf32> -> vector<16x32xf32>
    %c0_83 = arith.constant 0 : index
    %c0_84 = arith.constant 0 : index
    %197 = vector.load %arg21[%c0_83, %c0_84] : memref<2x32xf32, #tpu.memory_space<vmem>>, vector<1x32xf32>
    %198 = vector.broadcast %197 : vector<1x32xf32> to vector<16x32xf32>
    %199 = arith.addf %196, %198 : vector<16x32xf32>
    %200 = arith.addf %150, %199 : vector<16x32xf32>
    %c1 = arith.constant 1 : index
    %c0_85 = arith.constant 0 : index
    %201 = vector.load %arg11[%c1, %c0_85] : memref<2x32xf32, #tpu.memory_space<vmem>>, vector<1x32xf32>
    %c1_86 = arith.constant 1 : index
    %c0_87 = arith.constant 0 : index
    %202 = vector.load %arg12[%c1_86, %c0_87] : memref<2x32xf32, #tpu.memory_space<vmem>>, vector<1x32xf32>
    %cst_88 = arith.constant dense<0.000000e+00> : vector<16xf32>
    %203 = vector.multi_reduction <add>, %200, %cst_88 [1] : vector<16x32xf32> to vector<16xf32>
    %204 = vector.shape_cast %203 : vector<16xf32> to vector<16x1xf32>
    %cst_89 = arith.constant 3.200000e+01 : f32
    %205 = vector.broadcast %cst_89 : f32 to vector<16x1xf32>
    %206 = arith.divf %204, %205 : vector<16x1xf32>
    %207 = vector.broadcast %206 : vector<16x1xf32> to vector<16x32xf32>
    %208 = arith.subf %200, %207 : vector<16x32xf32>
    %209 = arith.mulf %208, %208 : vector<16x32xf32>
    %cst_90 = arith.constant dense<0.000000e+00> : vector<16xf32>
    %210 = vector.multi_reduction <add>, %209, %cst_90 [1] : vector<16x32xf32> to vector<16xf32>
    %211 = vector.shape_cast %210 : vector<16xf32> to vector<16x1xf32>
    %cst_91 = arith.constant 3.200000e+01 : f32
    %212 = vector.broadcast %cst_91 : f32 to vector<16x1xf32>
    %213 = arith.divf %211, %212 : vector<16x1xf32>
    %cst_92 = arith.constant 9.99999974E-6 : f32
    %214 = vector.broadcast %cst_92 : f32 to vector<16x1xf32>
    %215 = arith.addf %213, %214 : vector<16x1xf32>
    %216 = math.rsqrt %215 : vector<16x1xf32>
    %217 = vector.broadcast %216 : vector<16x1xf32> to vector<16x32xf32>
    %218 = arith.mulf %208, %217 : vector<16x32xf32>
    %219 = vector.broadcast %201 : vector<1x32xf32> to vector<16x32xf32>
    %220 = arith.mulf %218, %219 : vector<16x32xf32>
    %221 = vector.broadcast %202 : vector<1x32xf32> to vector<16x32xf32>
    %222 = arith.addf %220, %221 : vector<16x32xf32>
    %c1_93 = arith.constant 1 : index
    %c0_94 = arith.constant 0 : index
    %c0_95 = arith.constant 0 : index
    %223 = vector.load %arg13[%c1_93, %c0_94, %c0_95] : memref<2x32x384xbf16, #tpu.memory_space<vmem>>, vector<1x32x384xbf16>
    %224 = vector.shape_cast %223 : vector<1x32x384xbf16> to vector<32x384xbf16>
    %225 = arith.truncf %222 : vector<16x32xf32> to vector<16x32xbf16>
    %cst_96 = arith.constant dense<0.000000e+00> : vector<16x384xf32>
    %226 = tpu.matmul %225, %224, %cst_96 {dimension_numbers = #tpu.dot_dimension_numbers<[1], [0], [0], [1], [0, 0, 1, 1], [], []>} : vector<16x32xbf16>, vector<32x384xbf16>, vector<16x384xf32> -> vector<16x384xf32>
    %227 = vector.extract_strided_slice %226 {offsets = [0, 0], sizes = [16, 128], strides = [1, 1]} : vector<16x384xf32> to vector<16x128xf32>
    %cst_97 = arith.constant 1.250000e-01 : f32
    %228 = vector.broadcast %cst_97 : f32 to vector<16x128xf32>
    %229 = arith.mulf %227, %228 : vector<16x128xf32>
    %230 = vector.shape_cast %229 : vector<16x128xf32> to vector<2x8x128xf32>
    %231 = vector.extract_strided_slice %226 {offsets = [0, 128], sizes = [16, 128], strides = [1, 1]} : vector<16x384xf32> to vector<16x128xf32>
    %232 = vector.shape_cast %231 : vector<16x128xf32> to vector<2x8x128xf32>
    %233 = vector.extract_strided_slice %226 {offsets = [0, 256], sizes = [16, 128], strides = [1, 1]} : vector<16x384xf32> to vector<16x128xf32>
    %234 = vector.shape_cast %233 : vector<16x128xf32> to vector<2x8x128xf32>
    %235 = vector.extract_strided_slice %230 {offsets = [0, 0, 0], sizes = [2, 8, 64], strides = [1, 1, 1]} : vector<2x8x128xf32> to vector<2x8x64xf32>
    %236 = vector.extract_strided_slice %232 {offsets = [0, 0, 0], sizes = [2, 8, 64], strides = [1, 1, 1]} : vector<2x8x128xf32> to vector<2x8x64xf32>
    %237 = arith.truncf %235 : vector<2x8x64xf32> to vector<2x8x64xbf16>
    %238 = arith.truncf %236 : vector<2x8x64xf32> to vector<2x8x64xbf16>
    %cst_98 = arith.constant dense<0.000000e+00> : vector<2x8x8xf32>
    %239 = tpu.matmul %237, %238, %cst_98 {dimension_numbers = #tpu.dot_dimension_numbers<[2], [2], [1], [1], [0, 0, 0, 1, 1, 1], [0], [0]>} : vector<2x8x64xbf16>, vector<2x8x64xbf16>, vector<2x8x8xf32> -> vector<2x8x8xf32>
    %cst_99 = arith.constant -1.000000e+30 : f32
    %240 = vector.broadcast %cst_99 : f32 to vector<2x8x8xf32>
    %241 = arith.select %64, %239, %240 : vector<2x8x8xi1>, vector<2x8x8xf32>
    %cst_100 = arith.constant dense<0xFF800000> : vector<2x8xf32>
    %242 = vector.multi_reduction <maximumf>, %241, %cst_100 [2] : vector<2x8x8xf32> to vector<2x8xf32>
    %243 = vector.shape_cast %242 : vector<2x8xf32> to vector<2x8x1xf32>
    %244 = vector.broadcast %243 : vector<2x8x1xf32> to vector<2x8x8xf32>
    %245 = arith.subf %241, %244 : vector<2x8x8xf32>
    %246 = math.exp %245 : vector<2x8x8xf32>
    %cst_101 = arith.constant dense<0.000000e+00> : vector<2x8xf32>
    %247 = vector.multi_reduction <add>, %246, %cst_101 [2] : vector<2x8x8xf32> to vector<2x8xf32>
    %248 = vector.shape_cast %247 : vector<2x8xf32> to vector<2x8x1xf32>
    %249 = tpu.reciprocal %248 {approx = true} : vector<2x8x1xf32> -> vector<2x8x1xf32>
    %250 = vector.broadcast %249 : vector<2x8x1xf32> to vector<2x8x8xf32>
    %251 = arith.mulf %246, %250 : vector<2x8x8xf32>
    %252 = vector.extract_strided_slice %234 {offsets = [0, 0, 0], sizes = [2, 8, 64], strides = [1, 1, 1]} : vector<2x8x128xf32> to vector<2x8x64xf32>
    %253 = arith.truncf %251 : vector<2x8x8xf32> to vector<2x8x8xbf16>
    %254 = arith.truncf %252 : vector<2x8x64xf32> to vector<2x8x64xbf16>
    %cst_102 = arith.constant dense<0.000000e+00> : vector<2x8x64xf32>
    %255 = tpu.matmul %253, %254, %cst_102 {dimension_numbers = #tpu.dot_dimension_numbers<[2], [1], [1], [2], [0, 0, 0, 1, 1, 2], [0], [0]>} : vector<2x8x8xbf16>, vector<2x8x64xbf16>, vector<2x8x64xf32> -> vector<2x8x64xf32>
    %256 = vector.extract_strided_slice %230 {offsets = [0, 0, 64], sizes = [2, 8, 64], strides = [1, 1, 1]} : vector<2x8x128xf32> to vector<2x8x64xf32>
    %257 = vector.extract_strided_slice %232 {offsets = [0, 0, 64], sizes = [2, 8, 64], strides = [1, 1, 1]} : vector<2x8x128xf32> to vector<2x8x64xf32>
    %258 = arith.truncf %256 : vector<2x8x64xf32> to vector<2x8x64xbf16>
    %259 = arith.truncf %257 : vector<2x8x64xf32> to vector<2x8x64xbf16>
    %cst_103 = arith.constant dense<0.000000e+00> : vector<2x8x8xf32>
    %260 = tpu.matmul %258, %259, %cst_103 {dimension_numbers = #tpu.dot_dimension_numbers<[2], [2], [1], [1], [0, 0, 0, 1, 1, 1], [0], [0]>} : vector<2x8x64xbf16>, vector<2x8x64xbf16>, vector<2x8x8xf32> -> vector<2x8x8xf32>
    %cst_104 = arith.constant -1.000000e+30 : f32
    %261 = vector.broadcast %cst_104 : f32 to vector<2x8x8xf32>
    %262 = arith.select %64, %260, %261 : vector<2x8x8xi1>, vector<2x8x8xf32>
    %cst_105 = arith.constant dense<0xFF800000> : vector<2x8xf32>
    %263 = vector.multi_reduction <maximumf>, %262, %cst_105 [2] : vector<2x8x8xf32> to vector<2x8xf32>
    %264 = vector.shape_cast %263 : vector<2x8xf32> to vector<2x8x1xf32>
    %265 = vector.broadcast %264 : vector<2x8x1xf32> to vector<2x8x8xf32>
    %266 = arith.subf %262, %265 : vector<2x8x8xf32>
    %267 = math.exp %266 : vector<2x8x8xf32>
    %cst_106 = arith.constant dense<0.000000e+00> : vector<2x8xf32>
    %268 = vector.multi_reduction <add>, %267, %cst_106 [2] : vector<2x8x8xf32> to vector<2x8xf32>
    %269 = vector.shape_cast %268 : vector<2x8xf32> to vector<2x8x1xf32>
    %270 = tpu.reciprocal %269 {approx = true} : vector<2x8x1xf32> -> vector<2x8x1xf32>
    %271 = vector.broadcast %270 : vector<2x8x1xf32> to vector<2x8x8xf32>
    %272 = arith.mulf %267, %271 : vector<2x8x8xf32>
    %273 = vector.extract_strided_slice %234 {offsets = [0, 0, 64], sizes = [2, 8, 64], strides = [1, 1, 1]} : vector<2x8x128xf32> to vector<2x8x64xf32>
    %274 = arith.truncf %272 : vector<2x8x8xf32> to vector<2x8x8xbf16>
    %275 = arith.truncf %273 : vector<2x8x64xf32> to vector<2x8x64xbf16>
    %cst_107 = arith.constant dense<0.000000e+00> : vector<2x8x64xf32>
    %276 = tpu.matmul %274, %275, %cst_107 {dimension_numbers = #tpu.dot_dimension_numbers<[2], [1], [1], [2], [0, 0, 0, 1, 1, 2], [0], [0]>} : vector<2x8x8xbf16>, vector<2x8x64xbf16>, vector<2x8x64xf32> -> vector<2x8x64xf32>
    %277 = tpu.concatenate %255, %276 in 2 : vector<2x8x64xf32>, vector<2x8x64xf32> -> vector<2x8x128xf32>
    %278 = vector.shape_cast %277 : vector<2x8x128xf32> to vector<16x128xf32>
    %c1_108 = arith.constant 1 : index
    %c0_109 = arith.constant 0 : index
    %c0_110 = arith.constant 0 : index
    %279 = vector.load %arg14[%c1_108, %c0_109, %c0_110] : memref<2x128x32xbf16, #tpu.memory_space<vmem>>, vector<1x128x32xbf16>
    %280 = vector.shape_cast %279 : vector<1x128x32xbf16> to vector<128x32xbf16>
    %281 = arith.truncf %278 : vector<16x128xf32> to vector<16x128xbf16>
    %cst_111 = arith.constant dense<0.000000e+00> : vector<16x32xf32>
    %282 = tpu.matmul %281, %280, %cst_111 {dimension_numbers = #tpu.dot_dimension_numbers<[1], [0], [0], [1], [0, 0, 1, 1], [], []>} : vector<16x128xbf16>, vector<128x32xbf16>, vector<16x32xf32> -> vector<16x32xf32>
    %283 = arith.addf %200, %282 : vector<16x32xf32>
    %c1_112 = arith.constant 1 : index
    %c0_113 = arith.constant 0 : index
    %284 = vector.load %arg15[%c1_112, %c0_113] : memref<2x32xf32, #tpu.memory_space<vmem>>, vector<1x32xf32>
    %285 = vector.broadcast %284 : vector<1x32xf32> to vector<16x32xf32>
    %286 = arith.addf %283, %285 : vector<16x32xf32>
    %c1_114 = arith.constant 1 : index
    %c0_115 = arith.constant 0 : index
    %287 = vector.load %arg16[%c1_114, %c0_115] : memref<2x32xf32, #tpu.memory_space<vmem>>, vector<1x32xf32>
    %c1_116 = arith.constant 1 : index
    %c0_117 = arith.constant 0 : index
    %288 = vector.load %arg17[%c1_116, %c0_117] : memref<2x32xf32, #tpu.memory_space<vmem>>, vector<1x32xf32>
    %cst_118 = arith.constant dense<0.000000e+00> : vector<16xf32>
    %289 = vector.multi_reduction <add>, %286, %cst_118 [1] : vector<16x32xf32> to vector<16xf32>
    %290 = vector.shape_cast %289 : vector<16xf32> to vector<16x1xf32>
    %cst_119 = arith.constant 3.200000e+01 : f32
    %291 = vector.broadcast %cst_119 : f32 to vector<16x1xf32>
    %292 = arith.divf %290, %291 : vector<16x1xf32>
    %293 = vector.broadcast %292 : vector<16x1xf32> to vector<16x32xf32>
    %294 = arith.subf %286, %293 : vector<16x32xf32>
    %295 = arith.mulf %294, %294 : vector<16x32xf32>
    %cst_120 = arith.constant dense<0.000000e+00> : vector<16xf32>
    %296 = vector.multi_reduction <add>, %295, %cst_120 [1] : vector<16x32xf32> to vector<16xf32>
    %297 = vector.shape_cast %296 : vector<16xf32> to vector<16x1xf32>
    %cst_121 = arith.constant 3.200000e+01 : f32
    %298 = vector.broadcast %cst_121 : f32 to vector<16x1xf32>
    %299 = arith.divf %297, %298 : vector<16x1xf32>
    %cst_122 = arith.constant 9.99999974E-6 : f32
    %300 = vector.broadcast %cst_122 : f32 to vector<16x1xf32>
    %301 = arith.addf %299, %300 : vector<16x1xf32>
    %302 = math.rsqrt %301 : vector<16x1xf32>
    %303 = vector.broadcast %302 : vector<16x1xf32> to vector<16x32xf32>
    %304 = arith.mulf %294, %303 : vector<16x32xf32>
    %305 = vector.broadcast %287 : vector<1x32xf32> to vector<16x32xf32>
    %306 = arith.mulf %304, %305 : vector<16x32xf32>
    %307 = vector.broadcast %288 : vector<1x32xf32> to vector<16x32xf32>
    %308 = arith.addf %306, %307 : vector<16x32xf32>
    %c1_123 = arith.constant 1 : index
    %c0_124 = arith.constant 0 : index
    %c0_125 = arith.constant 0 : index
    %309 = vector.load %arg18[%c1_123, %c0_124, %c0_125] : memref<2x32x64xbf16, #tpu.memory_space<vmem>>, vector<1x32x64xbf16>
    %310 = vector.shape_cast %309 : vector<1x32x64xbf16> to vector<32x64xbf16>
    %311 = arith.truncf %308 : vector<16x32xf32> to vector<16x32xbf16>
    %cst_126 = arith.constant dense<0.000000e+00> : vector<16x64xf32>
    %312 = tpu.matmul %311, %310, %cst_126 {dimension_numbers = #tpu.dot_dimension_numbers<[1], [0], [0], [1], [0, 0, 1, 1], [], []>} : vector<16x32xbf16>, vector<32x64xbf16>, vector<16x64xf32> -> vector<16x64xf32>
    %c1_127 = arith.constant 1 : index
    %c0_128 = arith.constant 0 : index
    %313 = vector.load %arg19[%c1_127, %c0_128] : memref<2x64xf32, #tpu.memory_space<vmem>>, vector<1x64xf32>
    %314 = vector.broadcast %313 : vector<1x64xf32> to vector<16x64xf32>
    %315 = arith.addf %312, %314 : vector<16x64xf32>
    %cst_129 = arith.constant 5.000000e-01 : f32
    %316 = vector.broadcast %cst_129 : f32 to vector<16x64xf32>
    %317 = arith.mulf %316, %315 : vector<16x64xf32>
    %cst_130 = arith.constant 4.471500e-02 : f32
    %318 = vector.broadcast %cst_130 : f32 to vector<16x64xf32>
    %319 = arith.mulf %318, %315 : vector<16x64xf32>
    %320 = arith.mulf %319, %315 : vector<16x64xf32>
    %321 = arith.mulf %320, %315 : vector<16x64xf32>
    %322 = arith.addf %315, %321 : vector<16x64xf32>
    %cst_131 = arith.constant 0.797884583 : f32
    %323 = vector.broadcast %cst_131 : f32 to vector<16x64xf32>
    %324 = arith.mulf %323, %322 : vector<16x64xf32>
    %325 = math.tanh %324 : vector<16x64xf32>
    %cst_132 = arith.constant 1.000000e+00 : f32
    %326 = vector.broadcast %cst_132 : f32 to vector<16x64xf32>
    %327 = arith.addf %326, %325 : vector<16x64xf32>
    %328 = arith.mulf %317, %327 : vector<16x64xf32>
    %c1_133 = arith.constant 1 : index
    %c0_134 = arith.constant 0 : index
    %c0_135 = arith.constant 0 : index
    %329 = vector.load %arg20[%c1_133, %c0_134, %c0_135] : memref<2x64x32xbf16, #tpu.memory_space<vmem>>, vector<1x64x32xbf16>
    %330 = vector.shape_cast %329 : vector<1x64x32xbf16> to vector<64x32xbf16>
    %331 = arith.truncf %328 : vector<16x64xf32> to vector<16x64xbf16>
    %cst_136 = arith.constant dense<0.000000e+00> : vector<16x32xf32>
    %332 = tpu.matmul %331, %330, %cst_136 {dimension_numbers = #tpu.dot_dimension_numbers<[1], [0], [0], [1], [0, 0, 1, 1], [], []>} : vector<16x64xbf16>, vector<64x32xbf16>, vector<16x32xf32> -> vector<16x32xf32>
    %c1_137 = arith.constant 1 : index
    %c0_138 = arith.constant 0 : index
    %333 = vector.load %arg21[%c1_137, %c0_138] : memref<2x32xf32, #tpu.memory_space<vmem>>, vector<1x32xf32>
    %334 = vector.broadcast %333 : vector<1x32xf32> to vector<16x32xf32>
    %335 = arith.addf %332, %334 : vector<16x32xf32>
    %336 = arith.addf %286, %335 : vector<16x32xf32>
    %337 = vector.extract_strided_slice %336 {offsets = [0, 0], sizes = [1, 32], strides = [1, 1]} : vector<16x32xf32> to vector<1x32xf32>
    %338 = vector.extract_strided_slice %336 {offsets = [8, 0], sizes = [1, 32], strides = [1, 1]} : vector<16x32xf32> to vector<1x32xf32>
    %339 = tpu.concatenate %337, %338 in 0 : vector<1x32xf32>, vector<1x32xf32> -> vector<2x32xf32>
    %c0_139 = arith.constant 0 : index
    %c0_140 = arith.constant 0 : index
    %340 = vector.load %arg22[%c0_139, %c0_140] : memref<1x32xf32, #tpu.memory_space<vmem>>, vector<1x32xf32>
    %c0_141 = arith.constant 0 : index
    %c0_142 = arith.constant 0 : index
    %341 = vector.load %arg23[%c0_141, %c0_142] : memref<1x32xf32, #tpu.memory_space<vmem>>, vector<1x32xf32>
    %cst_143 = arith.constant dense<0.000000e+00> : vector<2xf32>
    %342 = vector.multi_reduction <add>, %339, %cst_143 [1] : vector<2x32xf32> to vector<2xf32>
    %343 = vector.shape_cast %342 : vector<2xf32> to vector<2x1xf32>
    %cst_144 = arith.constant 3.200000e+01 : f32
    %344 = vector.broadcast %cst_144 : f32 to vector<2x1xf32>
    %345 = arith.divf %343, %344 : vector<2x1xf32>
    %346 = vector.broadcast %345 : vector<2x1xf32> to vector<2x32xf32>
    %347 = arith.subf %339, %346 : vector<2x32xf32>
    %348 = arith.mulf %347, %347 : vector<2x32xf32>
    %cst_145 = arith.constant dense<0.000000e+00> : vector<2xf32>
    %349 = vector.multi_reduction <add>, %348, %cst_145 [1] : vector<2x32xf32> to vector<2xf32>
    %350 = vector.shape_cast %349 : vector<2xf32> to vector<2x1xf32>
    %cst_146 = arith.constant 3.200000e+01 : f32
    %351 = vector.broadcast %cst_146 : f32 to vector<2x1xf32>
    %352 = arith.divf %350, %351 : vector<2x1xf32>
    %cst_147 = arith.constant 9.99999974E-6 : f32
    %353 = vector.broadcast %cst_147 : f32 to vector<2x1xf32>
    %354 = arith.addf %352, %353 : vector<2x1xf32>
    %355 = math.rsqrt %354 : vector<2x1xf32>
    %356 = vector.broadcast %355 : vector<2x1xf32> to vector<2x32xf32>
    %357 = arith.mulf %347, %356 : vector<2x32xf32>
    %358 = vector.broadcast %340 : vector<1x32xf32> to vector<2x32xf32>
    %359 = arith.mulf %357, %358 : vector<2x32xf32>
    %360 = vector.broadcast %341 : vector<1x32xf32> to vector<2x32xf32>
    %361 = arith.addf %359, %360 : vector<2x32xf32>
    %c0_148 = arith.constant 0 : index
    %c0_149 = arith.constant 0 : index
    %362 = vector.load %arg24[%c0_148, %c0_149] : memref<32x16xbf16, #tpu.memory_space<vmem>>, vector<32x16xbf16>
    %363 = arith.truncf %361 : vector<2x32xf32> to vector<2x32xbf16>
    %cst_150 = arith.constant dense<0.000000e+00> : vector<2x16xf32>
    %364 = tpu.matmul %363, %362, %cst_150 {dimension_numbers = #tpu.dot_dimension_numbers<[1], [0], [0], [1], [0, 0, 1, 1], [], []>} : vector<2x32xbf16>, vector<32x16xbf16>, vector<2x16xf32> -> vector<2x16xf32>
    %c0_151 = arith.constant 0 : index
    %c0_152 = arith.constant 0 : index
    %365 = vector.load %arg25[%c0_151, %c0_152] : memref<1x16xf32, #tpu.memory_space<vmem>>, vector<1x16xf32>
    %366 = vector.broadcast %365 : vector<1x16xf32> to vector<2x16xf32>
    %367 = arith.addf %364, %366 : vector<2x16xf32>
    %c0_153 = arith.constant 0 : index
    %c0_154 = arith.constant 0 : index
    %368 = vector.load %arg35[%c0_153, %c0_154] : memref<2x16xf32, #tpu.memory_space<vmem>>, vector<2x16xf32>
    tpu.vector_store %arg35[%c0_153, %c0_154], %367 {strides = array<i32>} : memref<2x16xf32, #tpu.memory_space<vmem>>, vector<2x16xf32>,
    %c0_i32 = arith.constant 0 : i32
    %369 = arith.cmpi eq, %arg0, %c0_i32 : i32
    %370 = arith.extui %369 : i1 to i32
    %c0_i32_155 = arith.constant 0 : i32
    %371 = arith.cmpi ne, %370, %c0_i32_155 : i32
    scf.if %371 {
      %c0_156 = arith.constant 0 : index
      %c0_157 = arith.constant 0 : index
      %372 = vector.load %arg26[%c0_156, %c0_157] : memref<4x21xf32, #tpu.memory_space<vmem>>, vector<4x21xf32>
      %c0_158 = arith.constant 0 : index
      %c0_159 = arith.constant 0 : index
      %373 = vector.load %arg27[%c0_158, %c0_159] : memref<21x256xbf16, #tpu.memory_space<vmem>>, vector<21x256xbf16>
      %374 = arith.truncf %372 : vector<4x21xf32> to vector<4x21xbf16>
      %cst_160 = arith.constant dense<0.000000e+00> : vector<4x256xf32>
      %375 = tpu.matmul %374, %373, %cst_160 {dimension_numbers = #tpu.dot_dimension_numbers<[1], [0], [0], [1], [0, 0, 1, 1], [], []>} : vector<4x21xbf16>, vector<21x256xbf16>, vector<4x256xf32> -> vector<4x256xf32>
      %c0_161 = arith.constant 0 : index
      %c0_162 = arith.constant 0 : index
      %376 = vector.load %arg28[%c0_161, %c0_162] : memref<1x256xf32, #tpu.memory_space<vmem>>, vector<1x256xf32>
      %377 = vector.broadcast %376 : vector<1x256xf32> to vector<4x256xf32>
      %378 = arith.addf %375, %377 : vector<4x256xf32>
      %cst_163 = arith.constant 0.000000e+00 : f32
      %379 = vector.broadcast %cst_163 : f32 to vector<4x256xf32>
      %380 = arith.maximumf %378, %379 : vector<4x256xf32>
      %c0_164 = arith.constant 0 : index
      %c0_165 = arith.constant 0 : index
      %381 = vector.load %arg29[%c0_164, %c0_165] : memref<256x256xbf16, #tpu.memory_space<vmem>>, vector<256x256xbf16>
      %382 = arith.truncf %380 : vector<4x256xf32> to vector<4x256xbf16>
      %cst_166 = arith.constant dense<0.000000e+00> : vector<4x256xf32>
      %383 = tpu.matmul %382, %381, %cst_166 {dimension_numbers = #tpu.dot_dimension_numbers<[1], [0], [0], [1], [0, 0, 1, 1], [], []>} : vector<4x256xbf16>, vector<256x256xbf16>, vector<4x256xf32> -> vector<4x256xf32>
      %c0_167 = arith.constant 0 : index
      %c0_168 = arith.constant 0 : index
      %384 = vector.load %arg30[%c0_167, %c0_168] : memref<1x256xf32, #tpu.memory_space<vmem>>, vector<1x256xf32>
      %385 = vector.broadcast %384 : vector<1x256xf32> to vector<4x256xf32>
      %386 = arith.addf %383, %385 : vector<4x256xf32>
      %cst_169 = arith.constant 0.000000e+00 : f32
      %387 = vector.broadcast %cst_169 : f32 to vector<4x256xf32>
      %388 = arith.maximumf %386, %387 : vector<4x256xf32>
      %c0_170 = arith.constant 0 : index
      %c0_171 = arith.constant 0 : index
      %389 = vector.load %arg31[%c0_170, %c0_171] : memref<256x256xbf16, #tpu.memory_space<vmem>>, vector<256x256xbf16>
      %390 = arith.truncf %388 : vector<4x256xf32> to vector<4x256xbf16>
      %cst_172 = arith.constant dense<0.000000e+00> : vector<4x256xf32>
      %391 = tpu.matmul %390, %389, %cst_172 {dimension_numbers = #tpu.dot_dimension_numbers<[1], [0], [0], [1], [0, 0, 1, 1], [], []>} : vector<4x256xbf16>, vector<256x256xbf16>, vector<4x256xf32> -> vector<4x256xf32>
      %c0_173 = arith.constant 0 : index
      %c0_174 = arith.constant 0 : index
      %392 = vector.load %arg32[%c0_173, %c0_174] : memref<1x256xf32, #tpu.memory_space<vmem>>, vector<1x256xf32>
      %393 = vector.broadcast %392 : vector<1x256xf32> to vector<4x256xf32>
      %394 = arith.addf %391, %393 : vector<4x256xf32>
      %cst_175 = arith.constant 0.000000e+00 : f32
      %395 = vector.broadcast %cst_175 : f32 to vector<4x256xf32>
      %396 = arith.maximumf %394, %395 : vector<4x256xf32>
      %c0_176 = arith.constant 0 : index
      %c0_177 = arith.constant 0 : index
      %397 = vector.load %arg33[%c0_176, %c0_177] : memref<256x16xbf16, #tpu.memory_space<vmem>>, vector<256x16xbf16>
      %398 = arith.truncf %396 : vector<4x256xf32> to vector<4x256xbf16>
      %cst_178 = arith.constant dense<0.000000e+00> : vector<4x16xf32>
      %399 = tpu.matmul %398, %397, %cst_178 {dimension_numbers = #tpu.dot_dimension_numbers<[1], [0], [0], [1], [0, 0, 1, 1], [], []>} : vector<4x256xbf16>, vector<256x16xbf16>, vector<4x16xf32> -> vector<4x16xf32>
      %c0_179 = arith.constant 0 : index
      %c0_180 = arith.constant 0 : index
      %400 = vector.load %arg34[%c0_179, %c0_180] : memref<1x16xf32, #tpu.memory_space<vmem>>, vector<1x16xf32>
      %401 = vector.broadcast %400 : vector<1x16xf32> to vector<4x16xf32>
      %402 = arith.addf %399, %401 : vector<4x16xf32>
      %c0_181 = arith.constant 0 : index
      %c0_182 = arith.constant 0 : index
      %403 = vector.load %arg36[%c0_181, %c0_182] : memref<4x16xf32, #tpu.memory_space<vmem>>, vector<4x16xf32>
      tpu.vector_store %arg36[%c0_181, %c0_182], %402 {strides = array<i32>} : memref<4x16xf32, #tpu.memory_space<vmem>>, vector<4x16xf32>,
    } else {
    }
    return
  }
  func.func @transform_0(%arg0: i32) -> (i32, i32) {
    %c0_i32 = arith.constant 0 : i32
    %c0_i32_0 = arith.constant 0 : i32
    return %arg0, %c0_i32 : i32, i32
  }
  func.func @transform_1(%arg0: i32) -> (i32, i32) {
    %c0_i32 = arith.constant 0 : i32
    %c0_i32_0 = arith.constant 0 : i32
    %c0_i32_1 = arith.constant 0 : i32
    return %c0_i32, %c0_i32_0 : i32, i32
  }
  func.func @transform_2(%arg0: i32) -> (i32, i32) {
    %c0_i32 = arith.constant 0 : i32
    %c0_i32_0 = arith.constant 0 : i32
    %c0_i32_1 = arith.constant 0 : i32
    return %c0_i32, %c0_i32_0 : i32, i32
  }
  func.func @transform_3(%arg0: i32) -> (i32, i32) {
    %c0_i32 = arith.constant 0 : i32
    %c0_i32_0 = arith.constant 0 : i32
    %c0_i32_1 = arith.constant 0 : i32
    return %c0_i32, %c0_i32_0 : i32, i32
  }
  func.func @transform_4(%arg0: i32) -> (i32, i32) {
    %c0_i32 = arith.constant 0 : i32
    %c0_i32_0 = arith.constant 0 : i32
    %c0_i32_1 = arith.constant 0 : i32
    return %c0_i32, %c0_i32_0 : i32, i32
  }
  func.func @transform_5(%arg0: i32) -> (i32, i32) {
    %c0_i32 = arith.constant 0 : i32
    %c0_i32_0 = arith.constant 0 : i32
    %c0_i32_1 = arith.constant 0 : i32
    return %c0_i32, %c0_i32_0 : i32, i32
  }
  func.func @transform_6(%arg0: i32) -> (i32, i32) {
    %c0_i32 = arith.constant 0 : i32
    %c0_i32_0 = arith.constant 0 : i32
    %c0_i32_1 = arith.constant 0 : i32
    return %c0_i32, %c0_i32_0 : i32, i32
  }
  func.func @transform_7(%arg0: i32) -> (i32, i32) {
    %c0_i32 = arith.constant 0 : i32
    %c0_i32_0 = arith.constant 0 : i32
    %c0_i32_1 = arith.constant 0 : i32
    return %c0_i32, %c0_i32_0 : i32, i32
  }
  func.func @transform_8(%arg0: i32) -> (i32, i32) {
    %c0_i32 = arith.constant 0 : i32
    %c0_i32_0 = arith.constant 0 : i32
    %c0_i32_1 = arith.constant 0 : i32
    return %c0_i32, %c0_i32_0 : i32, i32
  }
  func.func @transform_9(%arg0: i32) -> (i32, i32) {
    %c0_i32 = arith.constant 0 : i32
    %c0_i32_0 = arith.constant 0 : i32
    %c0_i32_1 = arith.constant 0 : i32
    return %c0_i32, %c0_i32_0 : i32, i32
  }
  func.func @transform_10(%arg0: i32) -> (i32, i32) {
    %c0_i32 = arith.constant 0 : i32
    %c0_i32_0 = arith.constant 0 : i32
    %c0_i32_1 = arith.constant 0 : i32
    return %c0_i32, %c0_i32_0 : i32, i32
  }
  func.func @transform_11(%arg0: i32) -> (i32, i32) {
    %c0_i32 = arith.constant 0 : i32
    %c0_i32_0 = arith.constant 0 : i32
    %c0_i32_1 = arith.constant 0 : i32
    return %c0_i32, %c0_i32_0 : i32, i32
  }
  func.func @transform_12(%arg0: i32) -> (i32, i32, i32) {
    %c0_i32 = arith.constant 0 : i32
    %c0_i32_0 = arith.constant 0 : i32
    %c0_i32_1 = arith.constant 0 : i32
    %c0_i32_2 = arith.constant 0 : i32
    return %c0_i32, %c0_i32_0, %c0_i32_1 : i32, i32, i32
  }
  func.func @transform_13(%arg0: i32) -> (i32, i32, i32) {
    %c0_i32 = arith.constant 0 : i32
    %c0_i32_0 = arith.constant 0 : i32
    %c0_i32_1 = arith.constant 0 : i32
    %c0_i32_2 = arith.constant 0 : i32
    return %c0_i32, %c0_i32_0, %c0_i32_1 : i32, i32, i32
  }
  func.func @transform_14(%arg0: i32) -> (i32, i32) {
    %c0_i32 = arith.constant 0 : i32
    %c0_i32_0 = arith.constant 0 : i32
    %c0_i32_1 = arith.constant 0 : i32
    return %c0_i32, %c0_i32_0 : i32, i32
  }
  func.func @transform_15(%arg0: i32) -> (i32, i32) {
    %c0_i32 = arith.constant 0 : i32
    %c0_i32_0 = arith.constant 0 : i32
    %c0_i32_1 = arith.constant 0 : i32
    return %c0_i32, %c0_i32_0 : i32, i32
  }
  func.func @transform_16(%arg0: i32) -> (i32, i32) {
    %c0_i32 = arith.constant 0 : i32
    %c0_i32_0 = arith.constant 0 : i32
    %c0_i32_1 = arith.constant 0 : i32
    return %c0_i32, %c0_i32_0 : i32, i32
  }
  func.func @transform_17(%arg0: i32) -> (i32, i32, i32) {
    %c0_i32 = arith.constant 0 : i32
    %c0_i32_0 = arith.constant 0 : i32
    %c0_i32_1 = arith.constant 0 : i32
    %c0_i32_2 = arith.constant 0 : i32
    return %c0_i32, %c0_i32_0, %c0_i32_1 : i32, i32, i32
  }
  func.func @transform_18(%arg0: i32) -> (i32, i32) {
    %c0_i32 = arith.constant 0 : i32
    %c0_i32_0 = arith.constant 0 : i32
    %c0_i32_1 = arith.constant 0 : i32
    return %c0_i32, %c0_i32_0 : i32, i32
  }
  func.func @transform_19(%arg0: i32) -> (i32, i32, i32) {
    %c0_i32 = arith.constant 0 : i32
    %c0_i32_0 = arith.constant 0 : i32
    %c0_i32_1 = arith.constant 0 : i32
    %c0_i32_2 = arith.constant 0 : i32
    return %c0_i32, %c0_i32_0, %c0_i32_1 : i32, i32, i32
  }
  func.func @transform_20(%arg0: i32) -> (i32, i32) {
    %c0_i32 = arith.constant 0 : i32
    %c0_i32_0 = arith.constant 0 : i32
    %c0_i32_1 = arith.constant 0 : i32
    return %c0_i32, %c0_i32_0 : i32, i32
  }
  func.func @transform_21(%arg0: i32) -> (i32, i32) {
    %c0_i32 = arith.constant 0 : i32
    %c0_i32_0 = arith.constant 0 : i32
    %c0_i32_1 = arith.constant 0 : i32
    return %c0_i32, %c0_i32_0 : i32, i32
  }
  func.func @transform_22(%arg0: i32) -> (i32, i32) {
    %c0_i32 = arith.constant 0 : i32
    %c0_i32_0 = arith.constant 0 : i32
    %c0_i32_1 = arith.constant 0 : i32
    return %c0_i32, %c0_i32_0 : i32, i32
  }
  func.func @transform_23(%arg0: i32) -> (i32, i32) {
    %c0_i32 = arith.constant 0 : i32
    %c0_i32_0 = arith.constant 0 : i32
    %c0_i32_1 = arith.constant 0 : i32
    return %c0_i32, %c0_i32_0 : i32, i32
  }
  func.func @transform_24(%arg0: i32) -> (i32, i32) {
    %c0_i32 = arith.constant 0 : i32
    %c0_i32_0 = arith.constant 0 : i32
    %c0_i32_1 = arith.constant 0 : i32
    return %c0_i32, %c0_i32_0 : i32, i32
  }
  func.func @transform_25(%arg0: i32) -> (i32, i32) {
    %c0_i32 = arith.constant 0 : i32
    %c0_i32_0 = arith.constant 0 : i32
    %c0_i32_1 = arith.constant 0 : i32
    return %c0_i32, %c0_i32_0 : i32, i32
  }
  func.func @transform_26(%arg0: i32) -> (i32, i32) {
    %c0_i32 = arith.constant 0 : i32
    %c0_i32_0 = arith.constant 0 : i32
    %c0_i32_1 = arith.constant 0 : i32
    return %c0_i32, %c0_i32_0 : i32, i32
  }
  func.func @transform_27(%arg0: i32) -> (i32, i32) {
    %c0_i32 = arith.constant 0 : i32
    %c0_i32_0 = arith.constant 0 : i32
    %c0_i32_1 = arith.constant 0 : i32
    return %c0_i32, %c0_i32_0 : i32, i32
  }
  func.func @transform_28(%arg0: i32) -> (i32, i32) {
    %c0_i32 = arith.constant 0 : i32
    %c0_i32_0 = arith.constant 0 : i32
    %c0_i32_1 = arith.constant 0 : i32
    return %c0_i32, %c0_i32_0 : i32, i32
  }
  func.func @transform_29(%arg0: i32) -> (i32, i32) {
    %c0_i32 = arith.constant 0 : i32
    %c0_i32_0 = arith.constant 0 : i32
    %c0_i32_1 = arith.constant 0 : i32
    return %c0_i32, %c0_i32_0 : i32, i32
  }
  func.func @transform_30(%arg0: i32) -> (i32, i32) {
    %c0_i32 = arith.constant 0 : i32
    %c0_i32_0 = arith.constant 0 : i32
    %c0_i32_1 = arith.constant 0 : i32
    return %c0_i32, %c0_i32_0 : i32, i32
  }
  func.func @transform_31(%arg0: i32) -> (i32, i32) {
    %c0_i32 = arith.constant 0 : i32
    %c0_i32_0 = arith.constant 0 : i32
    %c0_i32_1 = arith.constant 0 : i32
    return %c0_i32, %c0_i32_0 : i32, i32
  }
  func.func @transform_32(%arg0: i32) -> (i32, i32) {
    %c0_i32 = arith.constant 0 : i32
    %c0_i32_0 = arith.constant 0 : i32
    %c0_i32_1 = arith.constant 0 : i32
    return %c0_i32, %c0_i32_0 : i32, i32
  }
  func.func @transform_33(%arg0: i32) -> (i32, i32) {
    %c0_i32 = arith.constant 0 : i32
    %c0_i32_0 = arith.constant 0 : i32
    %c0_i32_1 = arith.constant 0 : i32
    return %c0_i32, %c0_i32_0 : i32, i32
  }
  func.func @transform_34(%arg0: i32) -> (i32, i32) {
    %c0_i32 = arith.constant 0 : i32
    %c0_i32_0 = arith.constant 0 : i32
    return %arg0, %c0_i32 : i32, i32
  }
  func.func @transform_35(%arg0: i32) -> (i32, i32) {
    %c0_i32 = arith.constant 0 : i32
    %c0_i32_0 = arith.constant 0 : i32
    %c0_i32_1 = arith.constant 0 : i32
    return %c0_i32, %c0_i32_0 : i32, i32
  }
}

</mosaic_0001>

<bundles_post_ra>
// kernel: _lambda_.1
= control target key start
LH: loop header
LB: loop body
LE: loop exit
PB: predicated region body
PF: predicated region fallthrough
CT: control target
= control target key end

     0   :  { %s4109_s6 = smov 1   ;;  %s4110_s10 = smov 2   ;;  %s4837_s0 = inlined_call_operand.smem [shape: u32[36], index: -1, kind: input, shape index: {}] }
   0x1   :  { %s4158_s5 = sld [smem:[%s4837_s0]]   ;;  %s4111_s14 = smov 3  }
   0x2   :  { %s4163_s9 = sld [smem:[%s4837_s0 + %s4109_s6]]   ;;  %s4112_s18 = smov 4  }
   0x3   :  { %s4168_s13 = sld [smem:[%s4837_s0 + %s4110_s10]]   ;;  %s4113_s22 = smov 5  }
   0x4   :  { %s4173_s17 = sld [smem:[%s4837_s0 + %s4111_s14]]   ;;  %s4114_s26 = smov 6  }
   0x5   :  { %s4178_s21 = sld [smem:[%s4837_s0 + %s4112_s18]]   ;;  %s4115_s30 = smov 7  }
   0x6   :  { %s4183_s25 = sld [smem:[%s4837_s0 + %s4113_s22]]   ;;  %s4116_s4 = smov 8  }
   0x7   :  { %s4188_s29 = sld [smem:[%s4837_s0 + %s4114_s26]]   ;;  %s4117_s10 = smov 9  }
   0x8   :  { %s4193_s3 = sld [smem:[%s4837_s0 + %s4115_s30]]   ;;  %s4118_s15 = smov 10  }
   0x9   :  { %s4198_s8 = sld [smem:[%s4837_s0 + %s4116_s4]]   ;;  %s4119_s20 = smov 11  }
   0xa   :  { %s4203_s14 = sld [smem:[%s4837_s0 + %s4117_s10]]   ;;  %s4120_s26 = smov 12  }
   0xb   :  { %s4208_s19 = sld [smem:[%s4837_s0 + %s4118_s15]]   ;;  %s4121_s1 = smov 13  }
   0xc   :  { %s4213_s24 = sld [smem:[%s4837_s0 + %s4119_s20]]   ;;  %s4122_s7 = smov 14  }
   0xd   :  { %s4218_s30 = sld [smem:[%s4837_s0 + %s4120_s26]]   ;;  %s4123_s15 = smov 15  }
   0xe   :  { %s4223_s6 = sld [smem:[%s4837_s0 + %s4121_s1]]   ;;  %s4124_s22 = smov 16  }
   0xf   :  { %s4228_s12 = sld [smem:[%s4837_s0 + %s4122_s7]]   ;;  %s4125_s28 = smov 17  }
  0x10   :  { %s4233_s20 = sld [smem:[%s4837_s0 + %s4123_s15]]   ;;  %s4126_s7 = smov 18  }
  0x11   :  { %s4238_s27 = sld [smem:[%s4837_s0 + %s4124_s22]]   ;;  %s4127_s15 = smov 19  }
  0x12   :  { %s4243_s4 = sld [smem:[%s4837_s0 + %s4125_s28]]   ;;  %s4128_s22 = smov 20  }
  0x13   :  { %s4129_s28 = smov 21  }
  0x15   :  { %4849 = sst [smem:[#allocation5_spill]] %s4228_s12 }
  0x16   :  { %4850 = sst [smem:[#allocation6_spill]] %s4233_s20 }
  0x17   :  { %4851 = sst [smem:[#allocation7_spill]] %s4238_s27 }
  0x18   :  { %4852 = sst [smem:[#allocation8_spill]] %s4243_s4 }
  0x19   :  { %s4248_s12 = sld [smem:[%s4837_s0 + %s4126_s7]]   ;;  %s4130_s7 = smov 22  }
  0x1a   :  { %s4253_s20 = sld [smem:[%s4837_s0 + %s4127_s15]]   ;;  %s4131_s15 = smov 23  }
  0x1b   :  { %s4258_s27 = sld [smem:[%s4837_s0 + %s4128_s22]]   ;;  %s4132_s22 = smov 24  }
  0x1c   :  { %s4263_s4 = sld [smem:[%s4837_s0 + %s4129_s28]]   ;;  %s4133_s28 = smov 25  }
  0x1f   :  { %4853 = sst [smem:[#allocation9_spill]] %s4248_s12 }
  0x20   :  { %4854 = sst [smem:[#allocation10_spill]] %s4253_s20 }
  0x21   :  { %4855 = sst [smem:[#allocation11_spill]] %s4258_s27 }
  0x22   :  { %4856 = sst [smem:[#allocation12_spill]] %s4263_s4 }
  0x23   :  { %s4268_s12 = sld [smem:[%s4837_s0 + %s4130_s7]]   ;;  %s4134_s7 = smov 26  }
  0x24   :  { %s4273_s20 = sld [smem:[%s4837_s0 + %s4131_s15]]   ;;  %s4135_s15 = smov 27  }
  0x25   :  { %s4278_s27 = sld [smem:[%s4837_s0 + %s4132_s22]]   ;;  %s4136_s22 = smov 28  }
  0x26   :  { %s4283_s4 = sld [smem:[%s4837_s0 + %s4133_s28]]   ;;  %s4137_s28 = smov 29  }
  0x29   :  { %4857 = sst [smem:[#allocation13_spill]] %s4268_s12 }
  0x2a   :  { %4858 = sst [smem:[#allocation14_spill]] %s4273_s20 }
  0x2b   :  { %4859 = sst [smem:[#allocation15_spill]] %s4278_s27 }
  0x2c   :  { %4860 = sst [smem:[#allocation16_spill]] %s4283_s4 }
  0x2d   :  { %s4288_s12 = sld [smem:[%s4837_s0 + %s4134_s7]]   ;;  %s4138_s7 = smov 30  }
  0x2e   :  { %s4293_s20 = sld [smem:[%s4837_s0 + %s4135_s15]]   ;;  %s4139_s15 = smov 31  }
  0x2f   :  { %s4298_s27 = sld [smem:[%s4837_s0 + %s4136_s22]]   ;;  %s4140_s22 = smov 32  }
  0x30   :  { %s4303_s4 = sld [smem:[%s4837_s0 + %s4137_s28]]   ;;  %s4141_s28 = smov 33  }
  0x33   :  { %4861 = sst [smem:[#allocation17_spill]] %s4288_s12 }
  0x34   :  { %4862 = sst [smem:[#allocation18_spill]] %s4293_s20 }
  0x35   :  { %4863 = sst [smem:[#allocation19_spill]] %s4298_s27 }
  0x36   :  { %4864 = sst [smem:[#allocation20_spill]] %s4303_s4 }
  0x37   :  { %s4308_s12 = sld [smem:[%s4837_s0 + %s4138_s7]]   ;;  %s4142_s7 = smov 34  }
  0x38   :  { %s4313_s20 = sld [smem:[%s4837_s0 + %s4139_s15]]   ;;  %s4143_s15 = smov 35  }
  0x39   :  { %s4318_s27 = sld [smem:[%s4837_s0 + %s4140_s22]]  }
  0x3a   :  { %s4323_s4 = sld [smem:[%s4837_s0 + %s4141_s28]]  }
  0x3d   :  { %4865 = sst [smem:[#allocation21_spill]] %s4308_s12 }
  0x3e   :  { %4866 = sst [smem:[#allocation22_spill]] %s4313_s20 }
  0x3f   :  { %s4328_s12 = sld [smem:[%s4837_s0 + %s4142_s7]]  }
  0x40   :  { %s4333_s20 = sld [smem:[%s4837_s0 + %s4143_s15]]  }
  0x41   :  { %v147_v0 = vld [vmem:[%s4158_s5] sm:$0xff]  ;;  %v148_v1 = vld [vmem:[%s4158_s5 + $0x8] sm:$0xff]  ;;  %vm153_vm0 = vcmask 523264   ;;  %v149_v2 = vld [vmem:[%s4158_s5 + $0x10] sm:$0xff]  ;;  %v4144_v9 = vmov 0  }
  0x42   :  { %v154_v3 = vsel %vm153_vm0, %v148_v1, 0.0  ;;  %v150_v4 = vld [vmem:[%s4158_s5 + $0x18] sm:$0xff]  ;;  %329 = vmatprep.subr.bf16.mxu0 %v4144_v9  ;;  %v3847_v10 = vld [vmem:[%s4183_s25 + $0x30] sm:$0xff]   ;;  %3834 = vset.pattern.permute.xlu0 %v4144_v9  ;;  %v3848_v11 = vld [vmem:[%s4183_s25 + $0x28] sm:$0xff]  }
  0x43   :  { %v155_v5 = vadd.f32 %v154_v3, %v147_v0  ;;  %v158_v6 = vsel %vm153_vm0, %v150_v4, 0.0  ;;  %v3846_v8 = vld [vmem:[%s4183_s25 + $0x38] sm:$0xff]   ;;  %3835 = vset.pattern.permute.xlu1 %v4144_v9  ;;  %562 = vmatprep.mubr.bf16.mxu1 %v4144_v9  ;;  %v3849_v12 = vld [vmem:[%s4183_s25 + $0x20] sm:$0xff]  }
  0x44   :  { %v159_v7 = vadd.f32 %v158_v6, %v149_v2  ;;  %330 = vmatpush1.bf16.msra.mxu0 %v3846_v8 }
  0x45   :  { %156 = vadd.xlane.f32.xlu0 %v155_v5  ;;  %331 = vmatprep.subr.bf16.mxu0 %v4144_v9 }
  0x48   :  { %332 = vmatpush1.bf16.msra.mxu0 %v3847_v10 }
  0x49   :  { %160 = vadd.xlane.f32.xlu0 %v159_v7  ;;  %333 = vmatprep.subr.bf16.mxu0 %v4144_v9 }
  0x4c   :  { %334 = vmatpush1.bf16.msra.mxu0 %v3848_v11 }
  0x4d   :  { %335 = vmatprep.subr.bf16.mxu0 %v4144_v9 }
  0x50   :  { %336 = vmatpush1.bf16.msra.mxu0 %v3849_v12 }
  0x51   :  { %337 = vmatprep.subr.bf16.mxu0 %v4144_v9 }
  0x52   :  { %77 = vsyncpa [#allocation3], 0  ;;  %v3850_v29 = vld [vmem:[%s4183_s25 + $0x18] sm:$0xff]   ;;  %v3851_v30 = vld [vmem:[%s4183_s25 + $0x10] sm:$0xff]   ;;  %v192_v43 = vlaneseq  ;;  %vm372_vm1 = vcmask 261120   ;;  %vm4146_vm6 = vmmov 0  }
  0x53   :  { %v3852_v31 = vld [vmem:[%s4183_s25 + $0x8] sm:$0xff]   ;;  %v3853_v32 = vld [vmem:[%s4183_s25] sm:$0xff]   ;;  %v3854_v33 = vld [vmem:[%s4183_s25 + $0x58] sm:$0xff]   ;;  %s4147_s0 = smov 64   ;;  %vm744_vm7 = vcmask 1043456   ;;  %vm714_vm9 = vcmask 64512  }
  0x54   :  { %338 = vmatpush1.bf16.msra.mxu0 %v3850_v29  ;;  %v3855_v34 = vld [vmem:[%s4183_s25 + $0x50] sm:$0xff]   ;;  %v3856_v35 = vld [vmem:[%s4183_s25 + $0x48] sm:$0xff]   ;;  %v3857_v36 = vld [vmem:[%s4183_s25 + $0x40] sm:$0xff]   ;;  %v193_v44 = vshrl.u32 %v192_v43, 7  ;;  %s4867_s5 = sld [smem:[#allocation5_spill]]  ;;  %vm2349_vm10 = vcmask 1040384  }
  0x55   :  { %339 = vmatprep.subr.bf16.mxu0 %v4144_v9  ;;  %v151_v47 = vld [vmem:[%s4173_s17] sm:$0x3]  ;;  %s4870_s17 = sld [smem:[#allocation7_spill]]  ;;  %vm2353_vm11 = vcmask 254976   ;;  %vm2490_vm12 = vcmask 1041408   ;;  %vm2491_vm13 = vcmask 1042432  }
  0x56   :  { %v4371_v45 = vsub.s32 0, %v193_v44  ;;  %v4373_v46 = vsub.s32 1, %v193_v44  ;;  %v152_v49 = vld [vmem:[%s4178_s21] sm:$0x3]  ;;  %s4871_s21 = sld [smem:[#allocation10_spill]]  ;;  %vm2486_vm14 = vcmask 171008  }
  0x57   :  { %v3273_v5 = vld [vmem:[%s4188_s29] ss:$0 sm:$0xff]  ;;  %s4872_s25 = sld [smem:[#allocation9_spill]]  ;;  %vm2448_vm15 = vcmask 123904  }
  0x58   :  { %340 = vmatpush1.bf16.msra.mxu0 %v3851_v30  ;;  %v195_v51 = vrot.slane %v151_v47, %v4371_v45  ;;  %v199_v52 = vrot.slane %v151_v47, %v4373_v46  ;;  %v210_v55 = vrot.slane %v152_v49, %v4371_v45  ;;  %v214_v56 = vrot.slane %v152_v49, %v4373_v46  ;;  %v439_v47 = vld [vmem:[%s4168_s13] sm:$0xff]  ;;  %s4873_s29 = sld [smem:[#allocation11_spill]] }
  0x59   :  { %341 = vmatprep.subr.bf16.mxu0 %v4144_v9  ;;  %s4881_s22 = sld [smem:[#allocation21_spill]] }
  0x5a   :  { %s4882_s23 = sld [smem:[#allocation15_spill]] }
  0x5b   :  { %s4883_s26 = sld [smem:[#allocation20_spill]] }
  0x5c   :  { %342 = vmatpush1.bf16.msra.mxu0 %v3852_v31  ;;  %s4884_s28 = sld [smem:[#allocation22_spill]] }
  0x5d   :  { %343 = vmatprep.subr.bf16.mxu0 %v4144_v9 }
  0x60   :  { %344 = vmatpush1.bf16.msra.mxu0 %v3853_v32 }
  0x61   :  { %353 = vmatprep.subr.bf16.mxu0 %v4144_v9 }
  0x64   :  { %354 = vmatpush2.bf16.msra.mxu0 %v3854_v33 }
  0x65   :  { %355 = vmatprep.subr.bf16.mxu0 %v4144_v9 }
  0x68   :  { %356 = vmatpush2.bf16.msra.mxu0 %v3855_v34 }
  0x69   :  { %357 = vmatprep.subr.bf16.mxu0 %v4144_v9 }
  0x6c   :  { %358 = vmatpush2.bf16.msra.mxu0 %v3856_v35 }
  0x6d   :  { %359 = vmatprep.subr.bf16.mxu0 %v4144_v9 }
  0x70   :  { %360 = vmatpush2.bf16.msra.mxu0 %v3857_v36  ;;  %v3287_v36 = vld [vmem:[%s4193_s3] ss:$0 sm:$0xff]  ;;  %s4874_s3 = sld [smem:[#allocation17_spill]] }
  0xce   :  { %v157_v13 = vpop.xlane.xlu0 %156 }
  0xcf   :  { %v163_v14 = vmul.f32 0.0052083335, %v157_v13 }
  0xd1   :  { %v165_v15 = vsub.f32 %v147_v0, %v163_v14  ;;  %v166_v16 = vsub.f32 %v148_v1, %v163_v14 }
  0xd2   :  { %v161_v17 = vpop.xlane.xlu0 %160 }
  0xd3   :  { %v164_v18 = vmul.f32 0.0052083335, %v161_v17  ;;  %v169_v19 = vmul.f32 %v165_v15, %v165_v15  ;;  %v170_v20 = vmul.f32 %v166_v16, %v166_v16 }
  0xd5   :  { %v167_v21 = vsub.f32 %v149_v2, %v164_v18  ;;  %v168_v22 = vsub.f32 %v150_v4, %v164_v18  ;;  %v173_v23 = vsel %vm153_vm0, %v170_v20, 0.0 }
  0xd6   :  { %v174_v24 = vadd.f32 %v173_v23, %v169_v19 }
  0xd7   :  { %v171_v25 = vmul.f32 %v167_v21, %v167_v21  ;;  %v172_v26 = vmul.f32 %v168_v22, %v168_v22 }
  0xd8   :  { %175 = vadd.xlane.f32.xlu1 %v174_v24 }
  0xd9   :  { %v177_v27 = vsel %vm153_vm0, %v172_v26, 0.0  ;;  %v416_v26 = vld [vmem:[%s4163_s9] sm:$0xff] }
  0xda   :  { %v178_v28 = vadd.f32 %v177_v27, %v171_v25  ;;  %v417_v25 = vld [vmem:[%s4163_s9 + $0x8] sm:$0xff]  ;;  %vm418_vm3 = vcmp.gt.f32.partialorder %v416_v26, 0.5  ;;  %s4868_s9 = sld [smem:[#allocation8_spill]] }
  0xdb   :  { %vm419_vm2 = vcmp.gt.f32.partialorder %v417_v25, 0.5 }
  0xdc   :  { %179 = vadd.xlane.f32.xlu1 %v178_v28  ;;  %v422_v27 = vsel %vm419_vm2, 1, %v4144_v9  ;;  %v421_v28 = vsel %vm418_vm3, 1, %v4144_v9 }
 0x161   :  { %v176_v37 = vpop.xlane.xlu1 %175 }
 0x162   :  { %v181_v38 = vmul.f32 0.0052083335, %v176_v37 }
 0x164   :  { %v183_v39 = vadd.f32 1e-05, %v181_v38 }
 0x165   :  { %v180_v40 = vpop.xlane.xlu1 %179 }
 0x166   :  { %4021 = vrsqrt.f32 %v183_v39  ;;  %v182_v41 = vmul.f32 0.0052083335, %v180_v40  ;;  %v3288_v39 = vld [vmem:[%s4198_s8] ss:$0 sm:$0xff]  ;;  %s4875_s8 = sld [smem:[#allocation16_spill]] }
 0x168   :  { %v184_v42 = vadd.f32 1e-05, %v182_v41 }
 0x16a   :  { %4023 = vrsqrt.f32 %v184_v42  ;;  %v3289_v42 = vld [vmem:[%s4203_s14] ss:$0 sm:$0xff]  ;;  %s4876_s14 = sld [smem:[#allocation14_spill]] }
 0x173   :  { %v4022_v48 = vpop.eup %4021 }
 0x174   :  { %v188_v50 = vmul.f32 %v4022_v48, %v166_v16  ;;  %v187_v53 = vmul.f32 %v4022_v48, %v165_v15 }
 0x176   :  { %v203_v58 = vmul.f32 %v199_v52, %v188_v50  ;;  %v202_v60 = vmul.f32 %v195_v51, %v187_v53 }
 0x177   :  { %v4024_v54 = vpop.eup %4023 }
 0x178   :  { %v190_v57 = vmul.f32 %v4024_v54, %v168_v22  ;;  %v189_v59 = vmul.f32 %v4024_v54, %v167_v21  ;;  %v218_v63 = vadd.f32 %v214_v56, %v203_v58  ;;  %v217_v1 = vadd.f32 %v210_v55, %v202_v60  ;;  %v440_v54 = vld [vmem:[%s4168_s13 + $0x8] sm:$0xff]  ;;  %s4869_s13 = sld [smem:[#allocation6_spill]] }
 0x17a   :  { %v205_v61 = vmul.f32 %v199_v52, %v190_v57  ;;  %v204_v62 = vmul.f32 %v195_v51, %v189_v59 }
 0x17c   :  { %v220_v0 = vadd.f32 %v214_v56, %v205_v61  ;;  %v219_v2 = vadd.f32 %v210_v55, %v204_v62 }
 0x17e   :  { %v246_v3 = vpack.c.bf16 %v220_v0, %v218_v63  ;;  %v245_v4 = vpack.c.bf16 %v219_v2, %v217_v1 }
 0x180   :  { %3286 = vmatprep.mubr.msk.bf16.mxu0 %vm153_vm0, %v246_v3 }
 0x181   :  { %362 = vmatmul.mubr.bf16.vlgmr.msra.gmra.mxu0 %v245_v4 }
 0x241   :  { %v363_v6 = vpop.f32.mrf.mxu0 }
 0x242   :  { %v364_v7 = vadd.f32 %v3273_v5, %v363_v6  ;;  %v3860_v6 = vld [vmem:[%s4218_s30 + $0x18] ss:$12 sps:$4 sm:$0xff]  }
 0x243   :  { %v365_v8 = vpop.f32.mrf.mxu0 }
 0x244   :  { %v373_v10 = vsel %vm372_vm1, %v364_v7, 0.0  ;;  %v3863_v8 = vld [vmem:[%s4218_s30] ss:$12 sps:$4 sm:$0xff]  }
 0x245   :  { %v366_v11 = vpop.f32.mrf.mxu0  ;;  %374 = vadd.xlane.f32.xlu0 %v373_v10  ;;  %v4145_v10 = vmov 0.0  }
 0x246   :  { %v367_v12 = vadd.f32 %v3273_v5, %v366_v11  ;;  %v3858_v5 = vld [vmem:[%s4218_s30 + $0x1c] ss:$12 sps:$4 sm:$0xff]   ;;  %3625 = vmatprep.subr.bf16.mxu0 %v4145_v10  ;;  %3627 = vmatprep.mubr.msk.bf16.mxu0 %vm4146_vm6, %v4145_v10 }
 0x247   :  { %v368_v13 = vpop.f32.mrf.mxu0  ;;  %542 = vmatprep.subr.bf16.mxu1 %v3858_v5 }
 0x248   :  { %v376_v14 = vsel %vm372_vm1, %v367_v12, 0.0  ;;  %543 = vmatpush1.bf16.msra.mxu1 %v3860_v6 }
 0x249   :  { %377 = vadd.xlane.f32.xlu1 %v376_v14 }
 0x2ce   :  { %v375_v15 = vpop.xlane.xlu0 %374 }
 0x2cf   :  { %v380_v16 = vmul.f32 0.03125, %v375_v15 }
 0x2d1   :  { %v382_v17 = vsub.f32 %v364_v7, %v380_v16  ;;  %v3861_v7 = vld [vmem:[%s4218_s30 + $0x4] ss:$12 sps:$4 sm:$0xff]  }
 0x2d2   :  { %v378_v18 = vpop.xlane.xlu1 %377  ;;  %544 = vmatprep.subr.bf16.mxu1 %v3861_v7 }
 0x2d3   :  { %v381_v19 = vmul.f32 0.03125, %v378_v18  ;;  %v384_v20 = vmul.f32 %v382_v17, %v382_v17  ;;  %545 = vmatpush1.bf16.msra.mxu1 %v3863_v8 }
 0x2d4   :  { %3593 = vmatprep.subr.bf16.mxu1 %v4145_v10 }
 0x2d5   :  { %v383_v21 = vsub.f32 %v367_v12, %v381_v19  ;;  %v386_v22 = vsel %vm372_vm1, %v384_v20, 0.0  ;;  %v3290_v19 = vld [vmem:[%s4208_s19] ss:$0 sm:$0xff] }
 0x2d6   :  { %387 = vadd.xlane.f32.xlu0 %v386_v22 }
 0x2d7   :  { %v385_v23 = vmul.f32 %v383_v21, %v383_v21 }
 0x2d9   :  { %v389_v24 = vsel %vm372_vm1, %v385_v23, 0.0  ;;  %v3291_v23 = vld [vmem:[%s4213_s24] ss:$0 sm:$0xff] }
 0x2da   :  { %390 = vadd.xlane.f32.xlu1 %v389_v24 }
 0x2eb   :  { %427 = vperm.xlu1 %3835, %v422_v27   ;;  %v3864_v27 = vld [vmem:[%s4218_s30 + $0x20] ss:$12 sps:$4 sm:$0xff]  }
 0x2ec   :  { %424 = vperm.xlu0 %3834, %v421_v28  }
 0x35f   :  { %v388_v29 = vpop.xlane.xlu0 %387 }
 0x360   :  { %v392_v30 = vmul.f32 0.03125, %v388_v29  ;;  %v3865_v29 = vld [vmem:[%s4218_s30 + $0x8] ss:$12 sps:$4 sm:$0xff]  }
 0x362   :  { %v394_v31 = vadd.f32 1e-05, %v392_v30 }
 0x363   :  { %v391_v32 = vpop.xlane.xlu1 %390 }
 0x364   :  { %4025 = vrsqrt.f32 %v394_v31  ;;  %v393_v33 = vmul.f32 0.03125, %v391_v32 }
 0x366   :  { %v395_v34 = vadd.f32 1e-05, %v393_v33 }
 0x367   :  { %v425_v38 = vpop.permute.xlu0 %424  ;;  %v428_v49 = vpop.permute.xlu1 %427 }
 0x368   :  { %4027 = vrsqrt.f32 %v395_v34  ;;  %vm429_vm4 = vcmp.eq.s32.totalorder %v425_v38, 1  ;;  %vm430_vm5 = vcmp.eq.s32.totalorder %v428_v49, 1 }
 0x371   :  { %v4026_v35 = vpop.eup %4025 }
 0x372   :  { %v398_v37 = vmul.f32 %v4026_v35, %v382_v17 }
 0x374   :  { %v406_v40 = vmul.f32 %v3287_v36, %v398_v37 }
 0x375   :  { %v4028_v41 = vpop.eup %4027 }
 0x376   :  { %v414_v44 = vadd.f32 %v3288_v39, %v406_v40  ;;  %v399_v48 = vmul.f32 %v4028_v41, %v383_v21 }
 0x378   :  { %v437_v50 = vsel %vm429_vm4, %v3289_v42, %v414_v44  ;;  %v407_v51 = vmul.f32 %v3287_v36, %v399_v48 }
 0x379   :  { %v4395_v52 = vadd.f32 %v439_v47, %v437_v50 }
 0x37a   :  { %v415_v53 = vadd.f32 %v3288_v39, %v407_v51 }
 0x37b   :  { %v448_v55 = vsel %vm372_vm1, %v4395_v52, 0.0 }
 0x37c   :  { %v438_v56 = vsel %vm430_vm5, %v3289_v42, %v415_v53  ;;  %449 = vadd.xlane.f32.xlu1 %v448_v55 }
 0x37d   :  { %v4400_v57 = vadd.f32 %v440_v54, %v438_v56  ;;  %v4448_v54 = vand.u32 127, %v192_v43 }
 0x37f   :  { %v451_v58 = vsel %vm372_vm1, %v4400_v57, 0.0  ;;  %vm445_vm8 = vcmp.lt.s32.totalorder %v4448_v54, 5 }
 0x380   :  { %452 = vadd.xlane.f32.xlu0 %v451_v58 }
 0x405   :  { %v450_v59 = vpop.xlane.xlu1 %449 }
 0x406   :  { %v454_v60 = vmul.f32 0.03125, %v450_v59 }
 0x408   :  { %v456_v61 = vsub.f32 %v4395_v52, %v454_v60 }
 0x409   :  { %v453_v62 = vpop.xlane.xlu0 %452 }
 0x40a   :  { %v455_v63 = vmul.f32 0.03125, %v453_v62  ;;  %v458_v0 = vmul.f32 %v456_v61, %v456_v61 }
 0x40c   :  { %v457_v1 = vsub.f32 %v4400_v57, %v455_v63  ;;  %v460_v2 = vsel %vm372_vm1, %v458_v0, 0.0 }
 0x40d   :  { %461 = vadd.xlane.f32.xlu1 %v460_v2 }
 0x40e   :  { %v459_v3 = vmul.f32 %v457_v1, %v457_v1 }
 0x410   :  { %v463_v4 = vsel %vm372_vm1, %v459_v3, 0.0 }
 0x411   :  { %464 = vadd.xlane.f32.xlu1 %v463_v4 }
 0x496   :  { %v462_v11 = vpop.xlane.xlu1 %461 }
 0x497   :  { %v466_v12 = vmul.f32 0.03125, %v462_v11 }
 0x499   :  { %v468_v13 = vadd.f32 1e-05, %v466_v12 }
 0x49a   :  { %v465_v14 = vpop.xlane.xlu1 %464 }
 0x49b   :  { %4029 = vrsqrt.f32 %v468_v13  ;;  %v467_v15 = vmul.f32 0.03125, %v465_v14 }
 0x49d   :  { %v469_v16 = vadd.f32 1e-05, %v467_v15 }
 0x49f   :  { %4031 = vrsqrt.f32 %v469_v16 }
 0x4a8   :  { %v4030_v17 = vpop.eup %4029 }
 0x4a9   :  { %v472_v18 = vmul.f32 %v4030_v17, %v456_v61 }
 0x4ab   :  { %v478_v22 = vmul.f32 %v3290_v19, %v472_v18 }
 0x4ac   :  { %v4032_v20 = vpop.eup %4031 }
 0x4ad   :  { %v473_v21 = vmul.f32 %v4032_v20, %v457_v1  ;;  %v484_v25 = vadd.f32 %v3291_v23, %v478_v22 }
 0x4af   :  { %v479_v24 = vmul.f32 %v3290_v19, %v473_v21 }
 0x4b1   :  { %v485_v26 = vadd.f32 %v3291_v23, %v479_v24 }
 0x4b3   :  { %v494_v28 = vpack.c.bf16 %v485_v26, %v484_v25 }
 0x4b5   :  { %3298 = vmatmul.mubr.msk.bf16.vlgmr.msra.gmra.mxu1 %vm372_vm1, %v494_v28 }
 0x4b6   :  { %3594 = vmatpush3.bf16.msra.mxu1 %v3864_v27  ;;  %3597 = vmatprep.mubr.msk.bf16.mxu1 %vm4146_vm6, %v4145_v10 }
 0x4b7   :  { %3595 = vmatprep.subr.bf16.mxu1 %v4145_v10 }
 0x4ba   :  { %3596 = vmatpush3.bf16.msra.mxu1 %v3865_v29 }
 0x4bb   :  { %3601 = vmatprep.subr.bf16.mxu1 %v4145_v10 }
 0x4bd   :  { %3598 = vmatmul.mubr.msk.bf16.vlgmr.msra.gmra.mxu1 %vm372_vm1, %v494_v28 }
 0x4be   :  { %3603 = vmatprep.mubr.msk.bf16.mxu1 %vm4146_vm6, %v4145_v10 }
 0x575   :  { %v564_v30 = vpop.f32.mrf.mxu1 }
 0x576   :  { %v614_v37 = vmul.f32 0.125, %v564_v30 }
 0x577   :  { %v566_v31 = vpop.f32.mrf.mxu1 }
 0x578   :  { %v618_v32 = vpack.c.bf16 %v566_v31, %v566_v31  ;;  %v616_v42 = vpack.c.bf16 %v614_v37, %v614_v37 }
 0x579   :  { %v568_v33 = vpop.f32.mrf.mxu1 }
 0x57a   :  { %v624_v34 = vsel %vm153_vm0, %v618_v32, 0  ;;  %v615_v35 = vmul.f32 0.125, %v568_v33  ;;  %838 = vrot.lane.b32.xlu0 %v618_v32, %s4147_s0 }
 0x57b   :  { %v570_v36 = vpop.f32.mrf.mxu1  ;;  %3602 = vmatpush3.bf16.xpose.msra.mxu1 %v624_v34 }
 0x57c   :  { %v617_v38 = vpack.c.bf16 %v615_v35, %v615_v35  ;;  %3607 = vmatprep.subr.bf16.mxu1 %v4145_v10  ;;  %v619_v40 = vpack.c.bf16 %v570_v36, %v570_v36 }
 0x57d   :  { %v607_v39 = vpop.f32.mrf.mxu1 }
 0x57e   :  { %887 = vrot.lane.b32.xlu0 %v617_v38, %s4147_s0  ;;  %v670_v47 = vsel %vm153_vm0, %v619_v40, 0  ;;  %v4437_v49 = vpack.c.bf16 %v607_v39, %v607_v39 }
 0x57f   :  { %v3599_v41 = vpop.f32.mrf.mxu1 }
 0x580   :  { %v746_v50 = vsel %vm744_vm7, %v4437_v49, 0 }
 0x581   :  { %v610_v44 = vpop.f32.mrf.mxu1 }
 0x582   :  { %3604 = vmatmul.mubr.msk.bf16.vlgmr.msra.gmra.mxu1 %vm153_vm0, %v616_v42  ;;  %v740_v19 = vpack.c.bf16 %v610_v44, %v610_v44 }
 0x583   :  { %v3600_v48 = vpop.f32.mrf.mxu1  ;;  %3608 = vmatpush3.bf16.xpose.msra.mxu1 %v670_v47  ;;  %3609 = vmatprep.mubr.msk.bf16.mxu1 %vm4146_vm6, %v4145_v10 }
 0x584   :  { %3613 = vmatprep.subr.bf16.mxu1 %v4145_v10  ;;  %v792_v23 = vsel %vm744_vm7, %v740_v19, 0 }
 0x58a   :  { %3610 = vmatmul.mubr.msk.bf16.vlgmr.msra.gmra.mxu1 %vm153_vm0, %v617_v38 }
 0x58b   :  { %3614 = vmatpush3.bf16.msra.mxu1 %v746_v50  ;;  %3615 = vmatprep.mubr.msk.bf16.mxu1 %vm4146_vm6, %v4145_v10 }
 0x58c   :  { %3619 = vmatprep.subr.bf16.mxu1 %v4145_v10 }
 0x5ec   :  { %v839_v51 = vpop.permute.xlu0 %838 }
 0x5ed   :  { %v844_v53 = vsel %vm153_vm0, %v839_v51, 0 }
 0x5ee   :  { %3626 = vmatpush3.bf16.xpose.msra.mxu0 %v844_v53 }
 0x5ef   :  { %3637 = vmatprep.subr.bf16.mxu0 %v4145_v10 }
 0x5f0   :  { %v888_v28 = vpop.permute.xlu0 %887 }
 0x642   :  { %v660_v55 = vpop.f32.mrf.mxu1 }
 0x643   :  { %v712_v56 = vsel %vm445_vm8, %v660_v55, -1e+30 }
 0x644   :  { %v3605_v58 = vpop.f32.mrf.mxu1  ;;  %v715_v59 = vsel %vm714_vm9, %v712_v56, -inf }
 0x645   :  { %716 = vmax.xlane.f32.xlu1 %v715_v59 }
 0x646   :  { %v663_v60 = vpop.f32.mrf.mxu1 }
 0x648   :  { %v3606_v61 = vpop.f32.mrf.mxu1 }
 0x64a   :  { %v706_v62 = vpop.f32.mrf.mxu1 }
 0x64b   :  { %v713_v63 = vsel %vm445_vm8, %v706_v62, -1e+30 }
 0x64c   :  { %v3611_v0 = vpop.f32.mrf.mxu1  ;;  %v718_v43 = vsel %vm714_vm9, %v713_v63, -inf }
 0x64d   :  { %719 = vmax.xlane.f32.xlu1 %v718_v43 }
 0x64e   :  { %v709_v1 = vpop.f32.mrf.mxu1 }
 0x650   :  { %v3612_v2 = vpop.f32.mrf.mxu1 }
 0x6ce   :  { %v717_v3 = vpop.xlane.xlu1 %716 }
 0x6cf   :  { %v721_v4 = vsub.f32 %v712_v56, %v717_v3 }
 0x6d1   :  { %v723_v5 = vmul.f32 1.442695, %v721_v4 }
 0x6d3   :  { %4033 = vpow2.f32 %v723_v5 }
 0x6d6   :  { %v720_v6 = vpop.xlane.xlu1 %719 }
 0x6d7   :  { %v722_v7 = vsub.f32 %v713_v63, %v720_v6 }
 0x6d9   :  { %v725_v8 = vmul.f32 1.442695, %v722_v7 }
 0x6db   :  { %4035 = vpow2.f32 %v725_v8 }
 0x6e0   :  { %v4034_v11 = vpop.eup %4033 }
 0x6e1   :  { %v727_v12 = vsel %vm714_vm9, %v4034_v11, 0.0 }
 0x6e2   :  { %728 = vadd.xlane.f32.xlu1 %v727_v12 }
 0x6e8   :  { %v4036_v13 = vpop.eup %4035 }
 0x6e9   :  { %v730_v14 = vsel %vm714_vm9, %v4036_v13, 0.0 }
 0x6ea   :  { %731 = vadd.xlane.f32.xlu1 %v730_v14  ;;  %v3866_v14 = vld [vmem:[%s4223_s6 + $0x38] sm:$0xff]  }
 0x6fb   :  { %890 = vrot.lane.b32.xlu1 %v619_v40, %s4147_s0 }
 0x6ff   :  { %835 = vrot.lane.b32.xlu1 %v616_v42, %s4147_s0 }
 0x76b   :  { %v729_v15 = vpop.xlane.xlu1 %728 }
 0x76c   :  { %4037 = vrcp.f32 %v729_v15  ;;  %v3867_v15 = vld [vmem:[%s4223_s6 + $0x30] sm:$0xff]  }
 0x773   :  { %v732_v16 = vpop.xlane.xlu1 %731 }
 0x774   :  { %4039 = vrcp.f32 %v732_v16  ;;  %v3868_v16 = vld [vmem:[%s4223_s6 + $0x28] sm:$0xff]  }
 0x777   :  { %v891_v17 = vpop.permute.xlu1 %890 }
 0x778   :  { %v896_v27 = vsel %vm153_vm0, %v891_v17, 0  ;;  %v3869_v17 = vld [vmem:[%s4223_s6 + $0x20] sm:$0xff]  }
 0x779   :  { %v4038_v18 = vpop.eup %4037 }
 0x77a   :  { %v735_v20 = vmul.f32 %v4038_v18, %v4034_v11  ;;  %v3870_v18 = vld [vmem:[%s4223_s6 + $0x18] sm:$0xff]  }
 0x77b   :  { %v836_v21 = vpop.permute.xlu1 %835 }
 0x77c   :  { %3628 = vmatmul.mubr.msk.bf16.vlgmr.msra.gmra.mxu0 %vm153_vm0, %v836_v21  ;;  %v737_v22 = vpack.c.bf16 %v735_v20, %v735_v20  ;;  %v3872_v20 = vld [vmem:[%s4223_s6 + $0x8] sm:$0xff]  }
 0x77d   :  { %3639 = vmatprep.mubr.msk.bf16.mxu0 %vm4146_vm6, %v4145_v10 }
 0x77e   :  { %3616 = vmatmul.mubr.msk.bf16.vlgmr.msra.gmra.mxu1 %vm714_vm9, %v737_v22 }
 0x77f   :  { %3620 = vmatpush3.bf16.msra.mxu1 %v792_v23  ;;  %3621 = vmatprep.mubr.msk.bf16.mxu1 %vm4146_vm6, %v4145_v10 }
 0x780   :  { %3631 = vmatprep.subr.bf16.mxu1 %v4145_v10 }
 0x781   :  { %v4040_v24 = vpop.eup %4039 }
 0x782   :  { %v736_v25 = vmul.f32 %v4040_v24, %v4036_v13 }
 0x784   :  { %v738_v26 = vpack.c.bf16 %v736_v25, %v736_v25  ;;  %v3873_v25 = vld [vmem:[%s4223_s6] sm:$0xff]  }
 0x786   :  { %3622 = vmatmul.mubr.msk.bf16.vlgmr.msra.gmra.mxu1 %vm714_vm9, %v738_v26 }
 0x787   :  { %3632 = vmatpush3.bf16.xpose.msra.mxu1 %v896_v27  ;;  %3633 = vmatprep.mubr.msk.bf16.mxu1 %vm4146_vm6, %v4145_v10 }
 0x788   :  { %3643 = vmatprep.subr.bf16.mxu1 %v4145_v10 }
 0x78e   :  { %3634 = vmatmul.mubr.msk.bf16.vlgmr.msra.gmra.mxu1 %vm153_vm0, %v888_v28 }
 0x78f   :  { %3645 = vmatprep.mubr.msk.bf16.mxu1 %vm4146_vm6, %v4145_v10 }
 0x83c   :  { %v880_v29 = vpop.f32.mrf.mxu0 }
 0x83d   :  { %v938_v30 = vsel %vm445_vm8, %v880_v29, -1e+30 }
 0x83e   :  { %v4479_v31 = vpop.f32.mrf.mxu1  ;;  %v3629_v32 = vpop.f32.mrf.mxu0  ;;  %v940_v33 = vsel %vm714_vm9, %v938_v30, -inf }
 0x83f   :  { %941 = vmax.xlane.f32.xlu1 %v940_v33 }
 0x840   :  { %v3617_v34 = vpop.f32.mrf.mxu1  ;;  %v883_v35 = vpop.f32.mrf.mxu0 }
 0x842   :  { %v785_v36 = vpop.f32.mrf.mxu1  ;;  %v3630_v37 = vpop.f32.mrf.mxu0 }
 0x844   :  { %v3618_v38 = vpop.f32.mrf.mxu1 }
 0x846   :  { %v4482_v39 = vpop.f32.mrf.mxu1 }
 0x848   :  { %v3623_v40 = vpop.f32.mrf.mxu1 }
 0x849   :  { %v3316_v40 = vld [vmem:[%s4867_s5] ss:$0 sm:$0xff] }
 0x84a   :  { %v831_v41 = vpop.f32.mrf.mxu1 }
 0x84c   :  { %v3624_v42 = vpop.f32.mrf.mxu1 }
 0x84e   :  { %v932_v44 = vpop.f32.mrf.mxu1 }
 0x84f   :  { %v939_v47 = vsel %vm445_vm8, %v932_v44, -1e+30 }
 0x850   :  { %v3635_v48 = vpop.f32.mrf.mxu1  ;;  %v943_v50 = vsel %vm714_vm9, %v939_v47, -inf }
 0x851   :  { %944 = vmax.xlane.f32.xlu0 %v943_v50 }
 0x852   :  { %v935_v51 = vpop.f32.mrf.mxu1 }
 0x854   :  { %v3636_v53 = vpop.f32.mrf.mxu1 }
 0x8c8   :  { %v942_v55 = vpop.xlane.xlu1 %941 }
 0x8c9   :  { %v946_v56 = vsub.f32 %v938_v30, %v942_v55 }
 0x8cb   :  { %v948_v58 = vmul.f32 1.442695, %v946_v56 }
 0x8cd   :  { %4041 = vpow2.f32 %v948_v58 }
 0x8da   :  { %v4042_v59 = vpop.eup %4041  ;;  %v945_v60 = vpop.xlane.xlu0 %944 }
 0x8db   :  { %v947_v61 = vsub.f32 %v939_v47, %v945_v60  ;;  %v952_v62 = vsel %vm714_vm9, %v4042_v59, 0.0 }
 0x8dc   :  { %953 = vadd.xlane.f32.xlu0 %v952_v62 }
 0x8dd   :  { %v950_v63 = vmul.f32 1.442695, %v947_v61 }
 0x8df   :  { %4043 = vpow2.f32 %v950_v63  ;;  %v3874_v63 = vld [vmem:[%s4868_s9 + $0x8] sm:$0xff]  }
 0x8ec   :  { %v4044_v0 = vpop.eup %4043 }
 0x8ed   :  { %v955_v43 = vsel %vm714_vm9, %v4044_v0, 0.0 }
 0x8ee   :  { %956 = vadd.xlane.f32.xlu1 %v955_v43 }
 0x8f2   :  { %965 = vrot.lane.b32.xlu0 %v4437_v49, %s4147_s0 }
 0x8ff   :  { %1014 = vrot.lane.b32.xlu1 %v740_v19, %s4147_s0  ;;  %v3871_v19 = vld [vmem:[%s4223_s6 + $0x10] sm:$0xff]  }
 0x965   :  { %v954_v1 = vpop.xlane.xlu0 %953 }
 0x966   :  { %4045 = vrcp.f32 %v954_v1 }
 0x969   :  { %v966_v2 = vpop.permute.xlu0 %965 }
 0x96a   :  { %v971_v3 = vsel %vm744_vm7, %v966_v2, 0 }
 0x96b   :  { %3638 = vmatpush3.bf16.msra.mxu0 %v971_v3 }
 0x96c   :  { %3649 = vmatprep.subr.bf16.mxu0 %v4145_v10 }
 0x973   :  { %v4046_v4 = vpop.eup %4045 }
 0x974   :  { %v960_v5 = vmul.f32 %v4046_v4, %v4042_v59 }
 0x976   :  { %v962_v6 = vpack.c.bf16 %v960_v5, %v960_v5 }
 0x977   :  { %v957_v7 = vpop.xlane.xlu1 %956 }
 0x978   :  { %4047 = vrcp.f32 %v957_v7  ;;  %3640 = vmatmul.mubr.msk.bf16.vlgmr.msra.gmra.mxu0 %vm714_vm9, %v962_v6 }
 0x979   :  { %3665 = vmatprep.mubr.msk.bf16.mxu0 %vm4146_vm6, %v4145_v10  ;;  %3650 = vmatpush3.bf16.msra.mxu0 %v3866_v14 }
 0x97a   :  { %3651 = vmatprep.subr.bf16.mxu0 %v4145_v10 }
 0x97b   :  { %v1015_v49 = vpop.permute.xlu1 %1014 }
 0x97c   :  { %v1020_v8 = vsel %vm744_vm7, %v1015_v49, 0  ;;  %v3317_v49 = vld [vmem:[%s4869_s13] ss:$0 sm:$0xff] }
 0x97d   :  { %3644 = vmatpush3.bf16.msra.mxu1 %v1020_v8  ;;  %3652 = vmatpush3.bf16.msra.mxu0 %v3867_v15 }
 0x97e   :  { %3669 = vmatprep.subr.bf16.mxu1 %v4145_v10  ;;  %3653 = vmatprep.subr.bf16.mxu0 %v4145_v10 }
 0x981   :  { %3654 = vmatpush3.bf16.msra.mxu0 %v3868_v16 }
 0x982   :  { %3655 = vmatprep.subr.bf16.mxu0 %v4145_v10 }
 0x985   :  { %v4048_v11 = vpop.eup %4047  ;;  %3656 = vmatpush3.bf16.msra.mxu0 %v3869_v17 }
 0x986   :  { %v961_v12 = vmul.f32 %v4048_v11, %v4044_v0  ;;  %3657 = vmatprep.subr.bf16.mxu0 %v4145_v10  ;;  %v3875_v0 = vld [vmem:[%s4868_s9] sm:$0xff]  }
 0x988   :  { %v963_v13 = vpack.c.bf16 %v961_v12, %v961_v12 }
 0x989   :  { %3658 = vmatpush3.bf16.msra.mxu0 %v3870_v18  ;;  %v3876_v18 = vld [vmem:[%s4871_s21 + $0x18] sm:$0xff]  }
 0x98a   :  { %3646 = vmatmul.mubr.msk.bf16.vlgmr.msra.gmra.mxu1 %vm714_vm9, %v963_v13  ;;  %3659 = vmatprep.subr.bf16.mxu0 %v4145_v10  ;;  %v3318_v13 = vld [vmem:[%s4870_s17] ss:$0 sm:$0xff] }
 0x98b   :  { %3673 = vmatprep.mubr.msk.bf16.mxu1 %vm4146_vm6, %v4145_v10  ;;  %3670 = vmatpush3.bf16.msra.mxu1 %v3874_v63 }
 0x98c   :  { %3671 = vmatprep.subr.bf16.mxu1 %v4145_v10 }
 0x98d   :  { %3660 = vmatpush3.bf16.msra.mxu0 %v3871_v19  ;;  %v3877_v19 = vld [vmem:[%s4871_s21 + $0x10] sm:$0xff]  }
 0x98e   :  { %3661 = vmatprep.subr.bf16.mxu0 %v4145_v10 }
 0x98f   :  { %3672 = vmatpush3.bf16.msra.mxu1 %v3875_v0 }
 0x990   :  { %3677 = vmatprep.subr.bf16.mxu1 %v4145_v10 }
 0x991   :  { %3662 = vmatpush3.bf16.msra.mxu0 %v3872_v20  ;;  %v3878_v20 = vld [vmem:[%s4871_s21 + $0x8] sm:$0xff]  }
 0x992   :  { %3663 = vmatprep.subr.bf16.mxu0 %v4145_v10 }
 0x995   :  { %3664 = vmatpush3.bf16.msra.mxu0 %v3873_v25 }
 0x996   :  { %3689 = vmatprep.subr.bf16.mxu0 %v4145_v10 }
 0xa38   :  { %v1007_v21 = vpop.f32.mrf.mxu0 }
 0xa3a   :  { %v3641_v22 = vpop.f32.mrf.mxu0 }
 0xa3b   :  { %v3319_v22 = vld [vmem:[%s4872_s25] ss:$0 sm:$0xff] }
 0xa3c   :  { %v1010_v23 = vpop.f32.mrf.mxu0 }
 0xa3e   :  { %v3642_v24 = vpop.f32.mrf.mxu0 }
 0xa4a   :  { %v1056_v26 = vpop.f32.mrf.mxu1 }
 0xa4b   :  { %v3836_v27 = vpack.i.bf16 %v1056_v26, %v1007_v21  ;;  %v3879_v21 = vld [vmem:[%s4871_s21] sm:$0xff]  }
 0xa4c   :  { %v3647_v28 = vpop.f32.mrf.mxu1 }
 0xa4d   :  { %3837 = vrot.lane.b32.xlu1 %v3836_v27, %s4147_s0 }
 0xa4e   :  { %v1059_v29 = vpop.f32.mrf.mxu1 }
 0xa50   :  { %v3648_v30 = vpop.f32.mrf.mxu1 }
 0xabf   :  { %v3838_v32 = vpop.permute.xlu1 %3837 }
 0xac0   :  { %v3840_v33 = vunpack.i.h.bf16 %v3838_v32  ;;  %v3839_v34 = vunpack.i.l.bf16 %v3838_v32 }
 0xac2   :  { %v1071_v35 = vsel %vm153_vm0, %v4482_v39, %v3840_v33  ;;  %v1070_v36 = vsel %vm153_vm0, %v4479_v31, %v3839_v34 }
 0xac3   :  { %v1088_v37 = vpack.c.bf16 %v1071_v35, %v1070_v36 }
 0xac5   :  { %3666 = vmatmul.mubr.bf16.vlgmr.msra.gmra.mxu0 %v1088_v37 }
 0xac6   :  { %3693 = vmatprep.mubr.msk.bf16.mxu0 %vm4146_vm6, %v4145_v10 }
 0xb85   :  { %v1171_v38 = vpop.f32.mrf.mxu0 }
 0xb86   :  { %v1178_v41 = vadd.f32 %v1171_v38, %v4395_v52 }
 0xb87   :  { %v3667_v42 = vpop.f32.mrf.mxu0 }
 0xb88   :  { %v4527_v44 = vadd.f32 %v3316_v40, %v1178_v41 }
 0xb89   :  { %v1174_v47 = vpop.f32.mrf.mxu0 }
 0xb8a   :  { %v1179_v48 = vadd.f32 %v1174_v47, %v4400_v57  ;;  %v1189_v39 = vsel %vm372_vm1, %v4527_v44, 0.0 }
 0xb8b   :  { %1190 = vadd.xlane.f32.xlu0 %v1189_v39  ;;  %v3668_v31 = vpop.f32.mrf.mxu0 }
 0xb8c   :  { %v4532_v50 = vadd.f32 %v3316_v40, %v1179_v48 }
 0xb8e   :  { %v1192_v51 = vsel %vm372_vm1, %v4532_v50, 0.0 }
 0xb8f   :  { %1193 = vadd.xlane.f32.xlu1 %v1192_v51 }
 0xc14   :  { %v1191_v52 = vpop.xlane.xlu0 %1190 }
 0xc15   :  { %v1195_v53 = vmul.f32 0.03125, %v1191_v52 }
 0xc17   :  { %v1197_v55 = vsub.f32 %v4527_v44, %v1195_v53 }
 0xc18   :  { %v1194_v56 = vpop.xlane.xlu1 %1193 }
 0xc19   :  { %v1196_v58 = vmul.f32 0.03125, %v1194_v56  ;;  %v1199_v57 = vmul.f32 %v1197_v55, %v1197_v55 }
 0xc1b   :  { %v1198_v59 = vsub.f32 %v4532_v50, %v1196_v58  ;;  %v1201_v60 = vsel %vm372_vm1, %v1199_v57, 0.0 }
 0xc1c   :  { %1202 = vadd.xlane.f32.xlu0 %v1201_v60 }
 0xc1d   :  { %v1200_v61 = vmul.f32 %v1198_v59, %v1198_v59 }
 0xc1f   :  { %v1204_v62 = vsel %vm372_vm1, %v1200_v61, 0.0 }
 0xc20   :  { %1205 = vadd.xlane.f32.xlu0 %v1204_v62 }
 0xca5   :  { %v1203_v43 = vpop.xlane.xlu0 %1202 }
 0xca6   :  { %v1207_v1 = vmul.f32 0.03125, %v1203_v43 }
 0xca8   :  { %v1209_v2 = vadd.f32 1e-05, %v1207_v1 }
 0xca9   :  { %v1206_v3 = vpop.xlane.xlu0 %1205 }
 0xcaa   :  { %4049 = vrsqrt.f32 %v1209_v2  ;;  %v1208_v4 = vmul.f32 0.03125, %v1206_v3 }
 0xcac   :  { %v1210_v5 = vadd.f32 1e-05, %v1208_v4 }
 0xcae   :  { %4051 = vrsqrt.f32 %v1210_v5 }
 0xcb7   :  { %v4050_v6 = vpop.eup %4049 }
 0xcb8   :  { %v1213_v7 = vmul.f32 %v4050_v6, %v1197_v55  ;;  %v3323_v55 = vld [vmem:[%s4873_s29] ss:$0 sm:$0xff] }
 0xcba   :  { %v1219_v12 = vmul.f32 %v3317_v49, %v1213_v7 }
 0xcbb   :  { %v4052_v8 = vpop.eup %4051 }
 0xcbc   :  { %v1214_v11 = vmul.f32 %v4052_v8, %v1198_v59  ;;  %v1225_v15 = vadd.f32 %v3318_v13, %v1219_v12  ;;  %v3882_v8 = vld [vmem:[%s4218_s30 + $0x4c] ss:$12 sps:$4 sm:$0xff]   ;;  %v3883_v12 = vld [vmem:[%s4218_s30 + $0x50] ss:$12 sps:$4 sm:$0xff]  }
 0xcbd   :  { %3690 = vmatpush3.bf16.msra.mxu0 %v3883_v12 }
 0xcbe   :  { %v1220_v14 = vmul.f32 %v3317_v49, %v1214_v11  ;;  %v3880_v11 = vld [vmem:[%s4218_s30 + $0x48] ss:$12 sps:$4 sm:$0xff]   ;;  %3691 = vmatprep.subr.bf16.mxu0 %v4145_v10 }
 0xcc0   :  { %v1226_v16 = vadd.f32 %v3318_v13, %v1220_v14  ;;  %v3886_v13 = vld [vmem:[%s4218_s30 + $0x34] ss:$12 sps:$4 sm:$0xff]   ;;  %v3884_v14 = vld [vmem:[%s4218_s30 + $0x30] ss:$12 sps:$4 sm:$0xff]  }
 0xcc2   :  { %v1231_v17 = vpack.c.bf16 %v1226_v16, %v1225_v15  ;;  %v3887_v15 = vld [vmem:[%s4218_s30 + $0x38] ss:$12 sps:$4 sm:$0xff]   ;;  %s4879_s30 = sld [smem:[#allocation12_spill]] }
 0xcc3   :  { %3692 = vmatpush3.bf16.msra.mxu0 %v3887_v15 }
 0xcc4   :  { %3674 = vmatmul.mubr.msk.bf16.vlgmr.msra.gmra.mxu1 %vm372_vm1, %v1231_v17  ;;  %3703 = vmatprep.subr.bf16.mxu0 %v4145_v10 }
 0xcc5   :  { %3685 = vmatprep.mubr.msk.bf16.mxu1 %vm4146_vm6, %v4145_v10  ;;  %3678 = vmatpush3.bf16.msra.mxu1 %v3876_v18 }
 0xcc6   :  { %3679 = vmatprep.subr.bf16.mxu1 %v4145_v10 }
 0xcc9   :  { %3680 = vmatpush3.bf16.msra.mxu1 %v3877_v19 }
 0xcca   :  { %3681 = vmatprep.subr.bf16.mxu1 %v4145_v10 }
 0xccd   :  { %3682 = vmatpush3.bf16.msra.mxu1 %v3878_v20 }
 0xcce   :  { %3683 = vmatprep.subr.bf16.mxu1 %v4145_v10 }
 0xcd1   :  { %3684 = vmatpush3.bf16.msra.mxu1 %v3879_v21 }
 0xcd2   :  { %1492 = vmatprep.subr.bf16.mxu1 %v3882_v8 }
 0xd84   :  { %v1286_v23 = vpop.f32.mrf.mxu1 }
 0xd85   :  { %v1287_v24 = vadd.f32 %v3319_v22, %v1286_v23 }
 0xd86   :  { %v3675_v25 = vpop.f32.mrf.mxu1 }
 0xd87   :  { %v1295_v26 = vmul.f32 0.044715, %v1287_v24  ;;  %v1293_v48 = vmul.f32 0.5, %v1287_v24 }
 0xd88   :  { %v1289_v27 = vpop.f32.mrf.mxu1 }
 0xd89   :  { %v1297_v28 = vmul.f32 %v1295_v26, %v1287_v24  ;;  %v1290_v29 = vadd.f32 %v3319_v22, %v1289_v27 }
 0xd8a   :  { %v3676_v30 = vpop.f32.mrf.mxu1 }
 0xd8b   :  { %v1299_v32 = vmul.f32 %v1297_v28, %v1287_v24  ;;  %v1296_v33 = vmul.f32 0.044715, %v1290_v29  ;;  %v1294_v39 = vmul.f32 0.5, %v1290_v29  ;;  %v3330_v28 = vld [vmem:[%s4213_s24 + $0x1] ss:$0 sm:$0xff]  ;;  %s4878_s24 = sld [smem:[#allocation18_spill]] }
 0xd8d   :  { %v1301_v34 = vadd.f32 %v1299_v32, %v1287_v24  ;;  %v1298_v35 = vmul.f32 %v1296_v33, %v1290_v29  ;;  %v3329_v24 = vld [vmem:[%s4208_s19 + $0x1] ss:$0 sm:$0xff]  ;;  %s4877_s19 = sld [smem:[#allocation19_spill]] }
 0xd8f   :  { %v1303_v36 = vmul.f32 0.7978846, %v1301_v34  ;;  %v1300_v37 = vmul.f32 %v1298_v35, %v1290_v29 }
 0xd91   :  { %4053 = vtanh.f32 %v1303_v36  ;;  %v1302_v38 = vadd.f32 %v1300_v37, %v1290_v29 }
 0xd93   :  { %v1304_v40 = vmul.f32 0.7978846, %v1302_v38 }
 0xd95   :  { %4055 = vtanh.f32 %v1304_v40 }
 0xd9e   :  { %v4054_v41 = vpop.eup %4053 }
 0xd9f   :  { %v1307_v42 = vadd.f32 1.0, %v4054_v41 }
 0xda1   :  { %v1309_v51 = vmul.f32 %v1307_v42, %v1293_v48 }
 0xda2   :  { %v4056_v47 = vpop.eup %4055 }
 0xda3   :  { %v1308_v31 = vadd.f32 1.0, %v4056_v47 }
 0xda5   :  { %v1310_v52 = vmul.f32 %v1308_v31, %v1294_v39 }
 0xda7   :  { %v1319_v53 = vpack.c.bf16 %v1310_v52, %v1309_v51 }
 0xda9   :  { %3686 = vmatmul.mubr.msk.bf16.vlgmr.msra.gmra.mxu1 %vm153_vm0, %v1319_v53 }
 0xdaa   :  { %1512 = vmatprep.mubr.bf16.mxu1 %v4144_v9  ;;  %1493 = vmatpush1.bf16.msra.mxu1 %v3880_v11 }
 0xdab   :  { %1494 = vmatprep.subr.bf16.mxu1 %v3886_v13 }
 0xdae   :  { %1495 = vmatpush1.bf16.msra.mxu1 %v3884_v14 }
 0xdaf   :  { %3697 = vmatprep.subr.bf16.mxu1 %v4145_v10 }
 0xe69   :  { %v1386_v56 = vpop.f32.mrf.mxu1 }
 0xe6a   :  { %v1387_v58 = vadd.f32 %v3323_v55, %v1386_v56 }
 0xe6b   :  { %v3687_v57 = vpop.f32.mrf.mxu1 }
 0xe6c   :  { %v4561_v59 = vadd.f32 %v1387_v58, %v4527_v44 }
 0xe6d   :  { %v1389_v60 = vpop.f32.mrf.mxu1 }
 0xe6e   :  { %v1390_v61 = vadd.f32 %v3323_v55, %v1389_v60  ;;  %v1397_v62 = vsel %vm372_vm1, %v4561_v59, 0.0 }
 0xe6f   :  { %1398 = vadd.xlane.f32.xlu1 %v1397_v62  ;;  %v3688_v63 = vpop.f32.mrf.mxu1 }
 0xe70   :  { %v4566_v0 = vadd.f32 %v1390_v61, %v4532_v50 }
 0xe72   :  { %v1400_v43 = vsel %vm372_vm1, %v4566_v0, 0.0 }
 0xe73   :  { %1401 = vadd.xlane.f32.xlu0 %v1400_v43 }
 0xef8   :  { %v1399_v1 = vpop.xlane.xlu1 %1398 }
 0xef9   :  { %v1403_v44 = vmul.f32 0.03125, %v1399_v1 }
 0xefb   :  { %v1405_v2 = vsub.f32 %v4561_v59, %v1403_v44 }
 0xefc   :  { %v1402_v3 = vpop.xlane.xlu0 %1401 }
 0xefd   :  { %v1404_v4 = vmul.f32 0.03125, %v1402_v3  ;;  %v1407_v5 = vmul.f32 %v1405_v2, %v1405_v2 }
 0xeff   :  { %v1406_v6 = vsub.f32 %v4566_v0, %v1404_v4  ;;  %v1409_v50 = vsel %vm372_vm1, %v1407_v5, 0.0 }
 0xf00   :  { %1410 = vadd.xlane.f32.xlu1 %v1409_v50 }
 0xf01   :  { %v1408_v7 = vmul.f32 %v1406_v6, %v1406_v6 }
 0xf03   :  { %v1412_v49 = vsel %vm372_vm1, %v1408_v7, 0.0 }
 0xf04   :  { %1413 = vadd.xlane.f32.xlu0 %v1412_v49 }
 0xf89   :  { %v1411_v16 = vpop.xlane.xlu1 %1410 }
 0xf8a   :  { %v1415_v17 = vmul.f32 0.03125, %v1411_v16 }
 0xf8c   :  { %v1417_v18 = vadd.f32 1e-05, %v1415_v17 }
 0xf8d   :  { %v1414_v19 = vpop.xlane.xlu0 %1413 }
 0xf8e   :  { %4057 = vrsqrt.f32 %v1417_v18  ;;  %v1416_v20 = vmul.f32 0.03125, %v1414_v19 }
 0xf90   :  { %v1418_v21 = vadd.f32 1e-05, %v1416_v20 }
 0xf92   :  { %4059 = vrsqrt.f32 %v1418_v21 }
 0xf9b   :  { %v4058_v22 = vpop.eup %4057 }
 0xf9c   :  { %v1421_v23 = vmul.f32 %v4058_v22, %v1405_v2 }
 0xf9e   :  { %v1427_v27 = vmul.f32 %v3329_v24, %v1421_v23 }
 0xf9f   :  { %v4060_v25 = vpop.eup %4059 }
 0xfa0   :  { %v1422_v26 = vmul.f32 %v4060_v25, %v1406_v6  ;;  %v1433_v30 = vadd.f32 %v3330_v28, %v1427_v27 }
 0xfa2   :  { %v1428_v29 = vmul.f32 %v3329_v24, %v1422_v26 }
 0xfa4   :  { %v1434_v32 = vadd.f32 %v3330_v28, %v1428_v29 }
 0xfa6   :  { %v1444_v33 = vpack.c.bf16 %v1434_v32, %v1433_v30 }
 0xfa8   :  { %3345 = vmatmul.mubr.msk.bf16.vlgmr.msra.gmra.mxu1 %vm372_vm1, %v1444_v33  ;;  %3694 = vmatmul.mubr.msk.bf16.vlgmr.msra.gmra.mxu0 %vm372_vm1, %v1444_v33 }
 0xfa9   :  { %3699 = vmatprep.mubr.msk.bf16.mxu1 %vm4146_vm6, %v4145_v10  ;;  %3705 = vmatprep.mubr.msk.bf16.mxu0 %vm4146_vm6, %v4145_v10 }
0x1068   :  { %v1514_v34 = vpop.f32.mrf.mxu1  ;;  %v1557_v35 = vpop.f32.mrf.mxu0 }
0x1069   :  { %v1564_v39 = vmul.f32 0.125, %v1514_v34  ;;  %v4593_v51 = vpack.c.bf16 %v1557_v35, %v1557_v35 }
0x106a   :  { %v1516_v36 = vpop.f32.mrf.mxu1  ;;  %v3695_v37 = vpop.f32.mrf.mxu0 }
0x106b   :  { %v1568_v38 = vpack.c.bf16 %v1516_v36, %v1516_v36  ;;  %v1566_v53 = vpack.c.bf16 %v1564_v39, %v1564_v39  ;;  %v1694_v56 = vsel %vm744_vm7, %v4593_v51, 0 }
0x106c   :  { %v1518_v40 = vpop.f32.mrf.mxu1  ;;  %v1560_v41 = vpop.f32.mrf.mxu0 }
0x106d   :  { %v1574_v42 = vsel %vm153_vm0, %v1568_v38, 0  ;;  %v1565_v55 = vmul.f32 0.125, %v1518_v40  ;;  %v4599_v58 = vpack.c.bf16 %v1560_v41, %v1560_v41 }
0x106e   :  { %v1520_v47 = vpop.f32.mrf.mxu1  ;;  %v3696_v48 = vpop.f32.mrf.mxu0  ;;  %3698 = vmatpush3.bf16.xpose.msra.mxu1 %v1574_v42 }
0x106f   :  { %v1569_v31 = vpack.c.bf16 %v1520_v47, %v1520_v47  ;;  %3709 = vmatprep.subr.bf16.mxu1 %v4145_v10  ;;  %v1567_v57 = vpack.c.bf16 %v1565_v55, %v1565_v55  ;;  %v1740_v60 = vsel %vm744_vm7, %v4599_v58, 0 }
0x1071   :  { %v1620_v52 = vsel %vm153_vm0, %v1569_v31, 0 }
0x1072   :  { %3704 = vmatpush3.bf16.xpose.msra.mxu0 %v1620_v52 }
0x1073   :  { %3715 = vmatprep.subr.bf16.mxu0 %v4145_v10 }
0x1075   :  { %3700 = vmatmul.mubr.msk.bf16.vlgmr.msra.gmra.mxu1 %vm153_vm0, %v1566_v53 }
0x1076   :  { %3710 = vmatpush3.bf16.msra.mxu1 %v1694_v56  ;;  %3711 = vmatprep.mubr.msk.bf16.mxu1 %vm4146_vm6, %v4145_v10 }
0x1077   :  { %3721 = vmatprep.subr.bf16.mxu1 %v4145_v10 }
0x1079   :  { %3706 = vmatmul.mubr.msk.bf16.vlgmr.msra.gmra.mxu0 %vm153_vm0, %v1567_v57 }
0x107a   :  { %3716 = vmatpush3.bf16.msra.mxu0 %v1740_v60  ;;  %3717 = vmatprep.mubr.msk.bf16.mxu0 %vm4146_vm6, %v4145_v10 }
0x107b   :  { %3727 = vmatprep.subr.bf16.mxu0 %v4145_v10 }
0x1135   :  { %v1610_v61 = vpop.f32.mrf.mxu1 }
0x1136   :  { %v1662_v62 = vsel %vm445_vm8, %v1610_v61, -1e+30 }
0x1137   :  { %v3701_v63 = vpop.f32.mrf.mxu1  ;;  %v1664_v43 = vsel %vm714_vm9, %v1662_v62, -inf }
0x1138   :  { %1665 = vmax.xlane.f32.xlu1 %v1664_v43 }
0x1139   :  { %v1613_v1 = vpop.f32.mrf.mxu1  ;;  %v1656_v44 = vpop.f32.mrf.mxu0 }
0x113a   :  { %v1663_v2 = vsel %vm445_vm8, %v1656_v44, -1e+30 }
0x113b   :  { %v3702_v3 = vpop.f32.mrf.mxu1  ;;  %v3707_v4 = vpop.f32.mrf.mxu0  ;;  %v1667_v5 = vsel %vm714_vm9, %v1663_v2, -inf }
0x113c   :  { %1668 = vmax.xlane.f32.xlu0 %v1667_v5 }
0x113d   :  { %v1659_v6 = vpop.f32.mrf.mxu0 }
0x113f   :  { %v3708_v50 = vpop.f32.mrf.mxu0 }
0x1149   :  { %1786 = vrot.lane.b32.xlu1 %v1568_v38, %s4147_s0 }
0x11c1   :  { %v1666_v7 = vpop.xlane.xlu1 %1665 }
0x11c2   :  { %v1670_v49 = vsub.f32 %v1662_v62, %v1666_v7 }
0x11c4   :  { %v1672_v8 = vmul.f32 1.442695, %v1670_v49 }
0x11c5   :  { %v1669_v11 = vpop.xlane.xlu0 %1668  ;;  %v1787_v18 = vpop.permute.xlu1 %1786 }
0x11c6   :  { %4061 = vpow2.f32 %v1672_v8  ;;  %v1671_v12 = vsub.f32 %v1663_v2, %v1669_v11  ;;  %v1792_v25 = vsel %vm153_vm0, %v1787_v18, 0  ;;  %v3890_v18 = vld [vmem:[%s4223_s6 + $0x68] sm:$0xff]  }
0x11c8   :  { %v1674_v13 = vmul.f32 1.442695, %v1671_v12 }
0x11ca   :  { %4063 = vpow2.f32 %v1674_v13 }
0x11d3   :  { %v4062_v14 = vpop.eup %4061 }
0x11d4   :  { %v1676_v15 = vsel %vm714_vm9, %v4062_v14, 0.0 }
0x11d5   :  { %1677 = vadd.xlane.f32.xlu1 %v1676_v15 }
0x11d7   :  { %v4064_v16 = vpop.eup %4063 }
0x11d8   :  { %v1679_v17 = vsel %vm714_vm9, %v4064_v16, 0.0 }
0x11d9   :  { %1680 = vadd.xlane.f32.xlu0 %v1679_v17  ;;  %v3889_v17 = vld [vmem:[%s4223_s6 + $0x70] sm:$0xff]  }
0x11e6   :  { %1783 = vrot.lane.b32.xlu1 %v1566_v53, %s4147_s0 }
0x11ea   :  { %1835 = vrot.lane.b32.xlu1 %v1567_v57, %s4147_s0 }
0x11ef   :  { %1838 = vrot.lane.b32.xlu0 %v1569_v31, %s4147_s0 }
0x125e   :  { %v1678_v19 = vpop.xlane.xlu1 %1677 }
0x125f   :  { %4065 = vrcp.f32 %v1678_v19  ;;  %v3891_v19 = vld [vmem:[%s4223_s6 + $0x60] sm:$0xff]  }
0x1262   :  { %v1681_v20 = vpop.xlane.xlu0 %1680  ;;  %v1784_v30 = vpop.permute.xlu1 %1783 }
0x1263   :  { %4067 = vrcp.f32 %v1681_v20  ;;  %v3892_v20 = vld [vmem:[%s4223_s6 + $0x58] sm:$0xff]  }
0x1266   :  { %v1839_v27 = vpop.permute.xlu0 %1838  ;;  %v1836_v32 = vpop.permute.xlu1 %1835 }
0x1267   :  { %v1844_v29 = vsel %vm153_vm0, %v1839_v27, 0 }
0x126c   :  { %v4066_v21 = vpop.eup %4065 }
0x126d   :  { %v1684_v22 = vmul.f32 %v4066_v21, %v4062_v14  ;;  %v3893_v21 = vld [vmem:[%s4223_s6 + $0x50] sm:$0xff]  }
0x126f   :  { %v1686_v23 = vpack.c.bf16 %v1684_v22, %v1684_v22  ;;  %v3894_v22 = vld [vmem:[%s4223_s6 + $0x48] sm:$0xff]  }
0x1270   :  { %v4068_v24 = vpop.eup %4067 }
0x1271   :  { %3712 = vmatmul.mubr.msk.bf16.vlgmr.msra.gmra.mxu1 %vm714_vm9, %v1686_v23  ;;  %v1685_v26 = vmul.f32 %v4068_v24, %v4064_v16  ;;  %v3888_v16 = vld [vmem:[%s4223_s6 + $0x78] sm:$0xff]   ;;  %v3895_v23 = vld [vmem:[%s4223_s6 + $0x40] sm:$0xff]   ;;  %s4880_s6 = sld [smem:[#allocation13_spill]] }
0x1272   :  { %3722 = vmatpush3.bf16.xpose.msra.mxu1 %v1792_v25  ;;  %3723 = vmatprep.mubr.msk.bf16.mxu1 %vm4146_vm6, %v4145_v10 }
0x1273   :  { %v1687_v28 = vpack.c.bf16 %v1685_v26, %v1685_v26  ;;  %3733 = vmatprep.subr.bf16.mxu1 %v4145_v10 }
0x1275   :  { %3718 = vmatmul.mubr.msk.bf16.vlgmr.msra.gmra.mxu0 %vm714_vm9, %v1687_v28 }
0x1276   :  { %3728 = vmatpush3.bf16.xpose.msra.mxu0 %v1844_v29  ;;  %3729 = vmatprep.mubr.msk.bf16.mxu0 %vm4146_vm6, %v4145_v10 }
0x1277   :  { %3739 = vmatprep.subr.bf16.mxu0 %v4145_v10 }
0x1279   :  { %3724 = vmatmul.mubr.msk.bf16.vlgmr.msra.gmra.mxu1 %vm153_vm0, %v1784_v30 }
0x127a   :  { %3735 = vmatprep.mubr.msk.bf16.mxu1 %vm4146_vm6, %v4145_v10 }
0x127d   :  { %3730 = vmatmul.mubr.msk.bf16.vlgmr.msra.gmra.mxu0 %vm153_vm0, %v1836_v32 }
0x127e   :  { %3741 = vmatprep.mubr.msk.bf16.mxu0 %vm4146_vm6, %v4145_v10 }
0x1331   :  { %v4639_v33 = vpop.f32.mrf.mxu1 }
0x1333   :  { %v3713_v34 = vpop.f32.mrf.mxu1 }
0x1335   :  { %v1733_v35 = vpop.f32.mrf.mxu1  ;;  %v4641_v36 = vpop.f32.mrf.mxu0 }
0x1337   :  { %v3714_v37 = vpop.f32.mrf.mxu1  ;;  %v3719_v38 = vpop.f32.mrf.mxu0 }
0x1339   :  { %v1779_v40 = vpop.f32.mrf.mxu0  ;;  %v1828_v41 = vpop.f32.mrf.mxu1 }
0x133a   :  { %v1886_v42 = vsel %vm445_vm8, %v1828_v41, -1e+30 }
0x133b   :  { %v3720_v47 = vpop.f32.mrf.mxu0  ;;  %v3725_v48 = vpop.f32.mrf.mxu1  ;;  %v1888_v39 = vsel %vm714_vm9, %v1886_v42, -inf }
0x133c   :  { %1889 = vmax.xlane.f32.xlu0 %v1888_v39  ;;  %v3379_v48 = vld [vmem:[%s4867_s5 + $0x1] ss:$0 sm:$0xff] }
0x133d   :  { %v1831_v31 = vpop.f32.mrf.mxu1  ;;  %v1880_v52 = vpop.f32.mrf.mxu0 }
0x133e   :  { %v1887_v53 = vsel %vm445_vm8, %v1880_v52, -1e+30 }
0x133f   :  { %v3726_v55 = vpop.f32.mrf.mxu1  ;;  %v3731_v56 = vpop.f32.mrf.mxu0  ;;  %v1891_v57 = vsel %vm714_vm9, %v1887_v53, -inf }
0x1340   :  { %1892 = vmax.xlane.f32.xlu1 %v1891_v57 }
0x1341   :  { %v1883_v60 = vpop.f32.mrf.mxu0 }
0x1343   :  { %v3732_v61 = vpop.f32.mrf.mxu0 }
0x1351   :  { %1913 = vrot.lane.b32.xlu1 %v4593_v51, %s4147_s0 }
0x13c5   :  { %v1890_v62 = vpop.xlane.xlu0 %1889 }
0x13c6   :  { %v1894_v63 = vsub.f32 %v1886_v42, %v1890_v62 }
0x13c8   :  { %v1896_v43 = vmul.f32 1.442695, %v1894_v63 }
0x13c9   :  { %v1893_v1 = vpop.xlane.xlu1 %1892 }
0x13ca   :  { %4069 = vpow2.f32 %v1896_v43  ;;  %v1895_v44 = vsub.f32 %v1887_v53, %v1893_v1 }
0x13cc   :  { %v1898_v2 = vmul.f32 1.442695, %v1895_v44 }
0x13cd   :  { %v1914_v3 = vpop.permute.xlu1 %1913 }
0x13ce   :  { %4071 = vpow2.f32 %v1898_v2  ;;  %v1919_v54 = vsel %vm744_vm7, %v1914_v3, 0  ;;  %v3896_v3 = vld [vmem:[%s4868_s9 + $0x18] sm:$0xff]  }
0x13cf   :  { %3734 = vmatpush3.bf16.msra.mxu1 %v1919_v54  ;;  %v3897_v54 = vld [vmem:[%s4868_s9 + $0x10] sm:$0xff]  }
0x13d0   :  { %3745 = vmatprep.subr.bf16.mxu1 %v4145_v10 }
0x13d7   :  { %v4070_v4 = vpop.eup %4069 }
0x13d8   :  { %v1900_v5 = vsel %vm714_vm9, %v4070_v4, 0.0 }
0x13d9   :  { %1901 = vadd.xlane.f32.xlu0 %v1900_v5 }
0x13db   :  { %v4072_v6 = vpop.eup %4071 }
0x13dc   :  { %v1903_v51 = vsel %vm714_vm9, %v4072_v6, 0.0 }
0x13dd   :  { %1904 = vadd.xlane.f32.xlu0 %v1903_v51 }
0x13f3   :  { %1962 = vrot.lane.b32.xlu0 %v4599_v58, %s4147_s0 }
0x1462   :  { %v1902_v50 = vpop.xlane.xlu0 %1901 }
0x1463   :  { %4073 = vrcp.f32 %v1902_v50 }
0x1466   :  { %v1905_v7 = vpop.xlane.xlu0 %1904 }
0x1467   :  { %4075 = vrcp.f32 %v1905_v7 }
0x146a   :  { %v1963_v49 = vpop.permute.xlu0 %1962 }
0x146b   :  { %v1968_v8 = vsel %vm744_vm7, %v1963_v49, 0 }
0x146c   :  { %3740 = vmatpush3.bf16.msra.mxu0 %v1968_v8 }
0x146d   :  { %3765 = vmatprep.subr.bf16.mxu0 %v4145_v10 }
0x1470   :  { %v4074_v11 = vpop.eup %4073 }
0x1471   :  { %v1908_v12 = vmul.f32 %v4074_v11, %v4070_v4  ;;  %v3380_v11 = vld [vmem:[%s4869_s13 + $0x1] ss:$0 sm:$0xff] }
0x1473   :  { %v1910_v13 = vpack.c.bf16 %v1908_v12, %v1908_v12 }
0x1474   :  { %v4076_v14 = vpop.eup %4075 }
0x1475   :  { %3736 = vmatmul.mubr.msk.bf16.vlgmr.msra.gmra.mxu1 %vm714_vm9, %v1910_v13  ;;  %v1909_v58 = vmul.f32 %v4076_v14, %v4072_v6 }
0x1476   :  { %3761 = vmatprep.mubr.msk.bf16.mxu1 %vm4146_vm6, %v4145_v10  ;;  %3746 = vmatpush3.bf16.msra.mxu1 %v3888_v16 }
0x1477   :  { %v1911_v15 = vpack.c.bf16 %v1909_v58, %v1909_v58  ;;  %3747 = vmatprep.subr.bf16.mxu1 %v4145_v10  ;;  %v3381_v58 = vld [vmem:[%s4870_s17 + $0x1] ss:$0 sm:$0xff] }
0x1479   :  { %3742 = vmatmul.mubr.msk.bf16.vlgmr.msra.gmra.mxu0 %vm714_vm9, %v1911_v15 }
0x147a   :  { %3769 = vmatprep.mubr.msk.bf16.mxu0 %vm4146_vm6, %v4145_v10  ;;  %3748 = vmatpush3.bf16.msra.mxu1 %v3889_v17 }
0x147b   :  { %3749 = vmatprep.subr.bf16.mxu1 %v4145_v10  ;;  %3766 = vmatpush3.bf16.msra.mxu0 %v3896_v3 }
0x147c   :  { %3767 = vmatprep.subr.bf16.mxu0 %v4145_v10 }
0x147e   :  { %3750 = vmatpush3.bf16.msra.mxu1 %v3890_v18 }
0x147f   :  { %3751 = vmatprep.subr.bf16.mxu1 %v4145_v10  ;;  %3768 = vmatpush3.bf16.msra.mxu0 %v3897_v54 }
0x1480   :  { %3785 = vmatprep.subr.bf16.mxu0 %v4145_v10 }
0x1482   :  { %3752 = vmatpush3.bf16.msra.mxu1 %v3891_v19  ;;  %v3898_v19 = vld [vmem:[%s4871_s21 + $0x38] sm:$0xff]  }
0x1483   :  { %3753 = vmatprep.subr.bf16.mxu1 %v4145_v10 }
0x1486   :  { %3754 = vmatpush3.bf16.msra.mxu1 %v3892_v20  ;;  %v3899_v20 = vld [vmem:[%s4871_s21 + $0x30] sm:$0xff]  }
0x1487   :  { %3755 = vmatprep.subr.bf16.mxu1 %v4145_v10 }
0x148a   :  { %3756 = vmatpush3.bf16.msra.mxu1 %v3893_v21  ;;  %v3900_v21 = vld [vmem:[%s4871_s21 + $0x28] sm:$0xff]  }
0x148b   :  { %3757 = vmatprep.subr.bf16.mxu1 %v4145_v10 }
0x148e   :  { %3758 = vmatpush3.bf16.msra.mxu1 %v3894_v22  ;;  %v3901_v22 = vld [vmem:[%s4871_s21 + $0x20] sm:$0xff]  }
0x148f   :  { %3759 = vmatprep.subr.bf16.mxu1 %v4145_v10 }
0x1492   :  { %3760 = vmatpush3.bf16.msra.mxu1 %v3895_v23  ;;  %v3386_v23 = vld [vmem:[%s4872_s25 + $0x1] ss:$0 sm:$0xff] }
0x1493   :  { %3773 = vmatprep.subr.bf16.mxu1 %v4145_v10 }
0x1535   :  { %v1955_v24 = vpop.f32.mrf.mxu1 }
0x1537   :  { %v3737_v25 = vpop.f32.mrf.mxu1 }
0x1539   :  { %v1958_v26 = vpop.f32.mrf.mxu1  ;;  %v2004_v27 = vpop.f32.mrf.mxu0 }
0x153a   :  { %v3841_v28 = vpack.i.bf16 %v2004_v27, %v1955_v24 }
0x153b   :  { %v3738_v29 = vpop.f32.mrf.mxu1  ;;  %v3743_v30 = vpop.f32.mrf.mxu0 }
0x153c   :  { %3842 = vrot.lane.b32.xlu1 %v3841_v28, %s4147_s0 }
0x153d   :  { %v2007_v32 = vpop.f32.mrf.mxu0 }
0x153f   :  { %v3744_v34 = vpop.f32.mrf.mxu0 }
0x15ae   :  { %v3843_v35 = vpop.permute.xlu1 %3842 }
0x15af   :  { %v3845_v37 = vunpack.i.h.bf16 %v3843_v35  ;;  %v3844_v38 = vunpack.i.l.bf16 %v3843_v35 }
0x15b1   :  { %v2019_v40 = vsel %vm153_vm0, %v4641_v36, %v3845_v37  ;;  %v2018_v41 = vsel %vm153_vm0, %v4639_v33, %v3844_v38 }
0x15b2   :  { %v2037_v42 = vpack.c.bf16 %v2019_v40, %v2018_v41 }
0x15b4   :  { %3762 = vmatmul.mubr.bf16.vlgmr.msra.gmra.mxu1 %v2037_v42 }
0x15b5   :  { %3781 = vmatprep.mubr.msk.bf16.mxu1 %vm4146_vm6, %v4145_v10  ;;  %3774 = vmatpush3.bf16.msra.mxu1 %v3898_v19  ;;  %v3911_v19 = vld [vmem:[%s4877_s19 + $0x74] ss:$8 sps:$4 sm:$0xff]  }
0x15b6   :  { %3775 = vmatprep.subr.bf16.mxu1 %v4145_v10 }
0x15b9   :  { %3776 = vmatpush3.bf16.msra.mxu1 %v3899_v20 }
0x15ba   :  { %3777 = vmatprep.subr.bf16.mxu1 %v4145_v10 }
0x15bd   :  { %3778 = vmatpush3.bf16.msra.mxu1 %v3900_v21 }
0x15be   :  { %3779 = vmatprep.subr.bf16.mxu1 %v4145_v10 }
0x15c1   :  { %3780 = vmatpush3.bf16.msra.mxu1 %v3901_v22 }
0x1674   :  { %v2120_v47 = vpop.f32.mrf.mxu1 }
0x1675   :  { %v2127_v39 = vadd.f32 %v2120_v47, %v4561_v59 }
0x1676   :  { %v3763_v31 = vpop.f32.mrf.mxu1 }
0x1677   :  { %v4690_v52 = vadd.f32 %v3379_v48, %v2127_v39 }
0x1678   :  { %v2123_v53 = vpop.f32.mrf.mxu1 }
0x1679   :  { %v2128_v55 = vadd.f32 %v2123_v53, %v4566_v0  ;;  %v2138_v36 = vsel %vm372_vm1, %v4690_v52, 0.0 }
0x167a   :  { %2139 = vadd.xlane.f32.xlu1 %v2138_v36  ;;  %v3764_v33 = vpop.f32.mrf.mxu1 }
0x167b   :  { %v4695_v56 = vadd.f32 %v3379_v48, %v2128_v55 }
0x167d   :  { %v2141_v57 = vsel %vm372_vm1, %v4695_v56, 0.0 }
0x167e   :  { %2142 = vadd.xlane.f32.xlu0 %v2141_v57 }
0x1703   :  { %v2140_v59 = vpop.xlane.xlu1 %2139 }
0x1704   :  { %v2144_v60 = vmul.f32 0.03125, %v2140_v59 }
0x1706   :  { %v2146_v61 = vsub.f32 %v4690_v52, %v2144_v60 }
0x1707   :  { %v2143_v62 = vpop.xlane.xlu0 %2142 }
0x1708   :  { %v2145_v63 = vmul.f32 0.03125, %v2143_v62  ;;  %v2148_v0 = vmul.f32 %v2146_v61, %v2146_v61 }
0x170a   :  { %v2147_v43 = vsub.f32 %v4695_v56, %v2145_v63  ;;  %v2150_v1 = vsel %vm372_vm1, %v2148_v0, 0.0 }
0x170b   :  { %2151 = vadd.xlane.f32.xlu0 %v2150_v1 }
0x170c   :  { %v2149_v44 = vmul.f32 %v2147_v43, %v2147_v43 }
0x170e   :  { %v2153_v2 = vsel %vm372_vm1, %v2149_v44, 0.0 }
0x170f   :  { %2154 = vadd.xlane.f32.xlu1 %v2153_v2 }
0x1794   :  { %v2152_v4 = vpop.xlane.xlu0 %2151 }
0x1795   :  { %v2156_v5 = vmul.f32 0.03125, %v2152_v4  ;;  %v2457_v4 = vld [vmem:[%s4874_s3 + $0x10] sm:$0x77] }
0x1797   :  { %v2158_v6 = vadd.f32 1e-05, %v2156_v5  ;;  %v3412_v5 = vcombine.low %v2457_v4, %v2457_v4 }
0x1798   :  { %v2155_v51 = vpop.xlane.xlu1 %2154 }
0x1799   :  { %4077 = vrsqrt.f32 %v2158_v6  ;;  %v2157_v50 = vmul.f32 0.03125, %v2155_v51  ;;  %v3413_v6 = vcombine.high %v2457_v4, %v2457_v4  ;;  %v4148_v51 = vmov 65535   ;;  %v3947_v4 = vld [vmem:[%s4877_s19 + $0xb4] ss:$8 sps:$4 sm:$0xff]  }
0x179b   :  { %v2159_v7 = vadd.f32 1e-05, %v2157_v50  ;;  %v2492_v50 = vsel %vm2490_vm12, 4294967295, %v4148_v51  ;;  %v3948_v51 = vld [vmem:[%s4877_s19 + $0xa0] ss:$8 sps:$4 sm:$0xff]  }
0x179d   :  { %4079 = vrsqrt.f32 %v2159_v7 }
0x17a6   :  { %v4078_v49 = vpop.eup %4077 }
0x17a7   :  { %v2162_v8 = vmul.f32 %v4078_v49, %v2146_v61  ;;  %v3398_v61 = vld [vmem:[%s4873_s29 + $0x1] ss:$0 sm:$0xff] }
0x17a9   :  { %v2168_v14 = vmul.f32 %v3380_v11, %v2162_v8  ;;  %v3904_v8 = vld [vmem:[%s4874_s3] ss:$8 sps:$4 sm:$0xff]  }
0x17aa   :  { %v4080_v12 = vpop.eup %4079 }
0x17ab   :  { %v2163_v13 = vmul.f32 %v4080_v12, %v2147_v43  ;;  %v2174_v16 = vadd.f32 %v3381_v58, %v2168_v14 }
0x17ad   :  { %v2169_v15 = vmul.f32 %v3380_v11, %v2163_v13  ;;  %v2454_v11 = vld [vmem:[%s4875_s8] sm:$0xf] }
0x17ae   :  { %v2458_v12 = vpack.c.bf16 %v2454_v11, %v2454_v11 }
0x17af   :  { %v2175_v17 = vadd.f32 %v3381_v58, %v2169_v15 }
0x17b1   :  { %v2181_v18 = vpack.c.bf16 %v2175_v17, %v2174_v16  ;;  %v3907_v17 = vld [vmem:[%s4876_s14 + $0x8] sm:$0xff]  }
0x17b3   :  { %3770 = vmatmul.mubr.msk.bf16.vlgmr.msra.gmra.mxu0 %vm372_vm1, %v2181_v18  ;;  %v3908_v18 = vld [vmem:[%s4876_s14] sm:$0xff]  }
0x17b4   :  { %3789 = vmatprep.mubr.msk.bf16.mxu0 %vm4146_vm6, %v4145_v10  ;;  %3786 = vmatpush3.bf16.msra.mxu0 %v3907_v17  ;;  %v3963_v17 = vld [vmem:[%s4881_s22 + $0x50] ss:$8 sps:$4 sm:$0xff]  }
0x17b5   :  { %3787 = vmatprep.subr.bf16.mxu0 %v4145_v10 }
0x17b8   :  { %3788 = vmatpush3.bf16.msra.mxu0 %v3908_v18  ;;  %v3968_v18 = vld [vmem:[%s4881_s22 + $0x44] ss:$8 sps:$4 sm:$0xff]  }
0x17b9   :  { %2749 = vmatprep.subr.bf16.mxu0 %v3911_v19  ;;  %v3966_v19 = vld [vmem:[%s4881_s22 + $0x40] ss:$8 sps:$4 sm:$0xff]  }
0x1873   :  { %v2236_v24 = vpop.f32.mrf.mxu0 }
0x1874   :  { %v2237_v25 = vadd.f32 %v3386_v23, %v2236_v24 }
0x1875   :  { %v3771_v26 = vpop.f32.mrf.mxu0 }
0x1876   :  { %v2245_v27 = vmul.f32 0.044715, %v2237_v25  ;;  %v2243_v53 = vmul.f32 0.5, %v2237_v25 }
0x1877   :  { %v2239_v28 = vpop.f32.mrf.mxu0 }
0x1878   :  { %v2247_v29 = vmul.f32 %v2245_v27, %v2237_v25  ;;  %v2240_v30 = vadd.f32 %v3386_v23, %v2239_v28  ;;  %v4738_v27 = vld [vmem:[%s4878_s24] sm:$0x3] }
0x1879   :  { %v3772_v32 = vpop.f32.mrf.mxu0  ;;  %v2468_v10 = vrot.slane %v4738_v27, %v4373_v46 }
0x187a   :  { %v2249_v34 = vmul.f32 %v2247_v29, %v2237_v25  ;;  %v2246_v35 = vmul.f32 0.044715, %v2240_v30  ;;  %v2244_v55 = vmul.f32 0.5, %v2240_v30 }
0x187c   :  { %v2251_v37 = vadd.f32 %v2249_v34, %v2237_v25  ;;  %v2248_v38 = vmul.f32 %v2246_v35, %v2240_v30  ;;  %v3405_v34 = vld [vmem:[%s4880_s6] ss:$0 sm:$0xff] }
0x187e   :  { %v2253_v40 = vmul.f32 0.7978846, %v2251_v37  ;;  %v2250_v41 = vmul.f32 %v2248_v38, %v2240_v30 }
0x1880   :  { %4081 = vtanh.f32 %v2253_v40  ;;  %v2252_v42 = vadd.f32 %v2250_v41, %v2240_v30  ;;  %v3404_v30 = vld [vmem:[%s4879_s30] ss:$0 sm:$0xff]  ;;  %v3909_v40 = vld [vmem:[%s4877_s19 + $0x70] ss:$8 sps:$4 sm:$0xff]  }
0x1882   :  { %v2254_v47 = vmul.f32 0.7978846, %v2252_v42 }
0x1884   :  { %4083 = vtanh.f32 %v2254_v47  ;;  %v3914_v47 = vld [vmem:[%s4877_s19 + $0x64] ss:$8 sps:$4 sm:$0xff]  }
0x188d   :  { %v4082_v48 = vpop.eup %4081 }
0x188e   :  { %v2257_v39 = vadd.f32 1.0, %v4082_v48  ;;  %v3912_v48 = vld [vmem:[%s4877_s19 + $0x60] ss:$8 sps:$4 sm:$0xff]  }
0x1890   :  { %v2259_v33 = vmul.f32 %v2257_v39, %v2243_v53  ;;  %v3917_v39 = vld [vmem:[%s4877_s19 + $0x54] ss:$8 sps:$4 sm:$0xff]   ;;  %v3920_v53 = vld [vmem:[%s4877_s19 + $0x44] ss:$8 sps:$4 sm:$0xff]  }
0x1891   :  { %v4084_v31 = vpop.eup %4083 }
0x1892   :  { %v2258_v36 = vadd.f32 1.0, %v4084_v31  ;;  %v3915_v31 = vld [vmem:[%s4877_s19 + $0x50] ss:$8 sps:$4 sm:$0xff]  }
0x1894   :  { %v2260_v57 = vmul.f32 %v2258_v36, %v2244_v55  ;;  %v3918_v55 = vld [vmem:[%s4877_s19 + $0x40] ss:$8 sps:$4 sm:$0xff]   ;;  %v3923_v36 = vld [vmem:[%s4877_s19 + $0x34] ss:$8 sps:$4 sm:$0xff]  }
0x1896   :  { %v2270_v59 = vpack.c.bf16 %v2260_v57, %v2259_v33  ;;  %v3921_v33 = vld [vmem:[%s4877_s19 + $0x30] ss:$8 sps:$4 sm:$0xff]   ;;  %v3926_v57 = vld [vmem:[%s4877_s19 + $0x24] ss:$8 sps:$4 sm:$0xff]  }
0x1898   :  { %3782 = vmatmul.mubr.msk.bf16.vlgmr.msra.gmra.mxu1 %vm153_vm0, %v2270_v59  ;;  %v3924_v59 = vld [vmem:[%s4877_s19 + $0x20] ss:$8 sps:$4 sm:$0xff]  }
0x1899   :  { %2532 = vmatprep.mubr.bf16.mxu1 %v4144_v9 }
0x1958   :  { %v2337_v60 = vpop.f32.mrf.mxu1 }
0x1959   :  { %v2338_v0 = vadd.f32 %v3398_v61, %v2337_v60  ;;  %v3929_v60 = vld [vmem:[%s4877_s19 + $0x14] ss:$8 sps:$4 sm:$0xff]  }
0x195a   :  { %v3783_v62 = vpop.f32.mrf.mxu1 }
0x195b   :  { %v2344_v2 = vadd.f32 %v2338_v0, %v4690_v52  ;;  %v3906_v52 = vld [vmem:[%s4874_s3 + $0x4] ss:$8 sps:$4 sm:$0xff]   ;;  %v3935_v0 = vld [vmem:[%s4877_s19 + $0xf4] ss:$8 sps:$4 sm:$0xff]  }
0x195c   :  { %v2340_v63 = vpop.f32.mrf.mxu1  ;;  %v3932_v62 = vld [vmem:[%s4877_s19 + $0x4] ss:$8 sps:$4 sm:$0xff]  }
0x195d   :  { %v2341_v43 = vadd.f32 %v3398_v61, %v2340_v63  ;;  %v3927_v61 = vld [vmem:[%s4877_s19 + $0x10] ss:$8 sps:$4 sm:$0xff]   ;;  %v3930_v63 = vld [vmem:[%s4877_s19] ss:$8 sps:$4 sm:$0xff]  }
0x195e   :  { %v3784_v1 = vpop.f32.mrf.mxu1 }
0x195f   :  { %v2345_v44 = vadd.f32 %v2341_v43, %v4695_v56  ;;  %v2493_v56 = vsel %vm2491_vm13, %v2492_v50, 0  ;;  %v3933_v43 = vld [vmem:[%s4877_s19 + $0xf0] ss:$8 sps:$4 sm:$0xff]   ;;  %v3938_v1 = vld [vmem:[%s4877_s19 + $0xe4] ss:$8 sps:$4 sm:$0xff]   ;;  %v2464_v50 = vrot.slane %v4738_v27, %v4371_v45 }
0x1960   :  { %v2495_v7 = vand.u32 %v3412_v5, %v2493_v56  ;;  %v2498_v49 = vand.u32 %v3413_v6, %v2493_v56  ;;  %v3945_v5 = vld [vmem:[%s4877_s19 + $0xb0] ss:$8 sps:$4 sm:$0xff]   ;;  %v3950_v6 = vld [vmem:[%s4877_s19 + $0xa4] ss:$8 sps:$4 sm:$0xff]   ;;  %v3953_v56 = vld [vmem:[%s4877_s19 + $0x94] ss:$8 sps:$4 sm:$0xff]  }
0x1961   :  { %v2347_v3 = vrot.slane %v2345_v44, 7  ;;  %v3936_v44 = vld [vmem:[%s4877_s19 + $0xe0] ss:$8 sps:$4 sm:$0xff]  }
0x1962   :  { %2512 = vmatprep.subr.bf16.mxu1 %v2498_v49  ;;  %v3978_v27 = vld [vmem:[%s4881_s22] ss:$8 sps:$4 sm:$0xff]  }
0x1963   :  { %v2350_v54 = vsel %vm2349_vm10, %v2344_v2, %v2347_v3  ;;  %2513 = vmatpush1.bf16.msra.mxu1 %v2495_v7  ;;  %v3941_v2 = vld [vmem:[%s4877_s19 + $0xd4] ss:$8 sps:$4 sm:$0xff]   ;;  %v3939_v3 = vld [vmem:[%s4877_s19 + $0xd0] ss:$8 sps:$4 sm:$0xff]  }
0x1964   :  { %v2354_v9 = vsel %vm2353_vm11, %v2350_v54, 0.0  ;;  %2514 = vmatprep.subr.bf16.mxu1 %v3906_v52  ;;  %v3951_v7 = vld [vmem:[%s4877_s19 + $0x90] ss:$8 sps:$4 sm:$0xff]   ;;  %v3956_v52 = vld [vmem:[%s4877_s19 + $0x84] ss:$8 sps:$4 sm:$0xff]  }
0x1965   :  { %2355 = vadd.xlane.f32.xlu0 %v2354_v9  ;;  %v3942_v9 = vld [vmem:[%s4877_s19 + $0xc0] ss:$8 sps:$4 sm:$0xff]  }
0x1967   :  { %2515 = vmatpush1.bf16.msra.mxu1 %v3904_v8  ;;  %v3954_v8 = vld [vmem:[%s4877_s19 + $0x80] ss:$8 sps:$4 sm:$0xff]  }
0x196a   :  { %3414 = vmatmul.mubr.msk.bf16.vlgmr.msra.gmra.mxu1 %vm2486_vm14, %v2458_v12 }
0x19ee   :  { %v2356_v13 = vpop.xlane.xlu0 %2355 }
0x19ef   :  { %v2357_v14 = vmul.f32 0.03125, %v2356_v13  ;;  %v3957_v13 = vld [vmem:[%s4881_s22 + $0x70] ss:$8 sps:$4 sm:$0xff]  }
0x19f1   :  { %v2358_v58 = vsub.f32 %v2350_v54, %v2357_v14  ;;  %v3944_v54 = vld [vmem:[%s4877_s19 + $0xc4] ss:$8 sps:$4 sm:$0xff]   ;;  %v3959_v14 = vld [vmem:[%s4881_s22 + $0x74] ss:$8 sps:$4 sm:$0xff]  }
0x19f2   :  { %2998 = vmatprep.subr.bf16.mxu1 %v3959_v14  ;;  %v4017_v14 = vld [vmem:[%s4318_s27 + $0x48] sm:$0xff]  }
0x19f3   :  { %v2359_v15 = vmul.f32 %v2358_v58, %v2358_v58  ;;  %2999 = vmatpush1.bf16.msra.mxu1 %v3957_v13 }
0x19f5   :  { %v2360_v16 = vsel %vm2353_vm11, %v2359_v15, 0.0  ;;  %v3960_v15 = vld [vmem:[%s4881_s22 + $0x60] ss:$8 sps:$4 sm:$0xff]  }
0x19f6   :  { %2361 = vadd.xlane.f32.xlu1 %v2360_v16  ;;  %v3965_v16 = vld [vmem:[%s4881_s22 + $0x54] ss:$8 sps:$4 sm:$0xff]  }
0x1a2a   :  { %v4735_v20 = vpop.f32.mrf.mxu1 }
0x1a2b   :  { %v2535_v49 = vadd.f32 %v4735_v20, %v2464_v50  ;;  %v3971_v20 = vld [vmem:[%s4881_s22 + $0x34] ss:$8 sps:$4 sm:$0xff]  }
0x1a2c   :  { %v2536_v21 = vpop.f32.mrf.mxu1 }
0x1a2d   :  { %v2537_v28 = vadd.f32 %v2536_v21, %v2468_v10  ;;  %v2541_v11 = vmax.f32 %v2535_v49, 0.0  ;;  %v3969_v21 = vld [vmem:[%s4881_s22 + $0x30] ss:$8 sps:$4 sm:$0xff]   ;;  %v3983_v10 = vld [vmem:[%s4881_s22 + $0xf4] ss:$8 sps:$4 sm:$0xff]  }
0x1a2e   :  { %v2538_v22 = vpop.f32.mrf.mxu1 }
0x1a2f   :  { %v2542_v35 = vmax.f32 %v2537_v28, 0.0  ;;  %v2575_v12 = vpack.c.bf16 %v2541_v11, %v2541_v11  ;;  %v3974_v22 = vld [vmem:[%s4881_s22 + $0x24] ss:$8 sps:$4 sm:$0xff]   ;;  %v3981_v28 = vld [vmem:[%s4881_s22 + $0xf0] ss:$8 sps:$4 sm:$0xff]  }
0x1a30   :  { %v2539_v23 = vpop.f32.mrf.mxu1 }
0x1a31   :  { %v2576_v41 = vpack.c.bf16 %v2542_v35, %v2542_v35  ;;  %v3972_v23 = vld [vmem:[%s4881_s22 + $0x20] ss:$8 sps:$4 sm:$0xff]   ;;  %v3992_v35 = vld [vmem:[%s4881_s22 + $0xc4] ss:$8 sps:$4 sm:$0xff]  }
0x1a7f   :  { %v2362_v24 = vpop.xlane.xlu1 %2361 }
0x1a80   :  { %v2363_v25 = vmul.f32 0.03125, %v2362_v24  ;;  %v3977_v24 = vld [vmem:[%s4881_s22 + $0x14] ss:$8 sps:$4 sm:$0xff]  }
0x1a82   :  { %v2364_v26 = vadd.f32 1e-05, %v2363_v25  ;;  %v3975_v25 = vld [vmem:[%s4881_s22 + $0x10] ss:$8 sps:$4 sm:$0xff]  }
0x1a84   :  { %4085 = vrsqrt.f32 %v2364_v26  ;;  %v3980_v26 = vld [vmem:[%s4881_s22 + $0x4] ss:$8 sps:$4 sm:$0xff]  }
0x1a91   :  { %v4086_v29 = vpop.eup %4085 }
0x1a92   :  { %v2366_v32 = vmul.f32 %v4086_v29, %v2358_v58  ;;  %v3962_v58 = vld [vmem:[%s4881_s22 + $0x64] ss:$8 sps:$4 sm:$0xff]  }
0x1a93   :  { %3000 = vmatprep.subr.bf16.mxu1 %v3962_v58  ;;  %v3986_v29 = vld [vmem:[%s4881_s22 + $0xe4] ss:$8 sps:$4 sm:$0xff]  }
0x1a94   :  { %v2373_v37 = vmul.f32 %v3404_v30, %v2366_v32  ;;  %3001 = vmatpush1.bf16.msra.mxu1 %v3960_v15  ;;  %v3984_v30 = vld [vmem:[%s4881_s22 + $0xe0] ss:$8 sps:$4 sm:$0xff]   ;;  %v3989_v32 = vld [vmem:[%s4881_s22 + $0xd4] ss:$8 sps:$4 sm:$0xff]  }
0x1a95   :  { %3002 = vmatprep.subr.bf16.mxu1 %v3965_v16  ;;  %v4018_v58 = vld [vmem:[%s4318_s27 + $0x8] sm:$0xff]   ;;  %v4019_v15 = vld [vmem:[%s4318_s27 + $0x40] sm:$0xff]  }
0x1a96   :  { %v2380_v38 = vadd.f32 %v3405_v34, %v2373_v37  ;;  %v3987_v34 = vld [vmem:[%s4881_s22 + $0xd0] ss:$8 sps:$4 sm:$0xff]   ;;  %v3990_v37 = vld [vmem:[%s4881_s22 + $0xc0] ss:$8 sps:$4 sm:$0xff]  }
0x1a97   :  { %v4020_v16 = vld [vmem:[%s4318_s27] sm:$0xff]  }
0x1a98   :  { %v2385_v42 = vpack.c.bf16 %v2380_v38, %v2380_v38  ;;  %3003 = vmatpush1.bf16.msra.mxu1 %v3963_v17  ;;  %v3995_v38 = vld [vmem:[%s4881_s22 + $0xb4] ss:$8 sps:$4 sm:$0xff]   ;;  %v2826_v17 = vld [vmem:[%s4884_s28] sm:$0x3] }
0x1a99   :  { %3004 = vmatprep.subr.bf16.mxu1 %v3968_v18  ;;  %v2831_v18 = vrot.slane %v2826_v17, %v4371_v45 }
0x1a9a   :  { %3790 = vmatmul.mubr.msk.bf16.vlgmr.msra.gmra.mxu0 %vm372_vm1, %v2385_v42  ;;  %v3996_v42 = vld [vmem:[%s4881_s22 + $0xa0] ss:$8 sps:$4 sm:$0xff]  }
0x1a9b   :  { %2750 = vmatpush1.bf16.msra.mxu0 %v3909_v40  ;;  %2781 = vmatprep.mubr.bf16.mxu0 %v2576_v41  ;;  %v3993_v40 = vld [vmem:[%s4881_s22 + $0xb0] ss:$8 sps:$4 sm:$0xff]   ;;  %v3998_v41 = vld [vmem:[%s4881_s22 + $0xa4] ss:$8 sps:$4 sm:$0xff]  }
0x1a9c   :  { %2751 = vmatprep.subr.bf16.mxu0 %v3914_v47  ;;  %3005 = vmatpush1.bf16.msra.mxu1 %v3966_v19  ;;  %v4001_v47 = vld [vmem:[%s4881_s22 + $0x94] ss:$8 sps:$4 sm:$0xff]   ;;  %v2835_v19 = vrot.slane %v2826_v17, %v4373_v46 }
0x1a9d   :  { %3006 = vmatprep.subr.bf16.mxu1 %v3971_v20 }
0x1a9f   :  { %2752 = vmatpush1.bf16.msra.mxu0 %v3912_v48  ;;  %v3999_v48 = vld [vmem:[%s4881_s22 + $0x90] ss:$8 sps:$4 sm:$0xff]  }
0x1aa0   :  { %2753 = vmatprep.subr.bf16.mxu0 %v3917_v39  ;;  %3007 = vmatpush1.bf16.msra.mxu1 %v3969_v21  ;;  %v4004_v39 = vld [vmem:[%s4881_s22 + $0x84] ss:$8 sps:$4 sm:$0xff]  }
0x1aa1   :  { %3008 = vmatprep.subr.bf16.mxu1 %v3974_v22 }
0x1aa3   :  { %2754 = vmatpush1.bf16.msra.mxu0 %v3915_v31  ;;  %v4002_v31 = vld [vmem:[%s4881_s22 + $0x80] ss:$8 sps:$4 sm:$0xff]  }
0x1aa4   :  { %2755 = vmatprep.subr.bf16.mxu0 %v3920_v53  ;;  %3009 = vmatpush1.bf16.msra.mxu1 %v3972_v23  ;;  %v4005_v53 = vld [vmem:[%s4318_s27 + $0x78] sm:$0xff]  }
0x1aa5   :  { %3010 = vmatprep.subr.bf16.mxu1 %v3977_v24 }
0x1aa7   :  { %2756 = vmatpush1.bf16.msra.mxu0 %v3918_v55  ;;  %v4006_v55 = vld [vmem:[%s4318_s27 + $0x38] sm:$0xff]  }
0x1aa8   :  { %2757 = vmatprep.subr.bf16.mxu0 %v3923_v36  ;;  %3011 = vmatpush1.bf16.msra.mxu1 %v3975_v25  ;;  %v4007_v36 = vld [vmem:[%s4318_s27 + $0x70] sm:$0xff]  }
0x1aa9   :  { %3012 = vmatprep.subr.bf16.mxu1 %v3980_v26 }
0x1aab   :  { %2758 = vmatpush1.bf16.msra.mxu0 %v3921_v33  ;;  %v4008_v33 = vld [vmem:[%s4318_s27 + $0x30] sm:$0xff]  }
0x1aac   :  { %2759 = vmatprep.subr.bf16.mxu0 %v3926_v57  ;;  %3013 = vmatpush1.bf16.msra.mxu1 %v3978_v27  ;;  %v4009_v57 = vld [vmem:[%s4318_s27 + $0x68] sm:$0xff]  }
0x1aad   :  { %3014 = vmatprep.subr.bf16.mxu1 %v3983_v10 }
0x1aaf   :  { %2760 = vmatpush1.bf16.msra.mxu0 %v3924_v59  ;;  %v4010_v59 = vld [vmem:[%s4318_s27 + $0x28] sm:$0xff]  }
0x1ab0   :  { %2761 = vmatprep.subr.bf16.mxu0 %v3929_v60  ;;  %3015 = vmatpush2.bf16.msra.mxu1 %v3981_v28  ;;  %v4011_v60 = vld [vmem:[%s4318_s27 + $0x60] sm:$0xff]  }
0x1ab1   :  { %3016 = vmatprep.subr.bf16.mxu1 %v3986_v29 }
0x1ab3   :  { %2762 = vmatpush1.bf16.msra.mxu0 %v3927_v61  ;;  %v4012_v61 = vld [vmem:[%s4318_s27 + $0x20] sm:$0xff]  }
0x1ab4   :  { %2763 = vmatprep.subr.bf16.mxu0 %v3932_v62  ;;  %3017 = vmatpush2.bf16.msra.mxu1 %v3984_v30  ;;  %v4013_v62 = vld [vmem:[%s4318_s27 + $0x58] sm:$0xff]  }
0x1ab5   :  { %3018 = vmatprep.subr.bf16.mxu1 %v3989_v32 }
0x1ab7   :  { %2764 = vmatpush1.bf16.msra.mxu0 %v3930_v63  ;;  %v4014_v63 = vld [vmem:[%s4318_s27 + $0x18] sm:$0xff]  }
0x1ab8   :  { %2765 = vmatprep.subr.bf16.mxu0 %v3935_v0  ;;  %3019 = vmatpush2.bf16.msra.mxu1 %v3987_v34  ;;  %v4015_v0 = vld [vmem:[%s4318_s27 + $0x50] sm:$0xff]  }
0x1ab9   :  { %3020 = vmatprep.subr.bf16.mxu1 %v3992_v35 }
0x1abb   :  { %2766 = vmatpush2.bf16.msra.mxu0 %v3933_v43  ;;  %v4016_v43 = vld [vmem:[%s4318_s27 + $0x10] sm:$0xff]   ;;  %s4149_s27 = smov [#allocation2]  }
0x1abc   :  { %2767 = vmatprep.subr.bf16.mxu0 %v3938_v1  ;;  %3021 = vmatpush2.bf16.msra.mxu1 %v3990_v37  ;;  %v3406_v1 = vld [vmem:[%s4882_s23] ss:$0 sm:$0xff]  ;;  %s3226_s1 = sshll.u32 %s4149_s27, 4  ;;  %s3227_s1 = int_to_ptr.vmem [resolvable:$true] %s3226_s1 }
0x1abd   :  { %3022 = vmatprep.subr.bf16.mxu1 %v3995_v38  ;;  %s4087_s2 = scalar_lea.vmem %s3227_s1, 32  ;;  %p4092_p1 = scmp.lt.s32.totalorder %s3227_s1, %s3227_s1 }
0x1abe   :  { %p4088_p0 = scmp.ne.s32.totalorder %s3227_s1, %s4087_s2  ;;  %p4093_p2 = scmp.lt.s32.totalorder %s4087_s2, %s4087_s2 }
0x1abf   :  { %2768 = vmatpush2.bf16.msra.mxu0 %v3936_v44 }
0x1ac0   :  { %2769 = vmatprep.subr.bf16.mxu0 %v3941_v2  ;;  %3023 = vmatpush2.bf16.msra.mxu1 %v3993_v40  ;;  %p4094_p3 = por %p4093_p2, %p4092_p1 }
0x1ac1   :  { %3024 = vmatprep.subr.bf16.mxu1 %v3998_v41 }
0x1ac2   :  { %p4095_p4 = pnand %p4094_p3, %p4088_p0 }
0x1ac3   :  { %2770 = vmatpush2.bf16.msra.mxu0 %v3939_v3 }
0x1ac4   :  { %2771 = vmatprep.subr.bf16.mxu0 %v3944_v54  ;;  %3025 = vmatpush2.bf16.msra.mxu1 %v3996_v42 }
0x1ac5   :  { %3026 = vmatprep.subr.bf16.mxu1 %v4001_v47 }
0x1ac7   :  { %2772 = vmatpush2.bf16.msra.mxu0 %v3942_v9 }
0x1ac8   :  { %2773 = vmatprep.subr.bf16.mxu0 %v3947_v4  ;;  %3027 = vmatpush2.bf16.msra.mxu1 %v3999_v48  ;;  %v2577_v4 = vld [vmem:[%s4883_s26] sm:$0x3] }
0x1ac9   :  { %3028 = vmatprep.subr.bf16.mxu1 %v4004_v39 }
0x1acb   :  { %2774 = vmatpush2.bf16.msra.mxu0 %v3945_v5  ;;  %v2582_v5 = vrot.slane %v2577_v4, %v4371_v45 }
0x1acc   :  { %2775 = vmatprep.subr.bf16.mxu0 %v3950_v6  ;;  %3029 = vmatpush2.bf16.msra.mxu1 %v4002_v31  ;;  %v2586_v6 = vrot.slane %v2577_v4, %v4373_v46 }
0x1acf   :  { %2776 = vmatpush2.bf16.msra.mxu0 %v3948_v51 }
0x1ad0   :  { %2777 = vmatprep.subr.bf16.mxu0 %v3953_v56 }
0x1ad3   :  { %2778 = vmatpush2.bf16.msra.mxu0 %v3951_v7 }
0x1ad4   :  { %2779 = vmatprep.subr.bf16.mxu0 %v3956_v52 }
0x1ad7   :  { %2780 = vmatpush2.bf16.msra.mxu0 %v3954_v8 }
0x1ad8   :  { %3571 = vmatprep.subr.bf16.mxu0 %v4005_v53 }
0x1ada   :  { %2782 = vmatmul.mubr.bf16.vlgmr.msra.gmra.mxu0 %v2575_v12 }
0x1adb   :  { %3572 = vmatpush3.bf16.msra.mxu0 %v4006_v55 }
0x1adc   :  { %3573 = vmatprep.subr.bf16.mxu0 %v4007_v36 }
0x1adf   :  { %3574 = vmatpush3.bf16.msra.mxu0 %v4008_v33 }
0x1ae0   :  { %3575 = vmatprep.subr.bf16.mxu0 %v4009_v57 }
0x1ae3   :  { %3576 = vmatpush3.bf16.msra.mxu0 %v4010_v59 }
0x1ae4   :  { %3577 = vmatprep.subr.bf16.mxu0 %v4011_v60 }
0x1ae7   :  { %3578 = vmatpush3.bf16.msra.mxu0 %v4012_v61 }
0x1ae8   :  { %3579 = vmatprep.subr.bf16.mxu0 %v4013_v62 }
0x1aeb   :  { %3580 = vmatpush3.bf16.msra.mxu0 %v4014_v63 }
0x1aec   :  { %3581 = vmatprep.subr.bf16.mxu0 %v4015_v0 }
0x1aef   :  { %3582 = vmatpush3.bf16.msra.mxu0 %v4016_v43 }
0x1af0   :  { %3583 = vmatprep.subr.bf16.mxu0 %v4017_v14 }
0x1af3   :  { %3584 = vmatpush3.bf16.msra.mxu0 %v4018_v58 }
0x1af4   :  { %3585 = vmatprep.subr.bf16.mxu0 %v4019_v15 }
0x1af7   :  { %3586 = vmatpush3.bf16.msra.mxu0 %v4020_v16 }
0x1b5a   :  { %v2442_v44 = vpop.f32.mrf.mxu0 }
0x1b5b   :  { %v2443_v2 = vadd.f32 %v3406_v1, %v2442_v44 }
0x1b5c   :  { %v3791_v3 = vpop.f32.mrf.mxu0 }
0x1b5d   :  { %2449 = vst.msk [vmem:[#allocation2] sm:$0x3] %vm2448_vm15, %v2443_v2 }
0x1b5e   :  { %v2445_v54 = vpop.f32.mrf.mxu0 }
0x1b60   :  { %v3792_v9 = vpop.f32.mrf.mxu0 }
0x1b9a   :  { %v2783_v51 = vpop.f32.mrf.mxu0 }
0x1b9b   :  { %v2784_v50 = vadd.f32 %v2783_v51, %v2582_v5 }
0x1b9c   :  { %v2785_v56 = vpop.f32.mrf.mxu0 }
0x1b9d   :  { %v2786_v7 = vadd.f32 %v2785_v56, %v2586_v6  ;;  %v2790_v49 = vmax.f32 %v2784_v50, 0.0 }
0x1b9e   :  { %v2787_v52 = vpop.f32.mrf.mxu0 }
0x1b9f   :  { %v2791_v8 = vmax.f32 %v2786_v7, 0.0  ;;  %v2824_v13 = vpack.c.bf16 %v2790_v49, %v2790_v49 }
0x1ba0   :  { %v2788_v11 = vpop.f32.mrf.mxu0 }
0x1ba1   :  { %v2825_v12 = vpack.c.bf16 %v2791_v8, %v2791_v8 }
0x1ba3   :  { %3030 = vmatprep.mubr.bf16.mxu1 %v2825_v12 }
0x1ba4   :  { %3031 = vmatmul.mubr.bf16.vlgmr.msra.gmra.mxu1 %v2824_v13 }
0x1c64   :  { %v3032_v20 = vpop.f32.mrf.mxu1 }
0x1c65   :  { %v3033_v21 = vadd.f32 %v3032_v20, %v2831_v18 }
0x1c66   :  { %v3034_v22 = vpop.f32.mrf.mxu1 }
0x1c67   :  { %v3035_v23 = vadd.f32 %v3034_v22, %v2835_v19  ;;  %v3039_v24 = vmax.f32 %v3033_v21, 0.0 }
0x1c68   :  { %v3036_v25 = vpop.f32.mrf.mxu1 }
0x1c69   :  { %v3040_v26 = vmax.f32 %v3035_v23, 0.0  ;;  %v3073_v28 = vpack.c.bf16 %v3039_v24, %v3039_v24 }
0x1c6a   :  { %v3037_v27 = vpop.f32.mrf.mxu1 }
0x1c6b   :  { %v3074_v10 = vpack.c.bf16 %v3040_v26, %v3040_v26 }
0x1c6d   :  { %3210 = vmatprep.mubr.bf16.mxu0 %v3074_v10 }
0x1c6e   :  { %3211 = vmatmul.mubr.bf16.vlgmr.msra.gmra.mxu0 %v3073_v28 }
0x1c6f   :  { %4098 = shalt.err (!%p4095_p4)
}
0x1c70   :  { %3229 = dma.vmem_to_hbm [thread:$0]  %s3227_s1, 32, %s4328_s12, [#allocation3]   ;;  %v3479_v46 = vld [vmem:[%s4323_s4] ss:$0 sm:$0xff]  ;;  %vm3218_vm0 = vcmask 125952  }
0x1d2e   :  { %v3587_v45 = vpop.f32.mrf.mxu0 }
0x1d30   :  { %v3588_v29 = vpop.f32.mrf.mxu0 }
0x1d31   :  { %v3589_v30 = vadd.f32 %v3588_v29, %v3587_v45 }
0x1d32   :  { %v3590_v32 = vpop.f32.mrf.mxu0 }
0x1d33   :  { %v3213_v34 = vadd.f32 %v3589_v30, %v3479_v46 }
0x1d34   :  { %v3591_v35 = vpop.f32.mrf.mxu0 }
0x1d35   :  { %3219 = vst.msk [vmem:[%s4333_s20] sm:$0xf] %vm3218_vm0, %v3213_v34 }
0x1d36   :  { %4107 = dma.done.wait [#allocation3], 32  }
0x1d37   :  { %4108 = vsyncadd [#allocation3], 4294967264 }
0x1d38   :  { %3237 = vsyncpa [#allocation3], 1 }

</bundles_post_ra>
